<compile_context>
chip_gen: v5e
topology: v5e:2x2
jax: 0.10.0
libtpu: 0.0.40
codegen_flags: <defaults>
</compile_context>

<pallas_src>
import functools

import jax
import jax.numpy as jnp
from jax.experimental import pallas as pl
from jax.experimental.pallas import tpu as pltpu


# ----------------------------------------------------------------------------
# Generation-aware VMEM budget (v5e/v6e: 128 MiB physical, v7x: 64 MiB per TC).
# ----------------------------------------------------------------------------
@functools.lru_cache(maxsize=None)
def _vmem_limit_bytes():
    try:
        cap = int(pltpu.get_tpu_info().vmem_capacity_bytes)
    except Exception:
        cap = 0
    if cap <= 0:
        return 32 * 1024 * 1024               # conservative fallback, valid everywhere
    # ~25% headroom for Mosaic-internal scratch; cap at 96 MiB.
    return max(32 * 1024 * 1024, min((cap * 3) // 4, 96 * 1024 * 1024))


def _pick_tile_m(m, max_tile):
    """Row-tile size that divides m exactly (no wrapper-side jnp.pad), is a
    multiple of 8 (or the full dim), and yields >=2 grid steps when m is large
    enough to be worth splitting across v7x's two TensorCores."""
    if m <= max_tile:
        half = m // 2
        if m % 2 == 0 and half % 8 == 0 and half >= 256:
            return half                        # >=2 steps so both v7x TCs get work
        return m
    cap = (max_tile // 8) * 8
    for t in range(cap, 7, -8):
        if m % t == 0:
            return t
    return 0                                   # no nice divisor: caller pads (last resort)


# ----------------------------------------------------------------------------
# Pallas kernel 1: fused  out = act(x @ w + b)   (conv-as-matmul)
# ----------------------------------------------------------------------------
def _matmul_bias_act_kernel(x_ref, w_ref, b_ref, o_ref, *, apply_relu):
    acc = jnp.dot(x_ref[...], w_ref[...], preferred_element_type=jnp.float32)
    acc = acc + b_ref[...]                     # (1, N) f32, broadcast over the M tile
    if apply_relu:
        acc = jnp.maximum(acc, 0.0)
    o_ref[...] = acc.astype(o_ref.dtype)


def matmul_bias_act(x, w, b, *, apply_relu, out_dtype, max_tile_m=2048):
    """x: (M, K) compute dtype, w: (K, N) compute dtype, b: (1, N) f32 -> (M, N)."""
    M, K = x.shape
    Kw, N = w.shape
    assert K == Kw and b.shape == (1, N)
    tm = _pick_tile_m(M, max_tile_m)
    if tm == 0:                                # last resort only (never hit in tests)
        tm = max_tile_m
        x = jnp.pad(x, ((0, (-M) % tm), (0, 0)))
    mp = x.shape[0]
    isz = jnp.dtype(x.dtype).itemsize
    cost = pl.CostEstimate(
        flops=2 * mp * K * N, transcendentals=0,
        bytes_accessed=(mp * K + K * N) * isz + N * 4
        + mp * N * jnp.dtype(out_dtype).itemsize)
    out = pl.pallas_call(
        functools.partial(_matmul_bias_act_kernel, apply_relu=apply_relu),
        out_shape=jax.ShapeDtypeStruct((mp, N), out_dtype),
        grid=(mp // tm,),
        in_specs=[
            pl.BlockSpec((tm, K), lambda i: (i, 0)),   # streamed M tiles (pipelined)
            pl.BlockSpec((K, N), lambda i: (0, 0)),    # weights stay VMEM-resident
            pl.BlockSpec((1, N), lambda i: (0, 0)),    # bias (f32) VMEM-resident
        ],
        out_specs=pl.BlockSpec((tm, N), lambda i: (i, 0)),
        compiler_params=pltpu.CompilerParams(
            dimension_semantics=("parallel",),
            vmem_limit_bytes=_vmem_limit_bytes(),
        ),
        cost_estimate=cost,
    )(x, w, b)
    return out if mp == M else out[:M]


# ----------------------------------------------------------------------------
# Pallas kernel 2: fused fc tail  out = (relu(x @ w1 + b1)) @ w2 + b2
# (512-wide intermediate lives only in VMEM/registers; output is 128 lanes wide)
# ----------------------------------------------------------------------------
def _mlp_head_kernel(x_ref, w1_ref, b1_ref, w2_ref, b2_ref, o_ref, *, compute_dtype):
    h = jnp.dot(x_ref[...], w1_ref[...], preferred_element_type=jnp.float32)
    h = jnp.maximum(h + b1_ref[...], 0.0)
    acc = jnp.dot(h.astype(compute_dtype), w2_ref[...],
                  preferred_element_type=jnp.float32)
    o_ref[...] = (acc + b2_ref[...]).astype(o_ref.dtype)


def mlp_head(x, w1, b1, w2, b2, *, max_tile_m=512):
    M, F = x.shape
    F2, H = w1.shape
    H2, NP = w2.shape
    assert F == F2 and H == H2
    compute_dtype = x.dtype
    tm = _pick_tile_m(M, max_tile_m)
    if tm == 0:
        tm = max_tile_m
        x = jnp.pad(x, ((0, (-M) % tm), (0, 0)))
    mp = x.shape[0]
    isz = jnp.dtype(compute_dtype).itemsize
    cost = pl.CostEstimate(
        flops=2 * mp * (F * H + H * NP), transcendentals=0,
        bytes_accessed=(mp * F + F * H + H * NP) * isz + (H + NP) * 4 + mp * NP * 4)
    # TODO(synk): cross-call prefetch of w1/w2 (start the DMA in a tiny pallas_call
    # before conv1 and hand back a semaphore + VMEM ref) so the fc1 weight fetch
    # overlaps the conv layers for small-batch serving.
    out = pl.pallas_call(
        functools.partial(_mlp_head_kernel, compute_dtype=compute_dtype),
        out_shape=jax.ShapeDtypeStruct((mp, NP), jnp.float32),
        grid=(mp // tm,),
        in_specs=[
            pl.BlockSpec((tm, F), lambda i: (i, 0)),
            pl.BlockSpec((F, H), lambda i: (0, 0)),
            pl.BlockSpec((1, H), lambda i: (0, 0)),
            pl.BlockSpec((H, NP), lambda i: (0, 0)),
            pl.BlockSpec((1, NP), lambda i: (0, 0)),
        ],
        out_specs=pl.BlockSpec((tm, NP), lambda i: (i, 0)),
        compiler_params=pltpu.CompilerParams(
            dimension_semantics=("parallel",),
            vmem_limit_bytes=_vmem_limit_bytes(),
        ),
        cost_estimate=cost,
    )(x, w1, b1, w2, b2)
    return out if mp == M else out[:M]


# ----------------------------------------------------------------------------
# Conv layer = NHWC patch extraction (plain-JAX glue) + grouped lane-dense matmul
# ----------------------------------------------------------------------------
def conv2d_relu(x, w_bd, b_tiled, *, ksize, stride, cout):
    """x: (N, H, W, Cin) NHWC compute dtype.
    w_bd: (Gmax*K, Gmax*Cout) block-diagonal weight (K = KH*KW*Cin, Gmax = 128//Cout).
    b_tiled: (1, Gmax*Cout) f32 bias tiled Gmax times."""
    n, h, w, cin = x.shape
    oh = (h - ksize) // stride + 1
    ow = (w - ksize) // stride + 1
    k = ksize * ksize * cin
    gmax = max(1, 128 // cout)
    assert w_bd.shape == (gmax * k, gmax * cout)

    # TODO(synk): move this KH*KW patch gather into the Pallas kernel (banded input
    # BlockSpec + per-tap dots accumulated into an f32 VMEM scratch) so the im2col
    # matrix is never materialized in HBM for large batches.
    taps = []
    for i in range(ksize):
        for j in range(ksize):
            taps.append(
                jax.lax.slice(
                    x,
                    (0, i, j, 0),
                    (n, i + stride * (oh - 1) + 1, j + stride * (ow - 1) + 1, cin),
                    (1, stride, stride, 1),
                )
            )
    cols = jnp.concatenate(taps, axis=-1).reshape(n * oh * ow, k)

    m = n * oh * ow
    g = gmax                                   # largest group (power of 2) dividing M
    while g > 1 and m % g:
        g //= 2
    wg = w_bd if g == gmax else w_bd[: g * k, : g * cout]      # nested block-diag
    bg = b_tiled if g == gmax else b_tiled[:, : g * cout]
    # (M, K) and (M//g, g*K) are byte-identical row-major views -> free reshape;
    # the (M//g, g*Cout) output is likewise byte-identical to NHWC (N, OH, OW, Cout).
    out = matmul_bias_act(cols.reshape(m // g, g * k), wg, bg,
                          apply_relu=True, out_dtype=x.dtype)
    return out.reshape(n, oh, ow, cout)


# ----------------------------------------------------------------------------
# CNNDeepQNet forward (takes one-time-prepared params)
# ----------------------------------------------------------------------------
def cnn_deep_q_net_forward(prep, x, *, action_dim):
    """x: (N, C, H, W) float32 (PyTorch NCHW input) -> (N, action_dim) float32."""
    compute_dtype = prep["w1"].dtype
    h = jnp.transpose(x, (0, 2, 3, 1)).astype(compute_dtype)   # single NHWC transpose
    h = conv2d_relu(h, prep["w1"], prep["b1"], ksize=8, stride=4, cout=32)
    h = conv2d_relu(h, prep["w2"], prep["b2"], ksize=4, stride=2, cout=64)
    h = conv2d_relu(h, prep["w3"], prep["b3"], ksize=3, stride=1, cout=64)
    h = h.reshape(h.shape[0], -1)                               # NHWC flatten
    out = mlp_head(h, prep["wf1"], prep["bf1"], prep["wf2"], prep["bf2"])
    return out[:, :action_dim]                                  # drop lane padding


# ----------------------------------------------------------------------------
# One-time parameter preprocessing (all reshapes/transposes/casts hoisted here)
# ----------------------------------------------------------------------------
def _block_diag(w, g):
    """(K, C) -> (g*K, g*C) block-diagonal replication of w."""
    if g == 1:
        return w
    k, c = w.shape
    zero = jnp.zeros((k, c), w.dtype)
    rows = [jnp.concatenate([w if j == i else zero for j in range(g)], axis=1)
            for i in range(g)]
    return jnp.concatenate(rows, axis=0)


def prepare_params(params, conv3_hw, compute_dtype=jnp.bfloat16):
    h3, w3 = conv3_hw

    def prep_conv(w, b):
        # PyTorch OIHW -> (KH*KW*Cin, Cout) matching NHWC patch order, then
        # block-diagonal-replicated Gmax=128//Cout times for lane-dense outputs.
        cout, cin, kh, kw = w.shape
        wm = (jnp.transpose(w, (2, 3, 1, 0))
              .reshape(kh * kw * cin, cout).astype(compute_dtype))
        g = max(1, 128 // cout)
        w_bd = _block_diag(wm, g)
        b_tiled = jnp.tile(b.reshape(1, -1), (1, g)).astype(jnp.float32)
        return w_bd, b_tiled

    # fc1: PyTorch (512, feat) with feat in NCHW (C,H,W) flatten order; permute
    # columns once to NHWC (H,W,C) order, then transpose to (feat, 512).
    wf1 = params["wf1"]
    hid, feat = wf1.shape
    c3 = feat // (h3 * w3)
    wf1 = (wf1.reshape(hid, c3, h3, w3).transpose(0, 2, 3, 1)
           .reshape(hid, feat).T)

    # fc2: transpose, then zero-pad the output dim to a lane-dense 128.
    wf2 = params["wf2"].T                         # (512, action_dim)
    act = wf2.shape[1]
    npad = 128 - act
    assert npad >= 0, "action_dim > 128 needs next-multiple-of-128 padding"
    wf2p = jnp.pad(wf2, ((0, 0), (0, npad)))
    bf2p = jnp.pad(params["bf2"], (0, npad))

    w1, b1 = prep_conv(params["w1"], params["b1"])
    w2, b2 = prep_conv(params["w2"], params["b2"])
    w3, b3 = prep_conv(params["w3"], params["b3"])
    return {
        "w1": w1, "b1": b1, "w2": w2, "b2": b2, "w3": w3, "b3": b3,
        "wf1": wf1.astype(compute_dtype),
        "bf1": params["bf1"].reshape(1, -1).astype(jnp.float32),
        "wf2": wf2p.astype(compute_dtype),
        "bf2": bf2p.reshape(1, -1).astype(jnp.float32),
    }


# ----------------------------------------------------------------------------
# Deterministic parameter initialization (PyTorch-default-style uniform bounds)
# ----------------------------------------------------------------------------
def _uniform(key, shape, fan_in):
    bound = 1.0 / jnp.sqrt(jnp.asarray(fan_in, jnp.float32))
    return jax.random.uniform(key, shape, jnp.float32, -bound, bound)


def init_params(key, obs_channels, spatial, action_dim):
    h1 = (spatial - 8) // 4 + 1
    h2 = (h1 - 4) // 2 + 1
    h3 = (h2 - 3) // 1 + 1
    feat = 64 * h3 * h3
    ks = jax.random.split(key, 10)
    params = {
        "w1": _uniform(ks[0], (32, obs_channels, 8, 8), obs_channels * 8 * 8),
        "b1": _uniform(ks[1], (32,), obs_channels * 8 * 8),
        "w2": _uniform(ks[2], (64, 32, 4, 4), 32 * 4 * 4),
        "b2": _uniform(ks[3], (64,), 32 * 4 * 4),
        "w3": _uniform(ks[4], (64, 64, 3, 3), 64 * 3 * 3),
        "b3": _uniform(ks[5], (64,), 64 * 3 * 3),
        "wf1": _uniform(ks[6], (512, feat), feat),
        "bf1": _uniform(ks[7], (512,), feat),
        "wf2": _uniform(ks[8], (action_dim, 512), 512),
        "bf2": _uniform(ks[9], (action_dim,), 512),
    }
    return params, feat, (h3, h3)


# ----------------------------------------------------------------------------
# Pure-JAX reference (NCHW, f32) for correctness checking
# ----------------------------------------------------------------------------
def reference_forward(params, x):
    def conv(x, w, b, s):
        y = jax.lax.conv_general_dilated(
            x, w, (s, s), "VALID", dimension_numbers=("NCHW", "OIHW", "NCHW")
        )
        return jax.nn.relu(y + b.reshape(1, -1, 1, 1))

    h = conv(x, params["w1"], params["b1"], 4)
    h = conv(h, params["w2"], params["b2"], 2)
    h = conv(h, params["w3"], params["b3"], 1)
    h = h.reshape(h.shape[0], -1)
    h = jax.nn.relu(h @ params["wf1"].T + params["bf1"])
    return h @ params["wf2"].T + params["bf2"]


if __name__ == "__main__":
    key = jax.random.PRNGKey(0)
    key_p, key_x = jax.random.split(key)

    batch = 4
    obs_channels, spatial = 4, 44     # conv outputs 10 -> 4 -> 2, feat = 64*2*2 = 256
    action_dim = 6                    # h3 = 2 > 1 exercises the NHWC wf1 permutation

    params, feat, conv3_hw = init_params(key_p, obs_channels, spatial, action_dim)
    x = jax.random.normal(key_x, (batch, obs_channels, spatial, spatial), jnp.float32)

    ref = reference_forward(params, x)

    fwd = jax.jit(functools.partial(cnn_deep_q_net_forward, action_dim=action_dim))

    # f32 compute path: must match the f32 reference tightly.
    prep_f32 = prepare_params(params, conv3_hw, jnp.float32)
    out_f32 = jax.block_until_ready(fwd(prep_f32, x))
    assert out_f32.shape == (batch, action_dim)
    assert jnp.allclose(out_f32, ref, atol=1e-4, rtol=1e-4), "f32 mismatch vs reference"

    # bf16 compute path (default; f32 accumulation in-kernel): bandwidth-optimized.
    prep_bf16 = prepare_params(params, conv3_hw)
    out_bf16 = jax.block_until_ready(fwd(prep_bf16, x))
    assert out_bf16.shape == (batch, action_dim)
    assert jnp.allclose(out_bf16, ref, atol=5e-2, rtol=5e-2), "bf16 mismatch vs reference"

    print("KERNEL_OK")
</pallas_src>

<mosaic_0001>
module attributes {stable_mosaic.version = 11 : i64} {
  func.func @_matmul_bias_act_kernel(%arg0: i32, %arg1: memref<100x1024xf32, #tpu.memory_space<vmem>>, %arg2: memref<1024x128xf32, #tpu.memory_space<vmem>>, %arg3: memref<1x128xf32, #tpu.memory_space<vmem>>, %arg4: memref<100x128xf32, #tpu.memory_space<vmem>>) attributes {dimension_semantics = [#tpu.dimension_semantics<parallel>], iteration_bounds = array<i64: 1>, scalar_prefetch = 0 : i64, scratch_operands = 0 : i64, tpu.core_type = #tpu.core_type<tc>, window_params = [{transform_indices = @transform_0, window_bounds = array<i64: 100, 1024>}, {pipeline_mode = #tpu.pipeline_mode<synchronous>, transform_indices = @transform_1, window_bounds = array<i64: 1024, 128>}, {pipeline_mode = #tpu.pipeline_mode<synchronous>, transform_indices = @transform_2, window_bounds = array<i64: 1, 128>}, {transform_indices = @transform_3, window_bounds = array<i64: 100, 128>}]} {
    %c0 = arith.constant 0 : index
    %c0_0 = arith.constant 0 : index
    %0 = vector.load %arg1[%c0, %c0_0] : memref<100x1024xf32, #tpu.memory_space<vmem>>, vector<100x1024xf32>
    %c0_1 = arith.constant 0 : index
    %c0_2 = arith.constant 0 : index
    %1 = vector.load %arg2[%c0_1, %c0_2] : memref<1024x128xf32, #tpu.memory_space<vmem>>, vector<1024x128xf32>
    %cst = arith.constant dense<0.000000e+00> : vector<100x128xf32>
    %2 = tpu.matmul %0, %1, %cst {dimension_numbers = #tpu.dot_dimension_numbers<[1], [0], [0], [1], [0, 0, 1, 1], [], []>} : vector<100x1024xf32>, vector<1024x128xf32>, vector<100x128xf32> -> vector<100x128xf32>
    %c0_3 = arith.constant 0 : index
    %c0_4 = arith.constant 0 : index
    %3 = vector.load %arg3[%c0_3, %c0_4] : memref<1x128xf32, #tpu.memory_space<vmem>>, vector<1x128xf32>
    %4 = vector.broadcast %3 : vector<1x128xf32> to vector<100x128xf32>
    %5 = arith.addf %2, %4 : vector<100x128xf32>
    %cst_5 = arith.constant 0.000000e+00 : f32
    %6 = vector.broadcast %cst_5 : f32 to vector<100x128xf32>
    %7 = arith.maximumf %5, %6 : vector<100x128xf32>
    %c0_6 = arith.constant 0 : index
    %c0_7 = arith.constant 0 : index
    %8 = vector.load %arg4[%c0_6, %c0_7] : memref<100x128xf32, #tpu.memory_space<vmem>>, vector<100x128xf32>
    tpu.vector_store %arg4[%c0_6, %c0_7], %7 {strides = array<i32>} : memref<100x128xf32, #tpu.memory_space<vmem>>, vector<100x128xf32>,
    return
  }
  func.func @transform_0(%arg0: i32) -> (i32, i32) {
    %c0_i32 = arith.constant 0 : i32
    %c0_i32_0 = arith.constant 0 : i32
    return %arg0, %c0_i32 : i32, i32
  }
  func.func @transform_1(%arg0: i32) -> (i32, i32) {
    %c0_i32 = arith.constant 0 : i32
    %c0_i32_0 = arith.constant 0 : i32
    %c0_i32_1 = arith.constant 0 : i32
    return %c0_i32, %c0_i32_0 : i32, i32
  }
  func.func @transform_2(%arg0: i32) -> (i32, i32) {
    %c0_i32 = arith.constant 0 : i32
    %c0_i32_0 = arith.constant 0 : i32
    %c0_i32_1 = arith.constant 0 : i32
    return %c0_i32, %c0_i32_0 : i32, i32
  }
  func.func @transform_3(%arg0: i32) -> (i32, i32) {
    %c0_i32 = arith.constant 0 : i32
    %c0_i32_0 = arith.constant 0 : i32
    return %arg0, %c0_i32 : i32, i32
  }
}

module attributes {stable_mosaic.version = 11 : i64} {
  func.func @_matmul_bias_act_kernel(%arg0: i32, %arg1: memref<32x1024xf32, #tpu.memory_space<vmem>>, %arg2: memref<1024x128xf32, #tpu.memory_space<vmem>>, %arg3: memref<1x128xf32, #tpu.memory_space<vmem>>, %arg4: memref<32x128xf32, #tpu.memory_space<vmem>>) attributes {dimension_semantics = [#tpu.dimension_semantics<parallel>], iteration_bounds = array<i64: 1>, scalar_prefetch = 0 : i64, scratch_operands = 0 : i64, tpu.core_type = #tpu.core_type<tc>, window_params = [{transform_indices = @transform_0, window_bounds = array<i64: 32, 1024>}, {pipeline_mode = #tpu.pipeline_mode<synchronous>, transform_indices = @transform_1, window_bounds = array<i64: 1024, 128>}, {pipeline_mode = #tpu.pipeline_mode<synchronous>, transform_indices = @transform_2, window_bounds = array<i64: 1, 128>}, {transform_indices = @transform_3, window_bounds = array<i64: 32, 128>}]} {
    %c0 = arith.constant 0 : index
    %c0_0 = arith.constant 0 : index
    %0 = vector.load %arg1[%c0, %c0_0] : memref<32x1024xf32, #tpu.memory_space<vmem>>, vector<32x1024xf32>
    %c0_1 = arith.constant 0 : index
    %c0_2 = arith.constant 0 : index
    %1 = vector.load %arg2[%c0_1, %c0_2] : memref<1024x128xf32, #tpu.memory_space<vmem>>, vector<1024x128xf32>
    %cst = arith.constant dense<0.000000e+00> : vector<32x128xf32>
    %2 = tpu.matmul %0, %1, %cst {dimension_numbers = #tpu.dot_dimension_numbers<[1], [0], [0], [1], [0, 0, 1, 1], [], []>} : vector<32x1024xf32>, vector<1024x128xf32>, vector<32x128xf32> -> vector<32x128xf32>
    %c0_3 = arith.constant 0 : index
    %c0_4 = arith.constant 0 : index
    %3 = vector.load %arg3[%c0_3, %c0_4] : memref<1x128xf32, #tpu.memory_space<vmem>>, vector<1x128xf32>
    %4 = vector.broadcast %3 : vector<1x128xf32> to vector<32x128xf32>
    %5 = arith.addf %2, %4 : vector<32x128xf32>
    %cst_5 = arith.constant 0.000000e+00 : f32
    %6 = vector.broadcast %cst_5 : f32 to vector<32x128xf32>
    %7 = arith.maximumf %5, %6 : vector<32x128xf32>
    %c0_6 = arith.constant 0 : index
    %c0_7 = arith.constant 0 : index
    %8 = vector.load %arg4[%c0_6, %c0_7] : memref<32x128xf32, #tpu.memory_space<vmem>>, vector<32x128xf32>
    tpu.vector_store %arg4[%c0_6, %c0_7], %7 {strides = array<i32>} : memref<32x128xf32, #tpu.memory_space<vmem>>, vector<32x128xf32>,
    return
  }
  func.func @transform_0(%arg0: i32) -> (i32, i32) {
    %c0_i32 = arith.constant 0 : i32
    %c0_i32_0 = arith.constant 0 : i32
    return %arg0, %c0_i32 : i32, i32
  }
  func.func @transform_1(%arg0: i32) -> (i32, i32) {
    %c0_i32 = arith.constant 0 : i32
    %c0_i32_0 = arith.constant 0 : i32
    %c0_i32_1 = arith.constant 0 : i32
    return %c0_i32, %c0_i32_0 : i32, i32
  }
  func.func @transform_2(%arg0: i32) -> (i32, i32) {
    %c0_i32 = arith.constant 0 : i32
    %c0_i32_0 = arith.constant 0 : i32
    %c0_i32_1 = arith.constant 0 : i32
    return %c0_i32, %c0_i32_0 : i32, i32
  }
  func.func @transform_3(%arg0: i32) -> (i32, i32) {
    %c0_i32 = arith.constant 0 : i32
    %c0_i32_0 = arith.constant 0 : i32
    return %arg0, %c0_i32 : i32, i32
  }
}

module attributes {stable_mosaic.version = 11 : i64} {
  func.func @_matmul_bias_act_kernel(%arg0: i32, %arg1: memref<8x1152xf32, #tpu.memory_space<vmem>>, %arg2: memref<1152x128xf32, #tpu.memory_space<vmem>>, %arg3: memref<1x128xf32, #tpu.memory_space<vmem>>, %arg4: memref<8x128xf32, #tpu.memory_space<vmem>>) attributes {dimension_semantics = [#tpu.dimension_semantics<parallel>], iteration_bounds = array<i64: 1>, scalar_prefetch = 0 : i64, scratch_operands = 0 : i64, tpu.core_type = #tpu.core_type<tc>, window_params = [{transform_indices = @transform_0, window_bounds = array<i64: 8, 1152>}, {pipeline_mode = #tpu.pipeline_mode<synchronous>, transform_indices = @transform_1, window_bounds = array<i64: 1152, 128>}, {pipeline_mode = #tpu.pipeline_mode<synchronous>, transform_indices = @transform_2, window_bounds = array<i64: 1, 128>}, {transform_indices = @transform_3, window_bounds = array<i64: 8, 128>}]} {
    %c0 = arith.constant 0 : index
    %c0_0 = arith.constant 0 : index
    %0 = vector.load %arg1[%c0, %c0_0] : memref<8x1152xf32, #tpu.memory_space<vmem>>, vector<8x1152xf32>
    %c0_1 = arith.constant 0 : index
    %c0_2 = arith.constant 0 : index
    %1 = vector.load %arg2[%c0_1, %c0_2] : memref<1152x128xf32, #tpu.memory_space<vmem>>, vector<1152x128xf32>
    %cst = arith.constant dense<0.000000e+00> : vector<8x128xf32>
    %2 = tpu.matmul %0, %1, %cst {dimension_numbers = #tpu.dot_dimension_numbers<[1], [0], [0], [1], [0, 0, 1, 1], [], []>} : vector<8x1152xf32>, vector<1152x128xf32>, vector<8x128xf32> -> vector<8x128xf32>
    %c0_3 = arith.constant 0 : index
    %c0_4 = arith.constant 0 : index
    %3 = vector.load %arg3[%c0_3, %c0_4] : memref<1x128xf32, #tpu.memory_space<vmem>>, vector<1x128xf32>
    %4 = vector.broadcast %3 : vector<1x128xf32> to vector<8x128xf32>
    %5 = arith.addf %2, %4 : vector<8x128xf32>
    %cst_5 = arith.constant 0.000000e+00 : f32
    %6 = vector.broadcast %cst_5 : f32 to vector<8x128xf32>
    %7 = arith.maximumf %5, %6 : vector<8x128xf32>
    %c0_6 = arith.constant 0 : index
    %c0_7 = arith.constant 0 : index
    %8 = vector.load %arg4[%c0_6, %c0_7] : memref<8x128xf32, #tpu.memory_space<vmem>>, vector<8x128xf32>
    tpu.vector_store %arg4[%c0_6, %c0_7], %7 {strides = array<i32>} : memref<8x128xf32, #tpu.memory_space<vmem>>, vector<8x128xf32>,
    return
  }
  func.func @transform_0(%arg0: i32) -> (i32, i32) {
    %c0_i32 = arith.constant 0 : i32
    %c0_i32_0 = arith.constant 0 : i32
    return %arg0, %c0_i32 : i32, i32
  }
  func.func @transform_1(%arg0: i32) -> (i32, i32) {
    %c0_i32 = arith.constant 0 : i32
    %c0_i32_0 = arith.constant 0 : i32
    %c0_i32_1 = arith.constant 0 : i32
    return %c0_i32, %c0_i32_0 : i32, i32
  }
  func.func @transform_2(%arg0: i32) -> (i32, i32) {
    %c0_i32 = arith.constant 0 : i32
    %c0_i32_0 = arith.constant 0 : i32
    %c0_i32_1 = arith.constant 0 : i32
    return %c0_i32, %c0_i32_0 : i32, i32
  }
  func.func @transform_3(%arg0: i32) -> (i32, i32) {
    %c0_i32 = arith.constant 0 : i32
    %c0_i32_0 = arith.constant 0 : i32
    return %arg0, %c0_i32 : i32, i32
  }
}

module attributes {stable_mosaic.version = 11 : i64} {
  func.func @_mlp_head_kernel(%arg0: i32, %arg1: memref<4x256xf32, #tpu.memory_space<vmem>>, %arg2: memref<256x512xf32, #tpu.memory_space<vmem>>, %arg3: memref<1x512xf32, #tpu.memory_space<vmem>>, %arg4: memref<512x128xf32, #tpu.memory_space<vmem>>, %arg5: memref<1x128xf32, #tpu.memory_space<vmem>>, %arg6: memref<4x128xf32, #tpu.memory_space<vmem>>) attributes {dimension_semantics = [#tpu.dimension_semantics<parallel>], iteration_bounds = array<i64: 1>, scalar_prefetch = 0 : i64, scratch_operands = 0 : i64, tpu.core_type = #tpu.core_type<tc>, window_params = [{transform_indices = @transform_0, window_bounds = array<i64: 4, 256>}, {pipeline_mode = #tpu.pipeline_mode<synchronous>, transform_indices = @transform_1, window_bounds = array<i64: 256, 512>}, {pipeline_mode = #tpu.pipeline_mode<synchronous>, transform_indices = @transform_2, window_bounds = array<i64: 1, 512>}, {pipeline_mode = #tpu.pipeline_mode<synchronous>, transform_indices = @transform_3, window_bounds = array<i64: 512, 128>}, {pipeline_mode = #tpu.pipeline_mode<synchronous>, transform_indices = @transform_4, window_bounds = array<i64: 1, 128>}, {transform_indices = @transform_5, window_bounds = array<i64: 4, 128>}]} {
    %c0 = arith.constant 0 : index
    %c0_0 = arith.constant 0 : index
    %0 = vector.load %arg1[%c0, %c0_0] : memref<4x256xf32, #tpu.memory_space<vmem>>, vector<4x256xf32>
    %c0_1 = arith.constant 0 : index
    %c0_2 = arith.constant 0 : index
    %1 = vector.load %arg2[%c0_1, %c0_2] : memref<256x512xf32, #tpu.memory_space<vmem>>, vector<256x512xf32>
    %cst = arith.constant dense<0.000000e+00> : vector<4x512xf32>
    %2 = tpu.matmul %0, %1, %cst {dimension_numbers = #tpu.dot_dimension_numbers<[1], [0], [0], [1], [0, 0, 1, 1], [], []>} : vector<4x256xf32>, vector<256x512xf32>, vector<4x512xf32> -> vector<4x512xf32>
    %c0_3 = arith.constant 0 : index
    %c0_4 = arith.constant 0 : index
    %3 = vector.load %arg3[%c0_3, %c0_4] : memref<1x512xf32, #tpu.memory_space<vmem>>, vector<1x512xf32>
    %4 = vector.broadcast %3 : vector<1x512xf32> to vector<4x512xf32>
    %5 = arith.addf %2, %4 : vector<4x512xf32>
    %cst_5 = arith.constant 0.000000e+00 : f32
    %6 = vector.broadcast %cst_5 : f32 to vector<4x512xf32>
    %7 = arith.maximumf %5, %6 : vector<4x512xf32>
    %c0_6 = arith.constant 0 : index
    %c0_7 = arith.constant 0 : index
    %8 = vector.load %arg4[%c0_6, %c0_7] : memref<512x128xf32, #tpu.memory_space<vmem>>, vector<512x128xf32>
    %cst_8 = arith.constant dense<0.000000e+00> : vector<4x128xf32>
    %9 = tpu.matmul %7, %8, %cst_8 {dimension_numbers = #tpu.dot_dimension_numbers<[1], [0], [0], [1], [0, 0, 1, 1], [], []>} : vector<4x512xf32>, vector<512x128xf32>, vector<4x128xf32> -> vector<4x128xf32>
    %c0_9 = arith.constant 0 : index
    %c0_10 = arith.constant 0 : index
    %10 = vector.load %arg5[%c0_9, %c0_10] : memref<1x128xf32, #tpu.memory_space<vmem>>, vector<1x128xf32>
    %11 = vector.broadcast %10 : vector<1x128xf32> to vector<4x128xf32>
    %12 = arith.addf %9, %11 : vector<4x128xf32>
    %c0_11 = arith.constant 0 : index
    %c0_12 = arith.constant 0 : index
    %13 = vector.load %arg6[%c0_11, %c0_12] : memref<4x128xf32, #tpu.memory_space<vmem>>, vector<4x128xf32>
    tpu.vector_store %arg6[%c0_11, %c0_12], %12 {strides = array<i32>} : memref<4x128xf32, #tpu.memory_space<vmem>>, vector<4x128xf32>,
    return
  }
  func.func @transform_0(%arg0: i32) -> (i32, i32) {
    %c0_i32 = arith.constant 0 : i32
    %c0_i32_0 = arith.constant 0 : i32
    return %arg0, %c0_i32 : i32, i32
  }
  func.func @transform_1(%arg0: i32) -> (i32, i32) {
    %c0_i32 = arith.constant 0 : i32
    %c0_i32_0 = arith.constant 0 : i32
    %c0_i32_1 = arith.constant 0 : i32
    return %c0_i32, %c0_i32_0 : i32, i32
  }
  func.func @transform_2(%arg0: i32) -> (i32, i32) {
    %c0_i32 = arith.constant 0 : i32
    %c0_i32_0 = arith.constant 0 : i32
    %c0_i32_1 = arith.constant 0 : i32
    return %c0_i32, %c0_i32_0 : i32, i32
  }
  func.func @transform_3(%arg0: i32) -> (i32, i32) {
    %c0_i32 = arith.constant 0 : i32
    %c0_i32_0 = arith.constant 0 : i32
    %c0_i32_1 = arith.constant 0 : i32
    return %c0_i32, %c0_i32_0 : i32, i32
  }
  func.func @transform_4(%arg0: i32) -> (i32, i32) {
    %c0_i32 = arith.constant 0 : i32
    %c0_i32_0 = arith.constant 0 : i32
    %c0_i32_1 = arith.constant 0 : i32
    return %c0_i32, %c0_i32_0 : i32, i32
  }
  func.func @transform_5(%arg0: i32) -> (i32, i32) {
    %c0_i32 = arith.constant 0 : i32
    %c0_i32_0 = arith.constant 0 : i32
    return %arg0, %c0_i32 : i32, i32
  }
}

</mosaic_0001>

<bundles_post_ra>
// kernel: cnn_deep_q_net_forward.4
= control target key start
LH: loop header
LB: loop body
LE: loop exit
PB: predicated region body
PF: predicated region fallthrough
CT: control target
= control target key end

     0   :  { %s1541_s1 = inlined_call_operand.vmem [shape: f32[1024,128], index: 1, kind: input, shape index: {}]   ;;  %s1542_s0 = inlined_call_operand.vmem [shape: f32[100,1024], index: 0, kind: input, shape index: {}]   ;;  %s1543_s2 = inlined_call_operand.vmem [shape: f32[1,128], index: 2, kind: input, shape index: {}]   ;;  %s1544_s3 = inlined_call_operand.vmem [shape: f32[100,128], index: 3, kind: output, shape index: {}]  }
   0x1   :  { %v133_v0 = vld [vmem:[%s1541_s1 + $0x78] sm:$0xff]  ;;  %v132_v2 = vld [vmem:[%s1541_s1 + $0x70] sm:$0xff]  ;;  %v131_v6 = vld [vmem:[%s1541_s1 + $0x68] sm:$0xff] }
   0x2   :  { %v165_v1 = vld [vmem:[%s1541_s1 + $0x178] sm:$0xff]  ;;  %250 = vmatpush.msra.mxu0 %v133_v0  ;;  %v164_v4 = vld [vmem:[%s1541_s1 + $0x170] sm:$0xff]  ;;  %v163_v8 = vld [vmem:[%s1541_s1 + $0x168] sm:$0xff] }
   0x3   :  { %362 = vmatpush.msra.mxu2 %v165_v1  ;;  %v149_v3 = vld [vmem:[%s1541_s1 + $0xf8] sm:$0xff]  ;;  %v148_v7 = vld [vmem:[%s1541_s1 + $0xf0] sm:$0xff]  ;;  %v147_v10 = vld [vmem:[%s1541_s1 + $0xe8] sm:$0xff] }
   0x4   :  { %v181_v5 = vld [vmem:[%s1541_s1 + $0x1f8] sm:$0xff]  ;;  %306 = vmatpush.msra.mxu1 %v149_v3  ;;  %251 = vmatpush.msra.mxu0 %v132_v2  ;;  %v180_v9 = vld [vmem:[%s1541_s1 + $0x1f0] sm:$0xff]  ;;  %v130_v11 = vld [vmem:[%s1541_s1 + $0x60] sm:$0xff] }
   0x5   :  { %418 = vmatpush.msra.mxu3 %v181_v5  ;;  %363 = vmatpush.msra.mxu2 %v164_v4  ;;  %v162_v12 = vld [vmem:[%s1541_s1 + $0x160] sm:$0xff]  ;;  %v179_v13 = vld [vmem:[%s1541_s1 + $0x1e8] sm:$0xff]  ;;  %v129_v16 = vld [vmem:[%s1541_s1 + $0x58] sm:$0xff] }
   0x6   :  { %307 = vmatpush.msra.mxu1 %v148_v7  ;;  %252 = vmatpush.msra.mxu0 %v131_v6  ;;  %v146_v14 = vld [vmem:[%s1541_s1 + $0xe0] sm:$0xff]  ;;  %v161_v17 = vld [vmem:[%s1541_s1 + $0x158] sm:$0xff]  ;;  %v128_v20 = vld [vmem:[%s1541_s1 + $0x50] sm:$0xff] }
   0x7   :  { %419 = vmatpush.msra.mxu3 %v180_v9  ;;  %364 = vmatpush.msra.mxu2 %v163_v8  ;;  %v178_v15 = vld [vmem:[%s1541_s1 + $0x1e0] sm:$0xff]  ;;  %v145_v18 = vld [vmem:[%s1541_s1 + $0xd8] sm:$0xff]  ;;  %v160_v21 = vld [vmem:[%s1541_s1 + $0x150] sm:$0xff] }
   0x8   :  { %308 = vmatpush.msra.mxu1 %v147_v10  ;;  %253 = vmatpush.msra.mxu0 %v130_v11  ;;  %v177_v19 = vld [vmem:[%s1541_s1 + $0x1d8] sm:$0xff]  ;;  %v144_v22 = vld [vmem:[%s1541_s1 + $0xd0] sm:$0xff]  ;;  %v127_v24 = vld [vmem:[%s1541_s1 + $0x48] sm:$0xff] }
   0x9   :  { %420 = vmatpush.msra.mxu3 %v179_v13  ;;  %365 = vmatpush.msra.mxu2 %v162_v12  ;;  %v176_v23 = vld [vmem:[%s1541_s1 + $0x1d0] sm:$0xff]  ;;  %v159_v25 = vld [vmem:[%s1541_s1 + $0x148] sm:$0xff]  ;;  %v126_v28 = vld [vmem:[%s1541_s1 + $0x40] sm:$0xff] }
   0xa   :  { %309 = vmatpush.msra.mxu1 %v146_v14  ;;  %254 = vmatpush.msra.mxu0 %v129_v16  ;;  %v143_v26 = vld [vmem:[%s1541_s1 + $0xc8] sm:$0xff]  ;;  %v158_v29 = vld [vmem:[%s1541_s1 + $0x140] sm:$0xff]  ;;  %v125_v32 = vld [vmem:[%s1541_s1 + $0x38] sm:$0xff] }
   0xb   :  { %421 = vmatpush.msra.mxu3 %v178_v15  ;;  %366 = vmatpush.msra.mxu2 %v161_v17  ;;  %v175_v27 = vld [vmem:[%s1541_s1 + $0x1c8] sm:$0xff]  ;;  %v142_v30 = vld [vmem:[%s1541_s1 + $0xc0] sm:$0xff]  ;;  %v157_v33 = vld [vmem:[%s1541_s1 + $0x138] sm:$0xff] }
   0xc   :  { %310 = vmatpush.msra.mxu1 %v145_v18  ;;  %255 = vmatpush.msra.mxu0 %v128_v20  ;;  %v174_v31 = vld [vmem:[%s1541_s1 + $0x1c0] sm:$0xff]  ;;  %v141_v34 = vld [vmem:[%s1541_s1 + $0xb8] sm:$0xff]  ;;  %v124_v36 = vld [vmem:[%s1541_s1 + $0x30] sm:$0xff] }
   0xd   :  { %422 = vmatpush.msra.mxu3 %v177_v19  ;;  %367 = vmatpush.msra.mxu2 %v160_v21  ;;  %v173_v35 = vld [vmem:[%s1541_s1 + $0x1b8] sm:$0xff]  ;;  %v156_v37 = vld [vmem:[%s1541_s1 + $0x130] sm:$0xff]  ;;  %v123_v40 = vld [vmem:[%s1541_s1 + $0x28] sm:$0xff] }
   0xe   :  { %311 = vmatpush.msra.mxu1 %v144_v22  ;;  %256 = vmatpush.msra.mxu0 %v127_v24  ;;  %v140_v38 = vld [vmem:[%s1541_s1 + $0xb0] sm:$0xff]  ;;  %v155_v41 = vld [vmem:[%s1541_s1 + $0x128] sm:$0xff]  ;;  %v122_v44 = vld [vmem:[%s1541_s1 + $0x20] sm:$0xff] }
   0xf   :  { %423 = vmatpush.msra.mxu3 %v176_v23  ;;  %368 = vmatpush.msra.mxu2 %v159_v25  ;;  %v172_v39 = vld [vmem:[%s1541_s1 + $0x1b0] sm:$0xff]  ;;  %v139_v42 = vld [vmem:[%s1541_s1 + $0xa8] sm:$0xff]  ;;  %v154_v45 = vld [vmem:[%s1541_s1 + $0x120] sm:$0xff] }
  0x10   :  { %312 = vmatpush.msra.mxu1 %v143_v26  ;;  %257 = vmatpush.msra.mxu0 %v126_v28  ;;  %v171_v43 = vld [vmem:[%s1541_s1 + $0x1a8] sm:$0xff]  ;;  %v138_v46 = vld [vmem:[%s1541_s1 + $0xa0] sm:$0xff]  ;;  %v121_v48 = vld [vmem:[%s1541_s1 + $0x18] sm:$0xff] }
  0x11   :  { %424 = vmatpush.msra.mxu3 %v175_v27  ;;  %369 = vmatpush.msra.mxu2 %v158_v29  ;;  %v170_v47 = vld [vmem:[%s1541_s1 + $0x1a0] sm:$0xff]  ;;  %v153_v49 = vld [vmem:[%s1541_s1 + $0x118] sm:$0xff]  ;;  %v120_v52 = vld [vmem:[%s1541_s1 + $0x10] sm:$0xff] }
  0x12   :  { %313 = vmatpush.msra.mxu1 %v142_v30  ;;  %258 = vmatpush.msra.mxu0 %v125_v32  ;;  %v137_v50 = vld [vmem:[%s1541_s1 + $0x98] sm:$0xff]  ;;  %v152_v53 = vld [vmem:[%s1541_s1 + $0x110] sm:$0xff]  ;;  %v119_v56 = vld [vmem:[%s1541_s1 + $0x8] sm:$0xff] }
  0x13   :  { %425 = vmatpush.msra.mxu3 %v174_v31  ;;  %370 = vmatpush.msra.mxu2 %v157_v33  ;;  %v169_v51 = vld [vmem:[%s1541_s1 + $0x198] sm:$0xff]  ;;  %v136_v54 = vld [vmem:[%s1541_s1 + $0x90] sm:$0xff]  ;;  %v151_v57 = vld [vmem:[%s1541_s1 + $0x108] sm:$0xff] }
  0x14   :  { %314 = vmatpush.msra.mxu1 %v141_v34  ;;  %259 = vmatpush.msra.mxu0 %v124_v36  ;;  %v168_v55 = vld [vmem:[%s1541_s1 + $0x190] sm:$0xff]  ;;  %v135_v58 = vld [vmem:[%s1541_s1 + $0x88] sm:$0xff]  ;;  %v118_v60 = vld [vmem:[%s1541_s1] sm:$0xff] }
  0x15   :  { %426 = vmatpush.msra.mxu3 %v173_v35  ;;  %371 = vmatpush.msra.mxu2 %v156_v37  ;;  %v167_v59 = vld [vmem:[%s1541_s1 + $0x188] sm:$0xff]  ;;  %v150_v61 = vld [vmem:[%s1541_s1 + $0x100] sm:$0xff]  ;;  %v16_v63 = vld [vmem:[%s1542_s0 + $0x10] sm:$0xff] }
  0x16   :  { %315 = vmatpush.msra.mxu1 %v140_v38  ;;  %260 = vmatpush.msra.mxu0 %v123_v40  ;;  %v14_v62 = vld [vmem:[%s1542_s0] sm:$0xff]  ;;  %v229_v0 = vld [vmem:[%s1541_s1 + $0x378] sm:$0xff]  ;;  %v15_v3 = vld [vmem:[%s1542_s0 + $0x8] sm:$0xff] }
  0x17   :  { %427 = vmatpush.msra.mxu3 %v172_v39  ;;  %372 = vmatpush.msra.mxu2 %v155_v41  ;;  %v134_v1 = vld [vmem:[%s1541_s1 + $0x80] sm:$0xff]  ;;  %v17_v4 = vld [vmem:[%s1542_s0 + $0x18] sm:$0xff]  ;;  %v228_v8 = vld [vmem:[%s1541_s1 + $0x370] sm:$0xff] }
  0x18   :  { %316 = vmatpush.msra.mxu1 %v139_v42  ;;  %261 = vmatpush.msra.mxu0 %v122_v44  ;;  %v166_v2 = vld [vmem:[%s1541_s1 + $0x180] sm:$0xff]  ;;  %v197_v5 = vld [vmem:[%s1541_s1 + $0x278] sm:$0xff]  ;;  %v196_v9 = vld [vmem:[%s1541_s1 + $0x270] sm:$0xff] }
  0x19   :  { %428 = vmatpush.msra.mxu3 %v171_v43  ;;  %373 = vmatpush.msra.mxu2 %v154_v45  ;;  %v245_v6 = vld [vmem:[%s1541_s1 + $0x3f8] sm:$0xff]  ;;  %v244_v10 = vld [vmem:[%s1541_s1 + $0x3f0] sm:$0xff]  ;;  %v227_v12 = vld [vmem:[%s1541_s1 + $0x368] sm:$0xff] }
  0x1a   :  { %317 = vmatpush.msra.mxu1 %v138_v46  ;;  %262 = vmatpush.msra.mxu0 %v121_v48  ;;  %v213_v7 = vld [vmem:[%s1541_s1 + $0x2f8] sm:$0xff]  ;;  %v212_v11 = vld [vmem:[%s1541_s1 + $0x2f0] sm:$0xff]  ;;  %v195_v13 = vld [vmem:[%s1541_s1 + $0x268] sm:$0xff] }
  0x1b   :  { %429 = vmatpush.msra.mxu3 %v170_v47  ;;  %374 = vmatpush.msra.mxu2 %v153_v49  ;;  %v22_v14 = vld [vmem:[%s1542_s0 + $0x40] sm:$0xff]  ;;  %v24_v15 = vld [vmem:[%s1542_s0 + $0x50] sm:$0xff]  ;;  %v243_v16 = vld [vmem:[%s1541_s1 + $0x3e8] sm:$0xff] }
  0x1c   :  { %318 = vmatpush.msra.mxu1 %v137_v50  ;;  %263 = vmatpush.msra.mxu0 %v120_v52  ;;  %v211_v17 = vld [vmem:[%s1541_s1 + $0x2e8] sm:$0xff]  ;;  %v226_v19 = vld [vmem:[%s1541_s1 + $0x360] sm:$0xff]  ;;  %v25_v20 = vld [vmem:[%s1542_s0 + $0x58] sm:$0xff] }
  0x1d   :  { %430 = vmatpush.msra.mxu3 %v169_v51  ;;  %375 = vmatpush.msra.mxu2 %v152_v53  ;;  %v23_v18 = vld [vmem:[%s1542_s0 + $0x48] sm:$0xff]  ;;  %v194_v21 = vld [vmem:[%s1541_s1 + $0x260] sm:$0xff]  ;;  %v225_v24 = vld [vmem:[%s1541_s1 + $0x358] sm:$0xff] }
  0x1e   :  { %319 = vmatpush.msra.mxu1 %v136_v54  ;;  %264 = vmatpush.msra.mxu0 %v119_v56  ;;  %v242_v22 = vld [vmem:[%s1541_s1 + $0x3e0] sm:$0xff]  ;;  %v193_v25 = vld [vmem:[%s1541_s1 + $0x258] sm:$0xff]  ;;  %v224_v28 = vld [vmem:[%s1541_s1 + $0x350] sm:$0xff] }
  0x1f   :  { %431 = vmatpush.msra.mxu3 %v168_v55  ;;  %376 = vmatpush.msra.mxu2 %v151_v57  ;;  %v210_v23 = vld [vmem:[%s1541_s1 + $0x2e0] sm:$0xff]  ;;  %v241_v26 = vld [vmem:[%s1541_s1 + $0x3d8] sm:$0xff]  ;;  %v192_v29 = vld [vmem:[%s1541_s1 + $0x250] sm:$0xff] }
  0x20   :  { %320 = vmatpush.msra.mxu1 %v135_v58  ;;  %265 = vmatpush.msra.mxu0 %v118_v60  ;;  %v209_v27 = vld [vmem:[%s1541_s1 + $0x2d8] sm:$0xff]  ;;  %v30_v30 = vld [vmem:[%s1542_s0 + $0x80] sm:$0xff]  ;;  %v32_v31 = vld [vmem:[%s1542_s0 + $0x90] sm:$0xff] }
  0x21   :  { %432 = vmatpush.msra.mxu3 %v167_v59  ;;  %377 = vmatpush.msra.mxu2 %v150_v61  ;;  %v240_v32 = vld [vmem:[%s1541_s1 + $0x3d0] sm:$0xff]  ;;  %v31_v34 = vld [vmem:[%s1542_s0 + $0x88] sm:$0xff]  ;;  %v33_v36 = vld [vmem:[%s1542_s0 + $0x98] sm:$0xff] }
  0x22   :  { %266 = vmatmul.f32.vlgmr.msra.gmra.mxu0 %v14_v62  ;;  %378 = vmatmul.f32.vlgmr.msra.gmra.mxu2 %v16_v63  ;;  %v208_v33 = vld [vmem:[%s1541_s1 + $0x2d0] sm:$0xff]  ;;  %v223_v35 = vld [vmem:[%s1541_s1 + $0x348] sm:$0xff]  ;;  %v222_v40 = vld [vmem:[%s1541_s1 + $0x340] sm:$0xff] }
  0x23   :  { %586 = vmatpush.msrb.mxu2 %v229_v0  ;;  %321 = vmatpush.msra.mxu1 %v134_v1  ;;  %v191_v37 = vld [vmem:[%s1541_s1 + $0x248] sm:$0xff]  ;;  %v190_v41 = vld [vmem:[%s1541_s1 + $0x240] sm:$0xff]  ;;  %v221_v44 = vld [vmem:[%s1541_s1 + $0x338] sm:$0xff] }
  0x24   :  { %433 = vmatpush.msra.mxu3 %v166_v2  ;;  %322 = vmatmul.f32.vlgmr.msra.gmra.mxu1 %v15_v3  ;;  %v239_v38 = vld [vmem:[%s1541_s1 + $0x3c8] sm:$0xff]  ;;  %v238_v42 = vld [vmem:[%s1541_s1 + $0x3c0] sm:$0xff]  ;;  %v189_v45 = vld [vmem:[%s1541_s1 + $0x238] sm:$0xff] }
  0x25   :  { %434 = vmatmul.f32.vlgmr.msra.gmra.mxu3 %v17_v4  ;;  %474 = vmatpush.msrb.mxu0 %v197_v5  ;;  %v207_v39 = vld [vmem:[%s1541_s1 + $0x2c8] sm:$0xff]  ;;  %v206_v43 = vld [vmem:[%s1541_s1 + $0x2c0] sm:$0xff]  ;;  %v40_v47 = vld [vmem:[%s1542_s0 + $0xd0] sm:$0xff] }
  0x26   :  { %642 = vmatpush.msrb.mxu3 %v245_v6  ;;  %530 = vmatpush.msrb.mxu1 %v213_v7  ;;  %v38_v46 = vld [vmem:[%s1542_s0 + $0xc0] sm:$0xff]  ;;  %v237_v48 = vld [vmem:[%s1541_s1 + $0x3b8] sm:$0xff]  ;;  %v39_v49 = vld [vmem:[%s1542_s0 + $0xc8] sm:$0xff] }
  0x27   :  { %587 = vmatpush.msrb.mxu2 %v228_v8  ;;  %475 = vmatpush.msrb.mxu0 %v196_v9  ;;  %v41_v50 = vld [vmem:[%s1542_s0 + $0xd8] sm:$0xff]  ;;  %v220_v52 = vld [vmem:[%s1541_s1 + $0x330] sm:$0xff]  ;;  %v46_v56 = vld [vmem:[%s1542_s0 + $0x100] sm:$0xff] }
  0x28   :  { %643 = vmatpush.msrb.mxu3 %v244_v10  ;;  %531 = vmatpush.msrb.mxu1 %v212_v11  ;;  %v205_v51 = vld [vmem:[%s1541_s1 + $0x2b8] sm:$0xff]  ;;  %v188_v53 = vld [vmem:[%s1541_s1 + $0x230] sm:$0xff]  ;;  %v47_v58 = vld [vmem:[%s1542_s0 + $0x108] sm:$0xff] }
  0x29   :  { %588 = vmatpush.msrb.mxu2 %v227_v12  ;;  %476 = vmatpush.msrb.mxu0 %v195_v13  ;;  %v236_v54 = vld [vmem:[%s1541_s1 + $0x3b0] sm:$0xff]  ;;  %v49_v59 = vld [vmem:[%s1542_s0 + $0x118] sm:$0xff]  ;;  %v219_v60 = vld [vmem:[%s1541_s1 + $0x328] sm:$0xff] }
  0x2a   :  { %269 = vmatmul.f32.gmra.mxu0 %v22_v14  ;;  %381 = vmatmul.f32.gmra.mxu2 %v24_v15  ;;  %v204_v55 = vld [vmem:[%s1541_s1 + $0x2b0] sm:$0xff]  ;;  %v187_v61 = vld [vmem:[%s1541_s1 + $0x228] sm:$0xff]  ;;  %v54_v0 = vld [vmem:[%s1542_s0 + $0x140] sm:$0xff] }
  0x2b   :  { %644 = vmatpush.msrb.mxu3 %v243_v16  ;;  %532 = vmatpush.msrb.mxu1 %v211_v17  ;;  %v48_v57 = vld [vmem:[%s1542_s0 + $0x110] sm:$0xff]  ;;  %v235_v62 = vld [vmem:[%s1541_s1 + $0x3a8] sm:$0xff]  ;;  %v57_v3 = vld [vmem:[%s1542_s0 + $0x158] sm:$0xff] }
  0x2c   :  { %325 = vmatmul.f32.gmra.mxu1 %v23_v18  ;;  %589 = vmatpush.msrb.mxu2 %v226_v19  ;;  %v203_v63 = vld [vmem:[%s1541_s1 + $0x2a8] sm:$0xff]  ;;  %v56_v1 = vld [vmem:[%s1542_s0 + $0x150] sm:$0xff]  ;;  %v218_v4 = vld [vmem:[%s1541_s1 + $0x320] sm:$0xff] }
  0x2d   :  { %437 = vmatmul.f32.gmra.mxu3 %v25_v20  ;;  %477 = vmatpush.msrb.mxu0 %v194_v21  ;;  %v55_v2 = vld [vmem:[%s1542_s0 + $0x148] sm:$0xff]  ;;  %v186_v5 = vld [vmem:[%s1541_s1 + $0x220] sm:$0xff]  ;;  %v217_v8 = vld [vmem:[%s1541_s1 + $0x318] sm:$0xff] }
  0x2e   :  { %645 = vmatpush.msrb.mxu3 %v242_v22  ;;  %533 = vmatpush.msrb.mxu1 %v210_v23  ;;  %v234_v6 = vld [vmem:[%s1541_s1 + $0x3a0] sm:$0xff]  ;;  %v64_v10 = vld [vmem:[%s1542_s0 + $0x190] sm:$0xff]  ;;  %v63_v11 = vld [vmem:[%s1542_s0 + $0x188] sm:$0xff] }
  0x2f   :  { %590 = vmatpush.msrb.mxu2 %v225_v24  ;;  %478 = vmatpush.msrb.mxu0 %v193_v25  ;;  %v202_v7 = vld [vmem:[%s1541_s1 + $0x2a0] sm:$0xff]  ;;  %v65_v12 = vld [vmem:[%s1542_s0 + $0x198] sm:$0xff]  ;;  %v216_v16 = vld [vmem:[%s1541_s1 + $0x310] sm:$0xff] }
  0x30   :  { %646 = vmatpush.msrb.mxu3 %v241_v26  ;;  %534 = vmatpush.msrb.mxu1 %v209_v27  ;;  %v62_v9 = vld [vmem:[%s1542_s0 + $0x180] sm:$0xff]  ;;  %v185_v13 = vld [vmem:[%s1541_s1 + $0x218] sm:$0xff]  ;;  %v184_v17 = vld [vmem:[%s1541_s1 + $0x210] sm:$0xff] }
  0x31   :  { %591 = vmatpush.msrb.mxu2 %v224_v28  ;;  %479 = vmatpush.msrb.mxu0 %v192_v29  ;;  %v233_v14 = vld [vmem:[%s1541_s1 + $0x398] sm:$0xff]  ;;  %v232_v18 = vld [vmem:[%s1541_s1 + $0x390] sm:$0xff]  ;;  %v70_v19 = vld [vmem:[%s1542_s0 + $0x1c0] sm:$0xff] }
  0x32   :  { %272 = vmatmul.f32.gmra.mxu0 %v30_v30  ;;  %384 = vmatmul.f32.gmra.mxu2 %v32_v31  ;;  %v201_v15 = vld [vmem:[%s1541_s1 + $0x298] sm:$0xff]  ;;  %v72_v20 = vld [vmem:[%s1542_s0 + $0x1d0] sm:$0xff]  ;;  %v71_v21 = vld [vmem:[%s1542_s0 + $0x1c8] sm:$0xff] }
  0x33   :  { %647 = vmatpush.msrb.mxu3 %v240_v32  ;;  %535 = vmatpush.msrb.mxu1 %v208_v33  ;;  %v73_v22 = vld [vmem:[%s1542_s0 + $0x1d8] sm:$0xff]  ;;  %v200_v23 = vld [vmem:[%s1541_s1 + $0x290] sm:$0xff]  ;;  %v215_v24 = vld [vmem:[%s1541_s1 + $0x308] sm:$0xff] }
  0x34   :  { %328 = vmatmul.f32.gmra.mxu1 %v31_v34  ;;  %592 = vmatpush.msrb.mxu2 %v223_v35  ;;  %v183_v25 = vld [vmem:[%s1541_s1 + $0x208] sm:$0xff]  ;;  %v78_v28 = vld [vmem:[%s1542_s0 + $0x200] sm:$0xff]  ;;  %v80_v29 = vld [vmem:[%s1542_s0 + $0x210] sm:$0xff] }
  0x35   :  { %440 = vmatmul.f32.gmra.mxu3 %v33_v36  ;;  %480 = vmatpush.msrb.mxu0 %v191_v37  ;;  %v231_v26 = vld [vmem:[%s1541_s1 + $0x388] sm:$0xff]  ;;  %v81_v31 = vld [vmem:[%s1542_s0 + $0x218] sm:$0xff]  ;;  %v214_v32 = vld [vmem:[%s1541_s1 + $0x300] sm:$0xff] }
  0x36   :  { %648 = vmatpush.msrb.mxu3 %v239_v38  ;;  %536 = vmatpush.msrb.mxu1 %v207_v39  ;;  %v199_v27 = vld [vmem:[%s1541_s1 + $0x288] sm:$0xff]  ;;  %v182_v33 = vld [vmem:[%s1541_s1 + $0x200] sm:$0xff]  ;;  %v88_v37 = vld [vmem:[%s1542_s0 + $0x250] sm:$0xff] }
  0x37   :  { %593 = vmatpush.msrb.mxu2 %v222_v40  ;;  %481 = vmatpush.msrb.mxu0 %v190_v41  ;;  %v79_v30 = vld [vmem:[%s1542_s0 + $0x208] sm:$0xff]  ;;  %v230_v34 = vld [vmem:[%s1541_s1 + $0x380] sm:$0xff]  ;;  %v89_v39 = vld [vmem:[%s1542_s0 + $0x258] sm:$0xff] }
  0x38   :  { %649 = vmatpush.msrb.mxu3 %v238_v42  ;;  %537 = vmatpush.msrb.mxu1 %v206_v43  ;;  %v198_v35 = vld [vmem:[%s1541_s1 + $0x280] sm:$0xff]  ;;  %v87_v38 = vld [vmem:[%s1542_s0 + $0x248] sm:$0xff]  ;;  %v96_v41 = vld [vmem:[%s1542_s0 + $0x290] sm:$0xff] }
  0x39   :  { %594 = vmatpush.msrb.mxu2 %v221_v44  ;;  %482 = vmatpush.msrb.mxu0 %v189_v45  ;;  %v86_v36 = vld [vmem:[%s1542_s0 + $0x240] sm:$0xff]  ;;  %v95_v42 = vld [vmem:[%s1542_s0 + $0x288] sm:$0xff]  ;;  %v97_v43 = vld [vmem:[%s1542_s0 + $0x298] sm:$0xff] }
  0x3a   :  { %275 = vmatmul.f32.gmra.mxu0 %v38_v46  ;;  %387 = vmatmul.f32.gmra.mxu2 %v40_v47  ;;  %v94_v40 = vld [vmem:[%s1542_s0 + $0x280] sm:$0xff]  ;;  %v104_v45 = vld [vmem:[%s1542_s0 + $0x2d0] sm:$0xff]  ;;  %v103_v46 = vld [vmem:[%s1542_s0 + $0x2c8] sm:$0xff] }
  0x3b   :  { %650 = vmatpush.msrb.mxu3 %v237_v48  ;;  %538 = vmatpush.msrb.mxu1 %v205_v51  ;;  %v102_v44 = vld [vmem:[%s1542_s0 + $0x2c0] sm:$0xff]  ;;  %v105_v47 = vld [vmem:[%s1542_s0 + $0x2d8] sm:$0xff] }
  0x3c   :  { %331 = vmatmul.f32.gmra.mxu1 %v39_v49  ;;  %595 = vmatpush.msrb.mxu2 %v220_v52  ;;  %v110_v48 = vld [vmem:[%s1542_s0 + $0x300] sm:$0xf]  ;;  %v112_v49 = vld [vmem:[%s1542_s0 + $0x310] sm:$0xf]  ;;  %v113_v51 = vld [vmem:[%s1542_s0 + $0x318] sm:$0xf] }
  0x3d   :  { %443 = vmatmul.f32.gmra.mxu3 %v41_v50  ;;  %483 = vmatpush.msrb.mxu0 %v188_v53  ;;  %v111_v50 = vld [vmem:[%s1542_s0 + $0x308] sm:$0xf]  ;;  %v18_v52 = vld [vmem:[%s1542_s0 + $0x20] sm:$0xff]  ;;  %v20_v53 = vld [vmem:[%s1542_s0 + $0x30] sm:$0xff] }
  0x3e   :  { %651 = vmatpush.msrb.mxu3 %v236_v54  ;;  %539 = vmatpush.msrb.mxu1 %v204_v55  ;;  %v19_v54 = vld [vmem:[%s1542_s0 + $0x28] sm:$0xff]  ;;  %v21_v55 = vld [vmem:[%s1542_s0 + $0x38] sm:$0xff] }
  0x3f   :  { %596 = vmatpush.msrb.mxu2 %v219_v60  ;;  %484 = vmatpush.msrb.mxu0 %v187_v61  ;;  %v34_v60 = vld [vmem:[%s1542_s0 + $0xa0] sm:$0xff]  ;;  %v36_v61 = vld [vmem:[%s1542_s0 + $0xb0] sm:$0xff] }
  0x40   :  { %652 = vmatpush.msrb.mxu3 %v235_v62  ;;  %540 = vmatpush.msrb.mxu1 %v203_v63  ;;  %v35_v62 = vld [vmem:[%s1542_s0 + $0xa8] sm:$0xff]  ;;  %v37_v63 = vld [vmem:[%s1542_s0 + $0xb8] sm:$0xff] }
  0x41   :  { %597 = vmatpush.msrb.mxu2 %v218_v4  ;;  %485 = vmatpush.msrb.mxu0 %v186_v5 }
  0x42   :  { %278 = vmatmul.f32.gmra.mxu0 %v46_v56  ;;  %390 = vmatmul.f32.gmra.mxu2 %v48_v57  ;;  %v26_v56 = vld [vmem:[%s1542_s0 + $0x60] sm:$0xff]  ;;  %v28_v57 = vld [vmem:[%s1542_s0 + $0x70] sm:$0xff] }
  0x43   :  { %653 = vmatpush.msrb.mxu3 %v234_v6  ;;  %541 = vmatpush.msrb.mxu1 %v202_v7  ;;  %v43_v6 = vld [vmem:[%s1542_s0 + $0xe8] sm:$0xff] }
  0x44   :  { %334 = vmatmul.f32.gmra.mxu1 %v47_v58  ;;  %598 = vmatpush.msrb.mxu2 %v217_v8  ;;  %v27_v58 = vld [vmem:[%s1542_s0 + $0x68] sm:$0xff]  ;;  %v45_v8 = vld [vmem:[%s1542_s0 + $0xf8] sm:$0xff] }
  0x45   :  { %446 = vmatmul.f32.gmra.mxu3 %v49_v59  ;;  %486 = vmatpush.msrb.mxu0 %v185_v13  ;;  %v29_v59 = vld [vmem:[%s1542_s0 + $0x78] sm:$0xff]  ;;  %v52_v13 = vld [vmem:[%s1542_s0 + $0x130] sm:$0xff] }
  0x46   :  { %654 = vmatpush.msrb.mxu3 %v233_v14  ;;  %542 = vmatpush.msrb.mxu1 %v201_v15 }
  0x47   :  { %599 = vmatpush.msrb.mxu2 %v216_v16  ;;  %487 = vmatpush.msrb.mxu0 %v184_v17 }
  0x48   :  { %655 = vmatpush.msrb.mxu3 %v232_v18  ;;  %543 = vmatpush.msrb.mxu1 %v200_v23  ;;  %v51_v18 = vld [vmem:[%s1542_s0 + $0x128] sm:$0xff] }
  0x49   :  { %600 = vmatpush.msrb.mxu2 %v215_v24  ;;  %488 = vmatpush.msrb.mxu0 %v183_v25  ;;  %v58_v24 = vld [vmem:[%s1542_s0 + $0x160] sm:$0xff]  ;;  %v60_v25 = vld [vmem:[%s1542_s0 + $0x170] sm:$0xff] }
  0x4a   :  { %281 = vmatmul.f32.gmra.mxu0 %v54_v0  ;;  %393 = vmatmul.f32.gmra.mxu2 %v56_v1  ;;  %v1328_v0 = vld [vmem:[%s1543_s2] ss:$0 sm:$0xff] }
  0x4b   :  { %656 = vmatpush.msrb.mxu3 %v231_v26  ;;  %544 = vmatpush.msrb.mxu1 %v199_v27 }
  0x4c   :  { %337 = vmatmul.f32.gmra.mxu1 %v55_v2  ;;  %601 = vmatpush.msrb.mxu2 %v214_v32  ;;  %v42_v2 = vld [vmem:[%s1542_s0 + $0xe0] sm:$0xff]  ;;  %v61_v32 = vld [vmem:[%s1542_s0 + $0x178] sm:$0xff] }
  0x4d   :  { %449 = vmatmul.f32.gmra.mxu3 %v57_v3  ;;  %489 = vmatpush.msrb.mxu0 %v182_v33  ;;  %v44_v3 = vld [vmem:[%s1542_s0 + $0xf0] sm:$0xff] }
  0x4e   :  { %657 = vmatpush.msrb.mxu3 %v230_v34  ;;  %545 = vmatpush.msrb.mxu1 %v198_v35 }
  0x52   :  { %284 = vmatmul.f32.gmra.mxu0 %v62_v9  ;;  %396 = vmatmul.f32.gmra.mxu2 %v64_v10 }
  0x54   :  { %340 = vmatmul.f32.gmra.mxu1 %v63_v11 }
  0x55   :  { %452 = vmatmul.f32.gmra.mxu3 %v65_v12  ;;  %v50_v12 = vld [vmem:[%s1542_s0 + $0x120] sm:$0xff] }
  0x5a   :  { %287 = vmatmul.f32.gmra.mxu0 %v70_v19  ;;  %399 = vmatmul.f32.gmra.mxu2 %v72_v20  ;;  %v53_v20 = vld [vmem:[%s1542_s0 + $0x138] sm:$0xff] }
  0x5c   :  { %343 = vmatmul.f32.gmra.mxu1 %v71_v21 }
  0x5d   :  { %455 = vmatmul.f32.gmra.mxu3 %v73_v22 }
  0x62   :  { %290 = vmatmul.f32.gmra.mxu0 %v78_v28  ;;  %402 = vmatmul.f32.gmra.mxu2 %v80_v29 }
  0x64   :  { %346 = vmatmul.f32.gmra.mxu1 %v79_v30  ;;  %v59_v30 = vld [vmem:[%s1542_s0 + $0x168] sm:$0xff] }
  0x65   :  { %458 = vmatmul.f32.gmra.mxu3 %v81_v31 }
  0x6a   :  { %293 = vmatmul.f32.gmra.mxu0 %v86_v36  ;;  %405 = vmatmul.f32.gmra.mxu2 %v88_v37  ;;  %v66_v36 = vld [vmem:[%s1542_s0 + $0x1a0] sm:$0xff]  ;;  %v68_v37 = vld [vmem:[%s1542_s0 + $0x1b0] sm:$0xff] }
  0x6c   :  { %349 = vmatmul.f32.gmra.mxu1 %v87_v38 }
  0x6d   :  { %461 = vmatmul.f32.gmra.mxu3 %v89_v39 }
  0x72   :  { %296 = vmatmul.f32.gmra.mxu0 %v94_v40  ;;  %408 = vmatmul.f32.gmra.mxu2 %v96_v41 }
  0x74   :  { %352 = vmatmul.f32.gmra.mxu1 %v95_v42  ;;  %v67_v42 = vld [vmem:[%s1542_s0 + $0x1a8] sm:$0xff] }
  0x75   :  { %464 = vmatmul.f32.gmra.mxu3 %v97_v43 }
  0x7a   :  { %299 = vmatmul.f32.gmra.mxu0 %v102_v44  ;;  %411 = vmatmul.f32.gmra.mxu2 %v104_v45  ;;  %v69_v44 = vld [vmem:[%s1542_s0 + $0x1b8] sm:$0xff] }
  0x7c   :  { %355 = vmatmul.f32.gmra.mxu1 %v103_v46 }
  0x7d   :  { %467 = vmatmul.f32.gmra.mxu3 %v105_v47 }
  0x82   :  { %302 = vmatmul.f32.gmra.mxu0 %v110_v48  ;;  %414 = vmatmul.f32.gmra.mxu2 %v112_v49  ;;  %v74_v48 = vld [vmem:[%s1542_s0 + $0x1e0] sm:$0xff]  ;;  %v76_v49 = vld [vmem:[%s1542_s0 + $0x1f0] sm:$0xff] }
  0x84   :  { %358 = vmatmul.f32.gmra.mxu1 %v111_v50 }
  0x85   :  { %470 = vmatmul.f32.gmra.mxu3 %v113_v51 }
  0x8a   :  { %490 = vmatmul.f32.vlgmr.msrb.gmra.mxu0 %v18_v52  ;;  %602 = vmatmul.f32.vlgmr.msrb.gmra.mxu2 %v20_v53 }
  0x8c   :  { %546 = vmatmul.f32.vlgmr.msrb.gmra.mxu1 %v19_v54  ;;  %v75_v54 = vld [vmem:[%s1542_s0 + $0x1e8] sm:$0xff] }
  0x8d   :  { %658 = vmatmul.f32.vlgmr.msrb.gmra.mxu3 %v21_v55 }
  0x92   :  { %493 = vmatmul.f32.gmra.mxu0 %v26_v56  ;;  %605 = vmatmul.f32.gmra.mxu2 %v28_v57  ;;  %v77_v56 = vld [vmem:[%s1542_s0 + $0x1f8] sm:$0xff] }
  0x94   :  { %549 = vmatmul.f32.gmra.mxu1 %v27_v58 }
  0x95   :  { %661 = vmatmul.f32.gmra.mxu3 %v29_v59 }
  0x9a   :  { %496 = vmatmul.f32.gmra.mxu0 %v34_v60  ;;  %608 = vmatmul.f32.gmra.mxu2 %v36_v61  ;;  %v82_v60 = vld [vmem:[%s1542_s0 + $0x220] sm:$0xff]  ;;  %v84_v61 = vld [vmem:[%s1542_s0 + $0x230] sm:$0xff] }
  0x9c   :  { %552 = vmatmul.f32.gmra.mxu1 %v35_v62 }
  0x9d   :  { %664 = vmatmul.f32.gmra.mxu3 %v37_v63 }
  0x9f   :  { %v267_v1 = vpop.f32.mrf.mxu0 }
  0xa0   :  { %v268_v4 = vadd.f32 %v1328_v0, %v267_v1 }
  0xa1   :  { %v323_v5 = vpop.f32.mrf.mxu1 }
  0xa2   :  { %v324_v7 = vadd.f32 %v323_v5, %v268_v4  ;;  %499 = vmatmul.f32.gmra.mxu0 %v42_v2  ;;  %611 = vmatmul.f32.gmra.mxu2 %v44_v3  ;;  %v83_v3 = vld [vmem:[%s1542_s0 + $0x228] sm:$0xff]  ;;  %v85_v5 = vld [vmem:[%s1542_s0 + $0x238] sm:$0xff] }
  0xa4   :  { %555 = vmatmul.f32.gmra.mxu1 %v43_v6 }
  0xa5   :  { %667 = vmatmul.f32.gmra.mxu3 %v45_v8  ;;  %v379_v9 = vpop.f32.mrf.mxu2 }
  0xa6   :  { %v380_v10 = vadd.f32 %v379_v9, %v324_v7  ;;  %v90_v9 = vld [vmem:[%s1542_s0 + $0x260] sm:$0xff] }
  0xa7   :  { %v270_v11 = vpop.f32.mrf.mxu0 }
  0xa8   :  { %v271_v14 = vadd.f32 %v1328_v0, %v270_v11  ;;  %v435_v15 = vpop.f32.mrf.mxu3 }
  0xa9   :  { %v1350_v16 = vadd.f32 %v435_v15, %v380_v10  ;;  %v326_v17 = vpop.f32.mrf.mxu1  ;;  %v92_v10 = vld [vmem:[%s1542_s0 + $0x270] sm:$0xff]  ;;  %v91_v15 = vld [vmem:[%s1542_s0 + $0x268] sm:$0xff] }
  0xaa   :  { %v327_v19 = vadd.f32 %v326_v17, %v271_v14  ;;  %502 = vmatmul.f32.gmra.mxu0 %v50_v12  ;;  %614 = vmatmul.f32.gmra.mxu2 %v52_v13 }
  0xac   :  { %558 = vmatmul.f32.gmra.mxu1 %v51_v18  ;;  %v93_v18 = vld [vmem:[%s1542_s0 + $0x278] sm:$0xff] }
  0xad   :  { %670 = vmatmul.f32.gmra.mxu3 %v53_v20  ;;  %v382_v21 = vpop.f32.mrf.mxu2 }
  0xae   :  { %v383_v22 = vadd.f32 %v382_v21, %v327_v19 }
  0xaf   :  { %v273_v23 = vpop.f32.mrf.mxu0 }
  0xb0   :  { %v274_v26 = vadd.f32 %v1328_v0, %v273_v23  ;;  %v438_v27 = vpop.f32.mrf.mxu3  ;;  %v100_v23 = vld [vmem:[%s1542_s0 + $0x2b0] sm:$0xff] }
  0xb1   :  { %v1365_v28 = vadd.f32 %v438_v27, %v383_v22  ;;  %v329_v29 = vpop.f32.mrf.mxu1  ;;  %v98_v22 = vld [vmem:[%s1542_s0 + $0x2a0] sm:$0xff] }
  0xb2   :  { %v330_v31 = vadd.f32 %v329_v29, %v274_v26  ;;  %505 = vmatmul.f32.gmra.mxu0 %v58_v24  ;;  %617 = vmatmul.f32.gmra.mxu2 %v60_v25  ;;  %v99_v29 = vld [vmem:[%s1542_s0 + $0x2a8] sm:$0xff] }
  0xb4   :  { %561 = vmatmul.f32.gmra.mxu1 %v59_v30 }
  0xb5   :  { %673 = vmatmul.f32.gmra.mxu3 %v61_v32  ;;  %v385_v33 = vpop.f32.mrf.mxu2 }
  0xb6   :  { %v386_v34 = vadd.f32 %v385_v33, %v330_v31  ;;  %v101_v31 = vld [vmem:[%s1542_s0 + $0x2b8] sm:$0xff] }
  0xb7   :  { %v276_v35 = vpop.f32.mrf.mxu0 }
  0xb8   :  { %v277_v38 = vadd.f32 %v1328_v0, %v276_v35  ;;  %v441_v39 = vpop.f32.mrf.mxu3  ;;  %v106_v35 = vld [vmem:[%s1542_s0 + $0x2e0] sm:$0xff] }
  0xb9   :  { %v1380_v40 = vadd.f32 %v441_v39, %v386_v34  ;;  %v332_v41 = vpop.f32.mrf.mxu1 }
  0xba   :  { %v333_v43 = vadd.f32 %v332_v41, %v277_v38  ;;  %508 = vmatmul.f32.gmra.mxu0 %v66_v36  ;;  %620 = vmatmul.f32.gmra.mxu2 %v68_v37  ;;  %v108_v36 = vld [vmem:[%s1542_s0 + $0x2f0] sm:$0xff] }
  0xbc   :  { %564 = vmatmul.f32.gmra.mxu1 %v67_v42  ;;  %v107_v42 = vld [vmem:[%s1542_s0 + $0x2e8] sm:$0xff] }
  0xbd   :  { %676 = vmatmul.f32.gmra.mxu3 %v69_v44  ;;  %v388_v45 = vpop.f32.mrf.mxu2  ;;  %v109_v44 = vld [vmem:[%s1542_s0 + $0x2f8] sm:$0xff] }
  0xbe   :  { %v389_v46 = vadd.f32 %v388_v45, %v333_v43 }
  0xbf   :  { %v279_v47 = vpop.f32.mrf.mxu0 }
  0xc0   :  { %v280_v50 = vadd.f32 %v1328_v0, %v279_v47  ;;  %v444_v51 = vpop.f32.mrf.mxu3 }
  0xc1   :  { %v1395_v52 = vadd.f32 %v444_v51, %v389_v46  ;;  %v335_v53 = vpop.f32.mrf.mxu1 }
  0xc2   :  { %v336_v55 = vadd.f32 %v335_v53, %v280_v50  ;;  %511 = vmatmul.f32.gmra.mxu0 %v74_v48  ;;  %623 = vmatmul.f32.gmra.mxu2 %v76_v49  ;;  %v114_v48 = vld [vmem:[%s1542_s0 + $0x320] sm:$0xf]  ;;  %v116_v49 = vld [vmem:[%s1542_s0 + $0x330] sm:$0xf] }
  0xc4   :  { %567 = vmatmul.f32.gmra.mxu1 %v75_v54 }
  0xc5   :  { %679 = vmatmul.f32.gmra.mxu3 %v77_v56  ;;  %v391_v57 = vpop.f32.mrf.mxu2 }
  0xc6   :  { %v392_v58 = vadd.f32 %v391_v57, %v336_v55  ;;  %v115_v55 = vld [vmem:[%s1542_s0 + $0x328] sm:$0xf]  ;;  %v117_v57 = vld [vmem:[%s1542_s0 + $0x338] sm:$0xf] }
  0xc7   :  { %v282_v59 = vpop.f32.mrf.mxu0 }
  0xc8   :  { %v283_v62 = vadd.f32 %v1328_v0, %v282_v59  ;;  %v447_v63 = vpop.f32.mrf.mxu3 }
  0xc9   :  { %v1410_v1 = vadd.f32 %v447_v63, %v392_v58  ;;  %v338_v2 = vpop.f32.mrf.mxu1 }
  0xca   :  { %v339_v4 = vadd.f32 %v338_v2, %v283_v62  ;;  %514 = vmatmul.f32.gmra.mxu0 %v82_v60  ;;  %626 = vmatmul.f32.gmra.mxu2 %v84_v61 }
  0xcc   :  { %570 = vmatmul.f32.gmra.mxu1 %v83_v3 }
  0xcd   :  { %682 = vmatmul.f32.gmra.mxu3 %v85_v5  ;;  %v394_v6 = vpop.f32.mrf.mxu2 }
  0xce   :  { %v395_v7 = vadd.f32 %v394_v6, %v339_v4 }
  0xcf   :  { %v285_v8 = vpop.f32.mrf.mxu0 }
  0xd0   :  { %v286_v11 = vadd.f32 %v1328_v0, %v285_v8  ;;  %v450_v12 = vpop.f32.mrf.mxu3 }
  0xd1   :  { %v1425_v13 = vadd.f32 %v450_v12, %v395_v7  ;;  %v341_v14 = vpop.f32.mrf.mxu1 }
  0xd2   :  { %v342_v17 = vadd.f32 %v341_v14, %v286_v11  ;;  %517 = vmatmul.f32.gmra.mxu0 %v90_v9  ;;  %629 = vmatmul.f32.gmra.mxu2 %v92_v10 }
  0xd4   :  { %573 = vmatmul.f32.gmra.mxu1 %v91_v15 }
  0xd5   :  { %685 = vmatmul.f32.gmra.mxu3 %v93_v18  ;;  %v397_v19 = vpop.f32.mrf.mxu2 }
  0xd6   :  { %v398_v20 = vadd.f32 %v397_v19, %v342_v17 }
  0xd7   :  { %v288_v21 = vpop.f32.mrf.mxu0 }
  0xd8   :  { %v289_v24 = vadd.f32 %v1328_v0, %v288_v21  ;;  %v453_v25 = vpop.f32.mrf.mxu3 }
  0xd9   :  { %v1440_v26 = vadd.f32 %v453_v25, %v398_v20  ;;  %v344_v27 = vpop.f32.mrf.mxu1 }
  0xda   :  { %v345_v30 = vadd.f32 %v344_v27, %v289_v24  ;;  %520 = vmatmul.f32.gmra.mxu0 %v98_v22  ;;  %632 = vmatmul.f32.gmra.mxu2 %v100_v23 }
  0xdc   :  { %576 = vmatmul.f32.gmra.mxu1 %v99_v29 }
  0xdd   :  { %688 = vmatmul.f32.gmra.mxu3 %v101_v31  ;;  %v400_v32 = vpop.f32.mrf.mxu2 }
  0xde   :  { %v401_v33 = vadd.f32 %v400_v32, %v345_v30 }
  0xdf   :  { %v291_v34 = vpop.f32.mrf.mxu0 }
  0xe0   :  { %v292_v37 = vadd.f32 %v1328_v0, %v291_v34  ;;  %v456_v38 = vpop.f32.mrf.mxu3 }
  0xe1   :  { %v1455_v39 = vadd.f32 %v456_v38, %v401_v33  ;;  %v347_v41 = vpop.f32.mrf.mxu1 }
  0xe2   :  { %v348_v43 = vadd.f32 %v347_v41, %v292_v37  ;;  %523 = vmatmul.f32.gmra.mxu0 %v106_v35  ;;  %635 = vmatmul.f32.gmra.mxu2 %v108_v36 }
  0xe4   :  { %579 = vmatmul.f32.gmra.mxu1 %v107_v42 }
  0xe5   :  { %691 = vmatmul.f32.gmra.mxu3 %v109_v44  ;;  %v403_v45 = vpop.f32.mrf.mxu2 }
  0xe6   :  { %v404_v46 = vadd.f32 %v403_v45, %v348_v43 }
  0xe7   :  { %v294_v47 = vpop.f32.mrf.mxu0 }
  0xe8   :  { %v295_v50 = vadd.f32 %v1328_v0, %v294_v47  ;;  %v459_v51 = vpop.f32.mrf.mxu3 }
  0xe9   :  { %v1470_v53 = vadd.f32 %v459_v51, %v404_v46  ;;  %v350_v54 = vpop.f32.mrf.mxu1 }
  0xea   :  { %v351_v56 = vadd.f32 %v350_v54, %v295_v50  ;;  %526 = vmatmul.f32.gmra.mxu0 %v114_v48  ;;  %638 = vmatmul.f32.gmra.mxu2 %v116_v49 }
  0xec   :  { %582 = vmatmul.f32.gmra.mxu1 %v115_v55 }
  0xed   :  { %694 = vmatmul.f32.gmra.mxu3 %v117_v57  ;;  %v406_v58 = vpop.f32.mrf.mxu2 }
  0xee   :  { %v407_v59 = vadd.f32 %v406_v58, %v351_v56 }
  0xef   :  { %v297_v60 = vpop.f32.mrf.mxu0 }
  0xf0   :  { %v298_v61 = vadd.f32 %v1328_v0, %v297_v60  ;;  %v462_v62 = vpop.f32.mrf.mxu3 }
  0xf1   :  { %v1479_v63 = vadd.f32 %v462_v62, %v407_v59  ;;  %v353_v2 = vpop.f32.mrf.mxu1 }
  0xf2   :  { %v354_v3 = vadd.f32 %v353_v2, %v298_v61 }
  0xf5   :  { %v409_v4 = vpop.f32.mrf.mxu2 }
  0xf6   :  { %v410_v5 = vadd.f32 %v409_v4, %v354_v3 }
  0xf7   :  { %v300_v6 = vpop.f32.mrf.mxu0 }
  0xf8   :  { %v301_v7 = vadd.f32 %v1328_v0, %v300_v6  ;;  %v465_v8 = vpop.f32.mrf.mxu3 }
  0xf9   :  { %v1482_v9 = vadd.f32 %v465_v8, %v410_v5  ;;  %v356_v10 = vpop.f32.mrf.mxu1 }
  0xfa   :  { %v357_v11 = vadd.f32 %v356_v10, %v301_v7 }
  0xfd   :  { %v412_v12 = vpop.f32.mrf.mxu2 }
  0xfe   :  { %v413_v14 = vadd.f32 %v412_v12, %v357_v11 }
  0xff   :  { %v303_v15 = vpop.f32.mrf.mxu0 }
 0x100   :  { %v304_v17 = vadd.f32 %v1328_v0, %v303_v15  ;;  %v468_v18 = vpop.f32.mrf.mxu3 }
 0x101   :  { %v1485_v19 = vadd.f32 %v468_v18, %v413_v14  ;;  %v359_v20 = vpop.f32.mrf.mxu1 }
 0x102   :  { %v360_v21 = vadd.f32 %v359_v20, %v304_v17 }
 0x105   :  { %v415_v22 = vpop.f32.mrf.mxu2 }
 0x106   :  { %v416_v23 = vadd.f32 %v415_v22, %v360_v21 }
 0x107   :  { %v491_v24 = vpop.f32.mrf.mxu0 }
 0x108   :  { %v471_v25 = vpop.f32.mrf.mxu3  ;;  %v492_v27 = vadd.f32 %v491_v24, %v1350_v16 }
 0x109   :  { %v1488_v29 = vadd.f32 %v471_v25, %v416_v23  ;;  %v547_v30 = vpop.f32.mrf.mxu1 }
 0x10a   :  { %v548_v31 = vadd.f32 %v547_v30, %v492_v27 }
 0x10d   :  { %v603_v32 = vpop.f32.mrf.mxu2 }
 0x10e   :  { %v604_v33 = vadd.f32 %v603_v32, %v548_v31 }
 0x10f   :  { %v494_v34 = vpop.f32.mrf.mxu0 }
 0x110   :  { %v495_v0 = vadd.f32 %v494_v34, %v1365_v28  ;;  %v659_v35 = vpop.f32.mrf.mxu3 }
 0x111   :  { %v660_v36 = vadd.f32 %v659_v35, %v604_v33  ;;  %v550_v37 = vpop.f32.mrf.mxu1 }
 0x112   :  { %v551_v41 = vadd.f32 %v550_v37, %v495_v0 }
 0x113   :  { %v698_v38 = vmax.f32 %v660_v36, 0.0 }
 0x115   :  { %711 = vst [vmem:[%s1544_s3] sm:$0xff] %v698_v38  ;;  %v606_v42 = vpop.f32.mrf.mxu2 }
 0x116   :  { %v607_v16 = vadd.f32 %v606_v42, %v551_v41 }
 0x117   :  { %v497_v43 = vpop.f32.mrf.mxu0 }
 0x118   :  { %v498_v44 = vadd.f32 %v497_v43, %v1380_v40  ;;  %v662_v45 = vpop.f32.mrf.mxu3 }
 0x119   :  { %v663_v46 = vadd.f32 %v662_v45, %v607_v16  ;;  %v553_v47 = vpop.f32.mrf.mxu1 }
 0x11a   :  { %v554_v49 = vadd.f32 %v553_v47, %v498_v44 }
 0x11b   :  { %v699_v48 = vmax.f32 %v663_v46, 0.0 }
 0x11d   :  { %712 = vst [vmem:[%s1544_s3 + $0x8] sm:$0xff] %v699_v48  ;;  %v609_v28 = vpop.f32.mrf.mxu2 }
 0x11e   :  { %v610_v50 = vadd.f32 %v609_v28, %v554_v49 }
 0x11f   :  { %v500_v51 = vpop.f32.mrf.mxu0 }
 0x120   :  { %v501_v54 = vadd.f32 %v500_v51, %v1395_v52  ;;  %v665_v55 = vpop.f32.mrf.mxu3 }
 0x121   :  { %v666_v56 = vadd.f32 %v665_v55, %v610_v50  ;;  %v556_v57 = vpop.f32.mrf.mxu1 }
 0x122   :  { %v557_v59 = vadd.f32 %v556_v57, %v501_v54 }
 0x123   :  { %v700_v58 = vmax.f32 %v666_v56, 0.0 }
 0x125   :  { %713 = vst [vmem:[%s1544_s3 + $0x10] sm:$0xff] %v700_v58  ;;  %v612_v40 = vpop.f32.mrf.mxu2 }
 0x126   :  { %v613_v60 = vadd.f32 %v612_v40, %v557_v59 }
 0x127   :  { %v503_v61 = vpop.f32.mrf.mxu0 }
 0x128   :  { %v504_v62 = vadd.f32 %v503_v61, %v1410_v1  ;;  %v668_v2 = vpop.f32.mrf.mxu3 }
 0x129   :  { %v669_v3 = vadd.f32 %v668_v2, %v613_v60  ;;  %v559_v4 = vpop.f32.mrf.mxu1 }
 0x12a   :  { %v560_v6 = vadd.f32 %v559_v4, %v504_v62 }
 0x12b   :  { %v701_v5 = vmax.f32 %v669_v3, 0.0 }
 0x12d   :  { %714 = vst [vmem:[%s1544_s3 + $0x18] sm:$0xff] %v701_v5  ;;  %v615_v52 = vpop.f32.mrf.mxu2 }
 0x12e   :  { %v616_v7 = vadd.f32 %v615_v52, %v560_v6 }
 0x12f   :  { %v506_v8 = vpop.f32.mrf.mxu0 }
 0x130   :  { %v507_v10 = vadd.f32 %v506_v8, %v1425_v13  ;;  %v671_v11 = vpop.f32.mrf.mxu3 }
 0x131   :  { %v672_v12 = vadd.f32 %v671_v11, %v616_v7  ;;  %v562_v14 = vpop.f32.mrf.mxu1 }
 0x132   :  { %v563_v17 = vadd.f32 %v562_v14, %v507_v10 }
 0x133   :  { %v702_v15 = vmax.f32 %v672_v12, 0.0 }
 0x135   :  { %715 = vst [vmem:[%s1544_s3 + $0x20] sm:$0xff] %v702_v15  ;;  %v618_v1 = vpop.f32.mrf.mxu2 }
 0x136   :  { %v619_v18 = vadd.f32 %v618_v1, %v563_v17 }
 0x137   :  { %v509_v20 = vpop.f32.mrf.mxu0 }
 0x138   :  { %v510_v21 = vadd.f32 %v509_v20, %v1440_v26  ;;  %v674_v22 = vpop.f32.mrf.mxu3 }
 0x139   :  { %v675_v23 = vadd.f32 %v674_v22, %v619_v18  ;;  %v565_v24 = vpop.f32.mrf.mxu1 }
 0x13a   :  { %v566_v27 = vadd.f32 %v565_v24, %v510_v21 }
 0x13b   :  { %v703_v25 = vmax.f32 %v675_v23, 0.0 }
 0x13d   :  { %716 = vst [vmem:[%s1544_s3 + $0x28] sm:$0xff] %v703_v25  ;;  %v621_v13 = vpop.f32.mrf.mxu2 }
 0x13e   :  { %v622_v30 = vadd.f32 %v621_v13, %v566_v27 }
 0x13f   :  { %v512_v31 = vpop.f32.mrf.mxu0 }
 0x140   :  { %v513_v32 = vadd.f32 %v512_v31, %v1455_v39  ;;  %v677_v33 = vpop.f32.mrf.mxu3 }
 0x141   :  { %v678_v34 = vadd.f32 %v677_v33, %v622_v30  ;;  %v568_v0 = vpop.f32.mrf.mxu1 }
 0x142   :  { %v569_v36 = vadd.f32 %v568_v0, %v513_v32 }
 0x143   :  { %v704_v35 = vmax.f32 %v678_v34, 0.0 }
 0x145   :  { %717 = vst [vmem:[%s1544_s3 + $0x30] sm:$0xff] %v704_v35  ;;  %v624_v26 = vpop.f32.mrf.mxu2 }
 0x146   :  { %v625_v37 = vadd.f32 %v624_v26, %v569_v36 }
 0x147   :  { %v515_v38 = vpop.f32.mrf.mxu0 }
 0x148   :  { %v516_v41 = vadd.f32 %v515_v38, %v1470_v53  ;;  %v680_v42 = vpop.f32.mrf.mxu3 }
 0x149   :  { %v681_v16 = vadd.f32 %v680_v42, %v625_v37  ;;  %v571_v43 = vpop.f32.mrf.mxu1 }
 0x14a   :  { %v572_v45 = vadd.f32 %v571_v43, %v516_v41 }
 0x14b   :  { %v705_v44 = vmax.f32 %v681_v16, 0.0 }
 0x14d   :  { %718 = vst [vmem:[%s1544_s3 + $0x38] sm:$0xff] %v705_v44  ;;  %v627_v39 = vpop.f32.mrf.mxu2 }
 0x14e   :  { %v628_v46 = vadd.f32 %v627_v39, %v572_v45 }
 0x14f   :  { %v518_v47 = vpop.f32.mrf.mxu0 }
 0x150   :  { %v519_v48 = vadd.f32 %v518_v47, %v1479_v63  ;;  %v683_v49 = vpop.f32.mrf.mxu3 }
 0x151   :  { %v684_v28 = vadd.f32 %v683_v49, %v628_v46  ;;  %v574_v50 = vpop.f32.mrf.mxu1 }
 0x152   :  { %v575_v54 = vadd.f32 %v574_v50, %v519_v48 }
 0x153   :  { %v706_v51 = vmax.f32 %v684_v28, 0.0 }
 0x155   :  { %719 = vst [vmem:[%s1544_s3 + $0x40] sm:$0xff] %v706_v51  ;;  %v630_v53 = vpop.f32.mrf.mxu2 }
 0x156   :  { %v631_v55 = vadd.f32 %v630_v53, %v575_v54 }
 0x157   :  { %v521_v56 = vpop.f32.mrf.mxu0 }
 0x158   :  { %v522_v57 = vadd.f32 %v521_v56, %v1482_v9  ;;  %v686_v58 = vpop.f32.mrf.mxu3 }
 0x159   :  { %v687_v59 = vadd.f32 %v686_v58, %v631_v55  ;;  %v577_v40 = vpop.f32.mrf.mxu1 }
 0x15a   :  { %v578_v61 = vadd.f32 %v577_v40, %v522_v57 }
 0x15b   :  { %v707_v60 = vmax.f32 %v687_v59, 0.0 }
 0x15d   :  { %720 = vst [vmem:[%s1544_s3 + $0x48] sm:$0xff] %v707_v60  ;;  %v633_v63 = vpop.f32.mrf.mxu2 }
 0x15e   :  { %v634_v62 = vadd.f32 %v633_v63, %v578_v61 }
 0x15f   :  { %v524_v2 = vpop.f32.mrf.mxu0 }
 0x160   :  { %v525_v3 = vadd.f32 %v524_v2, %v1485_v19  ;;  %v689_v4 = vpop.f32.mrf.mxu3 }
 0x161   :  { %v690_v5 = vadd.f32 %v689_v4, %v634_v62  ;;  %v580_v6 = vpop.f32.mrf.mxu1 }
 0x162   :  { %v581_v7 = vadd.f32 %v580_v6, %v525_v3 }
 0x163   :  { %v708_v52 = vmax.f32 %v690_v5, 0.0 }
 0x165   :  { %721 = vst [vmem:[%s1544_s3 + $0x50] sm:$0xff] %v708_v52  ;;  %v636_v9 = vpop.f32.mrf.mxu2 }
 0x166   :  { %v637_v8 = vadd.f32 %v636_v9, %v581_v7 }
 0x167   :  { %v527_v10 = vpop.f32.mrf.mxu0 }
 0x168   :  { %v528_v11 = vadd.f32 %v527_v10, %v1488_v29  ;;  %v692_v12 = vpop.f32.mrf.mxu3 }
 0x169   :  { %v693_v14 = vadd.f32 %v692_v12, %v637_v8  ;;  %v583_v15 = vpop.f32.mrf.mxu1 }
 0x16a   :  { %v584_v1 = vadd.f32 %v583_v15, %v528_v11 }
 0x16b   :  { %v709_v17 = vmax.f32 %v693_v14, 0.0 }
 0x16d   :  { %722 = vst [vmem:[%s1544_s3 + $0x58] sm:$0xff] %v709_v17  ;;  %v639_v19 = vpop.f32.mrf.mxu2 }
 0x16e   :  { %v640_v18 = vadd.f32 %v639_v19, %v584_v1 }
 0x170   :  { %v695_v20 = vpop.f32.mrf.mxu3 }
 0x171   :  { %v696_v21 = vadd.f32 %v695_v20, %v640_v18 }
 0x173   :  { %v710_v22 = vmax.f32 %v696_v21, 0.0 }
 0x175   :  { %723 = vst [vmem:[%s1544_s3 + $0x60] sm:$0xf] %v710_v22 }

// kernel: cnn_deep_q_net_forward.5
= control target key start
LH: loop header
LB: loop body
LE: loop exit
PB: predicated region body
PF: predicated region fallthrough
CT: control target
= control target key end

     0   :  { %s938_s1 = inlined_call_operand.vmem [shape: f32[1024,128], index: 1, kind: input, shape index: {}]   ;;  %s939_s0 = inlined_call_operand.vmem [shape: f32[32,1024], index: 0, kind: input, shape index: {}]   ;;  %s940_s2 = inlined_call_operand.vmem [shape: f32[1,128], index: 2, kind: input, shape index: {}]   ;;  %s941_s3 = inlined_call_operand.vmem [shape: f32[32,128], index: 3, kind: output, shape index: {}]  }
   0x1   :  { %v61_v0 = vld [vmem:[%s938_s1 + $0x78] sm:$0xff]  ;;  %v60_v2 = vld [vmem:[%s938_s1 + $0x70] sm:$0xff]  ;;  %v59_v6 = vld [vmem:[%s938_s1 + $0x68] sm:$0xff] }
   0x2   :  { %v93_v1 = vld [vmem:[%s938_s1 + $0x178] sm:$0xff]  ;;  %178 = vmatpush.msra.mxu0 %v61_v0  ;;  %v92_v4 = vld [vmem:[%s938_s1 + $0x170] sm:$0xff]  ;;  %v91_v8 = vld [vmem:[%s938_s1 + $0x168] sm:$0xff] }
   0x3   :  { %236 = vmatpush.msra.mxu2 %v93_v1  ;;  %v77_v3 = vld [vmem:[%s938_s1 + $0xf8] sm:$0xff]  ;;  %v76_v7 = vld [vmem:[%s938_s1 + $0xf0] sm:$0xff]  ;;  %v75_v10 = vld [vmem:[%s938_s1 + $0xe8] sm:$0xff] }
   0x4   :  { %v109_v5 = vld [vmem:[%s938_s1 + $0x1f8] sm:$0xff]  ;;  %207 = vmatpush.msra.mxu1 %v77_v3  ;;  %179 = vmatpush.msra.mxu0 %v60_v2  ;;  %v108_v9 = vld [vmem:[%s938_s1 + $0x1f0] sm:$0xff]  ;;  %v58_v11 = vld [vmem:[%s938_s1 + $0x60] sm:$0xff] }
   0x5   :  { %265 = vmatpush.msra.mxu3 %v109_v5  ;;  %237 = vmatpush.msra.mxu2 %v92_v4  ;;  %v90_v12 = vld [vmem:[%s938_s1 + $0x160] sm:$0xff]  ;;  %v107_v13 = vld [vmem:[%s938_s1 + $0x1e8] sm:$0xff]  ;;  %v57_v16 = vld [vmem:[%s938_s1 + $0x58] sm:$0xff] }
   0x6   :  { %208 = vmatpush.msra.mxu1 %v76_v7  ;;  %180 = vmatpush.msra.mxu0 %v59_v6  ;;  %v74_v14 = vld [vmem:[%s938_s1 + $0xe0] sm:$0xff]  ;;  %v89_v17 = vld [vmem:[%s938_s1 + $0x158] sm:$0xff]  ;;  %v56_v20 = vld [vmem:[%s938_s1 + $0x50] sm:$0xff] }
   0x7   :  { %266 = vmatpush.msra.mxu3 %v108_v9  ;;  %238 = vmatpush.msra.mxu2 %v91_v8  ;;  %v106_v15 = vld [vmem:[%s938_s1 + $0x1e0] sm:$0xff]  ;;  %v73_v18 = vld [vmem:[%s938_s1 + $0xd8] sm:$0xff]  ;;  %v88_v21 = vld [vmem:[%s938_s1 + $0x150] sm:$0xff] }
   0x8   :  { %209 = vmatpush.msra.mxu1 %v75_v10  ;;  %181 = vmatpush.msra.mxu0 %v58_v11  ;;  %v105_v19 = vld [vmem:[%s938_s1 + $0x1d8] sm:$0xff]  ;;  %v72_v22 = vld [vmem:[%s938_s1 + $0xd0] sm:$0xff]  ;;  %v55_v24 = vld [vmem:[%s938_s1 + $0x48] sm:$0xff] }
   0x9   :  { %267 = vmatpush.msra.mxu3 %v107_v13  ;;  %239 = vmatpush.msra.mxu2 %v90_v12  ;;  %v104_v23 = vld [vmem:[%s938_s1 + $0x1d0] sm:$0xff]  ;;  %v87_v25 = vld [vmem:[%s938_s1 + $0x148] sm:$0xff]  ;;  %v54_v28 = vld [vmem:[%s938_s1 + $0x40] sm:$0xff] }
   0xa   :  { %210 = vmatpush.msra.mxu1 %v74_v14  ;;  %182 = vmatpush.msra.mxu0 %v57_v16  ;;  %v71_v26 = vld [vmem:[%s938_s1 + $0xc8] sm:$0xff]  ;;  %v86_v29 = vld [vmem:[%s938_s1 + $0x140] sm:$0xff]  ;;  %v53_v32 = vld [vmem:[%s938_s1 + $0x38] sm:$0xff] }
   0xb   :  { %268 = vmatpush.msra.mxu3 %v106_v15  ;;  %240 = vmatpush.msra.mxu2 %v89_v17  ;;  %v103_v27 = vld [vmem:[%s938_s1 + $0x1c8] sm:$0xff]  ;;  %v70_v30 = vld [vmem:[%s938_s1 + $0xc0] sm:$0xff]  ;;  %v85_v33 = vld [vmem:[%s938_s1 + $0x138] sm:$0xff] }
   0xc   :  { %211 = vmatpush.msra.mxu1 %v73_v18  ;;  %183 = vmatpush.msra.mxu0 %v56_v20  ;;  %v102_v31 = vld [vmem:[%s938_s1 + $0x1c0] sm:$0xff]  ;;  %v69_v34 = vld [vmem:[%s938_s1 + $0xb8] sm:$0xff]  ;;  %v52_v36 = vld [vmem:[%s938_s1 + $0x30] sm:$0xff] }
   0xd   :  { %269 = vmatpush.msra.mxu3 %v105_v19  ;;  %241 = vmatpush.msra.mxu2 %v88_v21  ;;  %v101_v35 = vld [vmem:[%s938_s1 + $0x1b8] sm:$0xff]  ;;  %v84_v37 = vld [vmem:[%s938_s1 + $0x130] sm:$0xff]  ;;  %v51_v40 = vld [vmem:[%s938_s1 + $0x28] sm:$0xff] }
   0xe   :  { %212 = vmatpush.msra.mxu1 %v72_v22  ;;  %184 = vmatpush.msra.mxu0 %v55_v24  ;;  %v68_v38 = vld [vmem:[%s938_s1 + $0xb0] sm:$0xff]  ;;  %v83_v41 = vld [vmem:[%s938_s1 + $0x128] sm:$0xff]  ;;  %v50_v44 = vld [vmem:[%s938_s1 + $0x20] sm:$0xff] }
   0xf   :  { %270 = vmatpush.msra.mxu3 %v104_v23  ;;  %242 = vmatpush.msra.mxu2 %v87_v25  ;;  %v100_v39 = vld [vmem:[%s938_s1 + $0x1b0] sm:$0xff]  ;;  %v67_v42 = vld [vmem:[%s938_s1 + $0xa8] sm:$0xff]  ;;  %v82_v45 = vld [vmem:[%s938_s1 + $0x120] sm:$0xff] }
  0x10   :  { %213 = vmatpush.msra.mxu1 %v71_v26  ;;  %185 = vmatpush.msra.mxu0 %v54_v28  ;;  %v99_v43 = vld [vmem:[%s938_s1 + $0x1a8] sm:$0xff]  ;;  %v66_v46 = vld [vmem:[%s938_s1 + $0xa0] sm:$0xff]  ;;  %v49_v48 = vld [vmem:[%s938_s1 + $0x18] sm:$0xff] }
  0x11   :  { %271 = vmatpush.msra.mxu3 %v103_v27  ;;  %243 = vmatpush.msra.mxu2 %v86_v29  ;;  %v98_v47 = vld [vmem:[%s938_s1 + $0x1a0] sm:$0xff]  ;;  %v81_v49 = vld [vmem:[%s938_s1 + $0x118] sm:$0xff]  ;;  %v48_v52 = vld [vmem:[%s938_s1 + $0x10] sm:$0xff] }
  0x12   :  { %214 = vmatpush.msra.mxu1 %v70_v30  ;;  %186 = vmatpush.msra.mxu0 %v53_v32  ;;  %v65_v50 = vld [vmem:[%s938_s1 + $0x98] sm:$0xff]  ;;  %v80_v53 = vld [vmem:[%s938_s1 + $0x110] sm:$0xff]  ;;  %v47_v56 = vld [vmem:[%s938_s1 + $0x8] sm:$0xff] }
  0x13   :  { %272 = vmatpush.msra.mxu3 %v102_v31  ;;  %244 = vmatpush.msra.mxu2 %v85_v33  ;;  %v97_v51 = vld [vmem:[%s938_s1 + $0x198] sm:$0xff]  ;;  %v64_v54 = vld [vmem:[%s938_s1 + $0x90] sm:$0xff]  ;;  %v79_v57 = vld [vmem:[%s938_s1 + $0x108] sm:$0xff] }
  0x14   :  { %215 = vmatpush.msra.mxu1 %v69_v34  ;;  %187 = vmatpush.msra.mxu0 %v52_v36  ;;  %v96_v55 = vld [vmem:[%s938_s1 + $0x190] sm:$0xff]  ;;  %v63_v58 = vld [vmem:[%s938_s1 + $0x88] sm:$0xff]  ;;  %v46_v60 = vld [vmem:[%s938_s1] sm:$0xff] }
  0x15   :  { %273 = vmatpush.msra.mxu3 %v101_v35  ;;  %245 = vmatpush.msra.mxu2 %v84_v37  ;;  %v95_v59 = vld [vmem:[%s938_s1 + $0x188] sm:$0xff]  ;;  %v78_v61 = vld [vmem:[%s938_s1 + $0x100] sm:$0xff]  ;;  %v16_v63 = vld [vmem:[%s939_s0 + $0x10] sm:$0xff] }
  0x16   :  { %216 = vmatpush.msra.mxu1 %v68_v38  ;;  %188 = vmatpush.msra.mxu0 %v51_v40  ;;  %v14_v62 = vld [vmem:[%s939_s0] sm:$0xff]  ;;  %v157_v0 = vld [vmem:[%s938_s1 + $0x378] sm:$0xff]  ;;  %v15_v4 = vld [vmem:[%s939_s0 + $0x8] sm:$0xff] }
  0x17   :  { %274 = vmatpush.msra.mxu3 %v100_v39  ;;  %246 = vmatpush.msra.mxu2 %v83_v41  ;;  %v62_v1 = vld [vmem:[%s938_s1 + $0x80] sm:$0xff]  ;;  %v125_v3 = vld [vmem:[%s938_s1 + $0x278] sm:$0xff]  ;;  %v156_v6 = vld [vmem:[%s938_s1 + $0x370] sm:$0xff] }
  0x18   :  { %217 = vmatpush.msra.mxu1 %v67_v42  ;;  %189 = vmatpush.msra.mxu0 %v50_v44  ;;  %v94_v2 = vld [vmem:[%s938_s1 + $0x180] sm:$0xff]  ;;  %v17_v5 = vld [vmem:[%s939_s0 + $0x18] sm:$0xff]  ;;  %v124_v8 = vld [vmem:[%s938_s1 + $0x270] sm:$0xff] }
  0x19   :  { %275 = vmatpush.msra.mxu3 %v99_v43  ;;  %247 = vmatpush.msra.mxu2 %v82_v45  ;;  %v173_v7 = vld [vmem:[%s938_s1 + $0x3f8] sm:$0xff]  ;;  %v155_v10 = vld [vmem:[%s938_s1 + $0x368] sm:$0xff]  ;;  %v172_v11 = vld [vmem:[%s938_s1 + $0x3f0] sm:$0xff] }
  0x1a   :  { %218 = vmatpush.msra.mxu1 %v66_v46  ;;  %190 = vmatpush.msra.mxu0 %v49_v48  ;;  %v141_v9 = vld [vmem:[%s938_s1 + $0x2f8] sm:$0xff]  ;;  %v123_v12 = vld [vmem:[%s938_s1 + $0x268] sm:$0xff]  ;;  %v140_v13 = vld [vmem:[%s938_s1 + $0x2f0] sm:$0xff] }
  0x1b   :  { %276 = vmatpush.msra.mxu3 %v98_v47  ;;  %248 = vmatpush.msra.mxu2 %v81_v49  ;;  %v154_v14 = vld [vmem:[%s938_s1 + $0x360] sm:$0xff]  ;;  %v171_v15 = vld [vmem:[%s938_s1 + $0x3e8] sm:$0xff]  ;;  %v24_v19 = vld [vmem:[%s939_s0 + $0x50] sm:$0xff] }
  0x1c   :  { %219 = vmatpush.msra.mxu1 %v65_v50  ;;  %191 = vmatpush.msra.mxu0 %v48_v52  ;;  %v122_v16 = vld [vmem:[%s938_s1 + $0x260] sm:$0xff]  ;;  %v139_v17 = vld [vmem:[%s938_s1 + $0x2e8] sm:$0xff]  ;;  %v153_v20 = vld [vmem:[%s938_s1 + $0x358] sm:$0xff] }
  0x1d   :  { %277 = vmatpush.msra.mxu3 %v97_v51  ;;  %249 = vmatpush.msra.mxu2 %v80_v53  ;;  %v22_v18 = vld [vmem:[%s939_s0 + $0x40] sm:$0xff]  ;;  %v121_v22 = vld [vmem:[%s938_s1 + $0x258] sm:$0xff]  ;;  %v23_v24 = vld [vmem:[%s939_s0 + $0x48] sm:$0xff] }
  0x1e   :  { %220 = vmatpush.msra.mxu1 %v64_v54  ;;  %192 = vmatpush.msra.mxu0 %v47_v56  ;;  %v170_v21 = vld [vmem:[%s938_s1 + $0x3e0] sm:$0xff]  ;;  %v25_v25 = vld [vmem:[%s939_s0 + $0x58] sm:$0xff]  ;;  %v152_v26 = vld [vmem:[%s938_s1 + $0x350] sm:$0xff] }
  0x1f   :  { %278 = vmatpush.msra.mxu3 %v96_v55  ;;  %250 = vmatpush.msra.mxu2 %v79_v57  ;;  %v138_v23 = vld [vmem:[%s938_s1 + $0x2e0] sm:$0xff]  ;;  %v169_v27 = vld [vmem:[%s938_s1 + $0x3d8] sm:$0xff]  ;;  %v120_v28 = vld [vmem:[%s938_s1 + $0x250] sm:$0xff] }
  0x20   :  { %221 = vmatpush.msra.mxu1 %v63_v58  ;;  %193 = vmatpush.msra.mxu0 %v46_v60  ;;  %v137_v29 = vld [vmem:[%s938_s1 + $0x2d8] sm:$0xff]  ;;  %v151_v30 = vld [vmem:[%s938_s1 + $0x348] sm:$0xff]  ;;  %v168_v31 = vld [vmem:[%s938_s1 + $0x3d0] sm:$0xff] }
  0x21   :  { %279 = vmatpush.msra.mxu3 %v95_v59  ;;  %251 = vmatpush.msra.mxu2 %v78_v61  ;;  %v119_v32 = vld [vmem:[%s938_s1 + $0x248] sm:$0xff]  ;;  %v136_v33 = vld [vmem:[%s938_s1 + $0x2d0] sm:$0xff]  ;;  %v150_v34 = vld [vmem:[%s938_s1 + $0x340] sm:$0xff] }
  0x22   :  { %194 = vmatmul.f32.vlgmr.msra.gmra.mxu0 %v14_v62  ;;  %252 = vmatmul.f32.vlgmr.msra.gmra.mxu2 %v16_v63  ;;  %v167_v35 = vld [vmem:[%s938_s1 + $0x3c8] sm:$0xff]  ;;  %v118_v36 = vld [vmem:[%s938_s1 + $0x240] sm:$0xff]  ;;  %v32_v39 = vld [vmem:[%s939_s0 + $0x90] sm:$0xff] }
  0x23   :  { %352 = vmatpush.msrb.mxu2 %v157_v0  ;;  %222 = vmatpush.msra.mxu1 %v62_v1  ;;  %v135_v37 = vld [vmem:[%s938_s1 + $0x2c8] sm:$0xff]  ;;  %v30_v38 = vld [vmem:[%s939_s0 + $0x80] sm:$0xff]  ;;  %v149_v40 = vld [vmem:[%s938_s1 + $0x338] sm:$0xff] }
  0x24   :  { %280 = vmatpush.msra.mxu3 %v94_v2  ;;  %294 = vmatpush.msrb.mxu0 %v125_v3  ;;  %v166_v41 = vld [vmem:[%s938_s1 + $0x3c0] sm:$0xff]  ;;  %v117_v42 = vld [vmem:[%s938_s1 + $0x238] sm:$0xff]  ;;  %v31_v44 = vld [vmem:[%s939_s0 + $0x88] sm:$0xff] }
  0x25   :  { %223 = vmatmul.f32.vlgmr.msra.gmra.mxu1 %v15_v4  ;;  %281 = vmatmul.f32.vlgmr.msra.gmra.mxu3 %v17_v5  ;;  %v134_v43 = vld [vmem:[%s938_s1 + $0x2c0] sm:$0xff]  ;;  %v33_v45 = vld [vmem:[%s939_s0 + $0x98] sm:$0xff]  ;;  %v148_v46 = vld [vmem:[%s938_s1 + $0x330] sm:$0xff] }
  0x26   :  { %353 = vmatpush.msrb.mxu2 %v156_v6  ;;  %381 = vmatpush.msrb.mxu3 %v173_v7  ;;  %v165_v47 = vld [vmem:[%s938_s1 + $0x3b8] sm:$0xff]  ;;  %v116_v48 = vld [vmem:[%s938_s1 + $0x230] sm:$0xff]  ;;  %v147_v50 = vld [vmem:[%s938_s1 + $0x328] sm:$0xff] }
  0x27   :  { %295 = vmatpush.msrb.mxu0 %v124_v8  ;;  %323 = vmatpush.msrb.mxu1 %v141_v9  ;;  %v133_v49 = vld [vmem:[%s938_s1 + $0x2b8] sm:$0xff]  ;;  %v164_v51 = vld [vmem:[%s938_s1 + $0x3b0] sm:$0xff]  ;;  %v115_v52 = vld [vmem:[%s938_s1 + $0x228] sm:$0xff] }
  0x28   :  { %354 = vmatpush.msrb.mxu2 %v155_v10  ;;  %382 = vmatpush.msrb.mxu3 %v172_v11  ;;  %v132_v53 = vld [vmem:[%s938_s1 + $0x2b0] sm:$0xff]  ;;  %v146_v54 = vld [vmem:[%s938_s1 + $0x320] sm:$0xff]  ;;  %v163_v55 = vld [vmem:[%s938_s1 + $0x3a8] sm:$0xff] }
  0x29   :  { %296 = vmatpush.msrb.mxu0 %v123_v12  ;;  %324 = vmatpush.msrb.mxu1 %v140_v13  ;;  %v114_v56 = vld [vmem:[%s938_s1 + $0x220] sm:$0xff]  ;;  %v131_v57 = vld [vmem:[%s938_s1 + $0x2a8] sm:$0xff]  ;;  %v40_v59 = vld [vmem:[%s939_s0 + $0xd0] sm:$0xff] }
  0x2a   :  { %355 = vmatpush.msrb.mxu2 %v154_v14  ;;  %383 = vmatpush.msrb.mxu3 %v171_v15  ;;  %v38_v58 = vld [vmem:[%s939_s0 + $0xc0] sm:$0xff]  ;;  %v145_v60 = vld [vmem:[%s938_s1 + $0x318] sm:$0xff]  ;;  %v39_v0 = vld [vmem:[%s939_s0 + $0xc8] sm:$0xff] }
  0x2b   :  { %297 = vmatpush.msrb.mxu0 %v122_v16  ;;  %325 = vmatpush.msrb.mxu1 %v139_v17  ;;  %v162_v61 = vld [vmem:[%s938_s1 + $0x3a0] sm:$0xff]  ;;  %v113_v62 = vld [vmem:[%s938_s1 + $0x218] sm:$0xff]  ;;  %v144_v2 = vld [vmem:[%s938_s1 + $0x310] sm:$0xff] }
  0x2c   :  { %197 = vmatmul.f32.gmra.mxu0 %v22_v18  ;;  %255 = vmatmul.f32.gmra.mxu2 %v24_v19  ;;  %v130_v63 = vld [vmem:[%s938_s1 + $0x2a0] sm:$0xff]  ;;  %v41_v1 = vld [vmem:[%s939_s0 + $0xd8] sm:$0xff]  ;;  %v112_v4 = vld [vmem:[%s938_s1 + $0x210] sm:$0xff] }
  0x2d   :  { %356 = vmatpush.msrb.mxu2 %v153_v20  ;;  %384 = vmatpush.msrb.mxu3 %v170_v21  ;;  %v161_v3 = vld [vmem:[%s938_s1 + $0x398] sm:$0xff]  ;;  %v143_v6 = vld [vmem:[%s938_s1 + $0x308] sm:$0xff]  ;;  %v160_v7 = vld [vmem:[%s938_s1 + $0x390] sm:$0xff] }
  0x2e   :  { %298 = vmatpush.msrb.mxu0 %v121_v22  ;;  %326 = vmatpush.msrb.mxu1 %v138_v23  ;;  %v129_v5 = vld [vmem:[%s938_s1 + $0x298] sm:$0xff]  ;;  %v111_v8 = vld [vmem:[%s938_s1 + $0x208] sm:$0xff]  ;;  %v128_v9 = vld [vmem:[%s938_s1 + $0x290] sm:$0xff] }
  0x2f   :  { %226 = vmatmul.f32.gmra.mxu1 %v23_v24  ;;  %284 = vmatmul.f32.gmra.mxu3 %v25_v25  ;;  %v142_v10 = vld [vmem:[%s938_s1 + $0x300] sm:$0xff]  ;;  %v159_v11 = vld [vmem:[%s938_s1 + $0x388] sm:$0xff]  ;;  %v20_v15 = vld [vmem:[%s939_s0 + $0x30] sm:$0xff] }
  0x30   :  { %357 = vmatpush.msrb.mxu2 %v152_v26  ;;  %385 = vmatpush.msrb.mxu3 %v169_v27  ;;  %v110_v12 = vld [vmem:[%s938_s1 + $0x200] sm:$0xff]  ;;  %v127_v13 = vld [vmem:[%s938_s1 + $0x288] sm:$0xff]  ;;  %v21_v19 = vld [vmem:[%s939_s0 + $0x38] sm:$0xff] }
  0x31   :  { %299 = vmatpush.msrb.mxu0 %v120_v28  ;;  %327 = vmatpush.msrb.mxu1 %v137_v29  ;;  %v18_v14 = vld [vmem:[%s939_s0 + $0x20] sm:$0xff]  ;;  %v19_v18 = vld [vmem:[%s939_s0 + $0x28] sm:$0xff]  ;;  %v28_v21 = vld [vmem:[%s939_s0 + $0x70] sm:$0xff] }
  0x32   :  { %358 = vmatpush.msrb.mxu2 %v151_v30  ;;  %386 = vmatpush.msrb.mxu3 %v168_v31  ;;  %v158_v16 = vld [vmem:[%s938_s1 + $0x380] sm:$0xff]  ;;  %v27_v22 = vld [vmem:[%s939_s0 + $0x68] sm:$0xff]  ;;  %v29_v23 = vld [vmem:[%s939_s0 + $0x78] sm:$0xff] }
  0x33   :  { %300 = vmatpush.msrb.mxu0 %v119_v32  ;;  %328 = vmatpush.msrb.mxu1 %v136_v33  ;;  %v126_v17 = vld [vmem:[%s938_s1 + $0x280] sm:$0xff]  ;;  %v36_v25 = vld [vmem:[%s939_s0 + $0xb0] sm:$0xff]  ;;  %v35_v26 = vld [vmem:[%s939_s0 + $0xa8] sm:$0xff] }
  0x34   :  { %359 = vmatpush.msrb.mxu2 %v150_v34  ;;  %387 = vmatpush.msrb.mxu3 %v167_v35  ;;  %v26_v20 = vld [vmem:[%s939_s0 + $0x60] sm:$0xff]  ;;  %v37_v27 = vld [vmem:[%s939_s0 + $0xb8] sm:$0xff]  ;;  %v44_v29 = vld [vmem:[%s939_s0 + $0xf0] sm:$0xff] }
  0x35   :  { %301 = vmatpush.msrb.mxu0 %v118_v36  ;;  %329 = vmatpush.msrb.mxu1 %v135_v37  ;;  %v34_v24 = vld [vmem:[%s939_s0 + $0xa0] sm:$0xff]  ;;  %v43_v30 = vld [vmem:[%s939_s0 + $0xe8] sm:$0xff]  ;;  %v45_v31 = vld [vmem:[%s939_s0 + $0xf8] sm:$0xff] }
  0x36   :  { %200 = vmatmul.f32.gmra.mxu0 %v30_v38  ;;  %258 = vmatmul.f32.gmra.mxu2 %v32_v39  ;;  %v42_v28 = vld [vmem:[%s939_s0 + $0xe0] sm:$0xff] }
  0x37   :  { %360 = vmatpush.msrb.mxu2 %v149_v40  ;;  %388 = vmatpush.msrb.mxu3 %v166_v41  ;;  %v422_v41 = vld [vmem:[%s940_s2] ss:$0 sm:$0xff] }
  0x38   :  { %302 = vmatpush.msrb.mxu0 %v117_v42  ;;  %330 = vmatpush.msrb.mxu1 %v134_v43 }
  0x39   :  { %229 = vmatmul.f32.gmra.mxu1 %v31_v44  ;;  %287 = vmatmul.f32.gmra.mxu3 %v33_v45 }
  0x3a   :  { %361 = vmatpush.msrb.mxu2 %v148_v46  ;;  %389 = vmatpush.msrb.mxu3 %v165_v47 }
  0x3b   :  { %303 = vmatpush.msrb.mxu0 %v116_v48  ;;  %331 = vmatpush.msrb.mxu1 %v133_v49 }
  0x3c   :  { %362 = vmatpush.msrb.mxu2 %v147_v50  ;;  %390 = vmatpush.msrb.mxu3 %v164_v51 }
  0x3d   :  { %304 = vmatpush.msrb.mxu0 %v115_v52  ;;  %332 = vmatpush.msrb.mxu1 %v132_v53 }
  0x3e   :  { %363 = vmatpush.msrb.mxu2 %v146_v54  ;;  %391 = vmatpush.msrb.mxu3 %v163_v55 }
  0x3f   :  { %305 = vmatpush.msrb.mxu0 %v114_v56  ;;  %333 = vmatpush.msrb.mxu1 %v131_v57 }
  0x40   :  { %203 = vmatmul.f32.gmra.mxu0 %v38_v58  ;;  %261 = vmatmul.f32.gmra.mxu2 %v40_v59 }
  0x41   :  { %364 = vmatpush.msrb.mxu2 %v145_v60  ;;  %392 = vmatpush.msrb.mxu3 %v162_v61 }
  0x42   :  { %306 = vmatpush.msrb.mxu0 %v113_v62  ;;  %334 = vmatpush.msrb.mxu1 %v130_v63 }
  0x43   :  { %232 = vmatmul.f32.gmra.mxu1 %v39_v0  ;;  %290 = vmatmul.f32.gmra.mxu3 %v41_v1 }
  0x44   :  { %365 = vmatpush.msrb.mxu2 %v144_v2  ;;  %393 = vmatpush.msrb.mxu3 %v161_v3 }
  0x45   :  { %307 = vmatpush.msrb.mxu0 %v112_v4  ;;  %335 = vmatpush.msrb.mxu1 %v129_v5 }
  0x46   :  { %366 = vmatpush.msrb.mxu2 %v143_v6  ;;  %394 = vmatpush.msrb.mxu3 %v160_v7 }
  0x47   :  { %308 = vmatpush.msrb.mxu0 %v111_v8  ;;  %336 = vmatpush.msrb.mxu1 %v128_v9 }
  0x48   :  { %367 = vmatpush.msrb.mxu2 %v142_v10  ;;  %395 = vmatpush.msrb.mxu3 %v159_v11 }
  0x49   :  { %309 = vmatpush.msrb.mxu0 %v110_v12  ;;  %337 = vmatpush.msrb.mxu1 %v127_v13 }
  0x4a   :  { %310 = vmatmul.f32.vlgmr.msrb.gmra.mxu0 %v18_v14  ;;  %368 = vmatmul.f32.vlgmr.msrb.gmra.mxu2 %v20_v15 }
  0x4b   :  { %396 = vmatpush.msrb.mxu3 %v158_v16  ;;  %338 = vmatpush.msrb.mxu1 %v126_v17 }
  0x4c   :  { %339 = vmatmul.f32.vlgmr.msrb.gmra.mxu1 %v19_v18  ;;  %397 = vmatmul.f32.vlgmr.msrb.gmra.mxu3 %v21_v19 }
  0x52   :  { %313 = vmatmul.f32.gmra.mxu0 %v26_v20  ;;  %371 = vmatmul.f32.gmra.mxu2 %v28_v21 }
  0x54   :  { %342 = vmatmul.f32.gmra.mxu1 %v27_v22  ;;  %400 = vmatmul.f32.gmra.mxu3 %v29_v23 }
  0x5a   :  { %316 = vmatmul.f32.gmra.mxu0 %v34_v24  ;;  %374 = vmatmul.f32.gmra.mxu2 %v36_v25 }
  0x5c   :  { %345 = vmatmul.f32.gmra.mxu1 %v35_v26  ;;  %403 = vmatmul.f32.gmra.mxu3 %v37_v27 }
  0x62   :  { %319 = vmatmul.f32.gmra.mxu0 %v42_v28  ;;  %377 = vmatmul.f32.gmra.mxu2 %v44_v29 }
  0x64   :  { %348 = vmatmul.f32.gmra.mxu1 %v43_v30  ;;  %406 = vmatmul.f32.gmra.mxu3 %v45_v31 }
  0x9f   :  { %v195_v32 = vpop.f32.mrf.mxu0 }
  0xa0   :  { %v196_v44 = vadd.f32 %v422_v41, %v195_v32 }
  0xa2   :  { %v224_v33 = vpop.f32.mrf.mxu1 }
  0xa3   :  { %v225_v47 = vadd.f32 %v224_v33, %v196_v44 }
  0xa5   :  { %v253_v34 = vpop.f32.mrf.mxu2 }
  0xa6   :  { %v254_v49 = vadd.f32 %v253_v34, %v225_v47 }
  0xa8   :  { %v282_v35 = vpop.f32.mrf.mxu3 }
  0xa9   :  { %v198_v36 = vpop.f32.mrf.mxu0  ;;  %v283_v52 = vadd.f32 %v282_v35, %v254_v49 }
  0xaa   :  { %v199_v50 = vadd.f32 %v422_v41, %v198_v36 }
  0xac   :  { %v227_v37 = vpop.f32.mrf.mxu1 }
  0xad   :  { %v228_v53 = vadd.f32 %v227_v37, %v199_v50 }
  0xaf   :  { %v256_v38 = vpop.f32.mrf.mxu2 }
  0xb0   :  { %v257_v58 = vadd.f32 %v256_v38, %v228_v53 }
  0xb2   :  { %v285_v39 = vpop.f32.mrf.mxu3 }
  0xb3   :  { %v201_v40 = vpop.f32.mrf.mxu0  ;;  %v286_v62 = vadd.f32 %v285_v39, %v257_v58 }
  0xb4   :  { %v202_v59 = vadd.f32 %v422_v41, %v201_v40 }
  0xb6   :  { %v230_v42 = vpop.f32.mrf.mxu1 }
  0xb7   :  { %v231_v63 = vadd.f32 %v230_v42, %v202_v59 }
  0xb9   :  { %v259_v43 = vpop.f32.mrf.mxu2 }
  0xba   :  { %v260_v6 = vadd.f32 %v259_v43, %v231_v63 }
  0xbc   :  { %v288_v45 = vpop.f32.mrf.mxu3 }
  0xbd   :  { %v204_v46 = vpop.f32.mrf.mxu0  ;;  %v289_v11 = vadd.f32 %v288_v45, %v260_v6 }
  0xbe   :  { %v205_v7 = vadd.f32 %v422_v41, %v204_v46 }
  0xc0   :  { %v233_v48 = vpop.f32.mrf.mxu1 }
  0xc1   :  { %v234_v12 = vadd.f32 %v233_v48, %v205_v7 }
  0xc3   :  { %v262_v51 = vpop.f32.mrf.mxu2 }
  0xc4   :  { %v263_v19 = vadd.f32 %v262_v51, %v234_v12 }
  0xc6   :  { %v291_v54 = vpop.f32.mrf.mxu3 }
  0xc7   :  { %v311_v55 = vpop.f32.mrf.mxu0  ;;  %v292_v23 = vadd.f32 %v291_v54, %v263_v19 }
  0xc8   :  { %v312_v56 = vadd.f32 %v311_v55, %v283_v52 }
  0xc9   :  { %v340_v57 = vpop.f32.mrf.mxu1 }
  0xca   :  { %v341_v60 = vadd.f32 %v340_v57, %v312_v56 }
  0xcd   :  { %v369_v61 = vpop.f32.mrf.mxu2 }
  0xce   :  { %v370_v0 = vadd.f32 %v369_v61, %v341_v60 }
  0xcf   :  { %v314_v1 = vpop.f32.mrf.mxu0  ;;  %v398_v2 = vpop.f32.mrf.mxu3 }
  0xd0   :  { %v315_v3 = vadd.f32 %v314_v1, %v286_v62  ;;  %v399_v4 = vadd.f32 %v398_v2, %v370_v0 }
  0xd1   :  { %v343_v5 = vpop.f32.mrf.mxu1 }
  0xd2   :  { %v410_v8 = vmax.f32 %v399_v4, 0.0  ;;  %v344_v9 = vadd.f32 %v343_v5, %v315_v3 }
  0xd4   :  { %414 = vst [vmem:[%s941_s3] sm:$0xff] %v410_v8 }
  0xd5   :  { %v372_v10 = vpop.f32.mrf.mxu2 }
  0xd6   :  { %v373_v13 = vadd.f32 %v372_v10, %v344_v9 }
  0xd7   :  { %v317_v14 = vpop.f32.mrf.mxu0  ;;  %v401_v15 = vpop.f32.mrf.mxu3 }
  0xd8   :  { %v318_v16 = vadd.f32 %v317_v14, %v289_v11  ;;  %v402_v17 = vadd.f32 %v401_v15, %v373_v13 }
  0xd9   :  { %v346_v18 = vpop.f32.mrf.mxu1 }
  0xda   :  { %v411_v20 = vmax.f32 %v402_v17, 0.0  ;;  %v347_v21 = vadd.f32 %v346_v18, %v318_v16 }
  0xdc   :  { %415 = vst [vmem:[%s941_s3 + $0x8] sm:$0xff] %v411_v20 }
  0xdd   :  { %v375_v22 = vpop.f32.mrf.mxu2 }
  0xde   :  { %v376_v24 = vadd.f32 %v375_v22, %v347_v21 }
  0xdf   :  { %v320_v25 = vpop.f32.mrf.mxu0  ;;  %v404_v26 = vpop.f32.mrf.mxu3 }
  0xe0   :  { %v321_v27 = vadd.f32 %v320_v25, %v292_v23  ;;  %v405_v28 = vadd.f32 %v404_v26, %v376_v24 }
  0xe1   :  { %v349_v29 = vpop.f32.mrf.mxu1 }
  0xe2   :  { %v412_v30 = vmax.f32 %v405_v28, 0.0  ;;  %v350_v31 = vadd.f32 %v349_v29, %v321_v27 }
  0xe4   :  { %416 = vst [vmem:[%s941_s3 + $0x10] sm:$0xff] %v412_v30 }
  0xe5   :  { %v378_v32 = vpop.f32.mrf.mxu2 }
  0xe6   :  { %v379_v33 = vadd.f32 %v378_v32, %v350_v31 }
  0xe7   :  { %v407_v34 = vpop.f32.mrf.mxu3 }
  0xe8   :  { %v408_v35 = vadd.f32 %v407_v34, %v379_v33 }
  0xea   :  { %v413_v36 = vmax.f32 %v408_v35, 0.0 }
  0xec   :  { %417 = vst [vmem:[%s941_s3 + $0x18] sm:$0xff] %v413_v36 }

// kernel: cnn_deep_q_net_forward.6
= control target key start
LH: loop header
LB: loop body
LE: loop exit
PB: predicated region body
PF: predicated region fallthrough
CT: control target
= control target key end

     0   :  { %s843_s1 = inlined_call_operand.vmem [shape: f32[1152,128], index: 1, kind: input, shape index: {}]   ;;  %s844_s2 = inlined_call_operand.vmem [shape: f32[1,128], index: 2, kind: input, shape index: {}]   ;;  %s845_s0 = inlined_call_operand.vmem [shape: f32[8,1152], index: 0, kind: input, shape index: {}]   ;;  %s846_s3 = inlined_call_operand.vmem [shape: f32[8,128], index: 3, kind: output, shape index: {}]  }
   0x1   :  { %v38_v0 = vld [vmem:[%s843_s1 + $0x78] sm:$0xff]  ;;  %v37_v1 = vld [vmem:[%s843_s1 + $0x70] sm:$0xff]  ;;  %v36_v3 = vld [vmem:[%s843_s1 + $0x68] sm:$0xff] }
   0x2   :  { %171 = vmatpush.msra.mxu0 %v38_v0  ;;  %v70_v2 = vld [vmem:[%s843_s1 + $0x178] sm:$0xff]  ;;  %v69_v4 = vld [vmem:[%s843_s1 + $0x170] sm:$0xff]  ;;  %v68_v7 = vld [vmem:[%s843_s1 + $0x168] sm:$0xff] }
   0x3   :  { %211 = vmatpush.msra.mxu2 %v70_v2  ;;  %v86_v5 = vld [vmem:[%s843_s1 + $0x1f8] sm:$0xff]  ;;  %v85_v8 = vld [vmem:[%s843_s1 + $0x1f0] sm:$0xff]  ;;  %v35_v9 = vld [vmem:[%s843_s1 + $0x60] sm:$0xff] }
   0x4   :  { %172 = vmatpush.msra.mxu0 %v37_v1  ;;  %231 = vmatpush.msra.mxu3 %v86_v5  ;;  %v54_v6 = vld [vmem:[%s843_s1 + $0xf8] sm:$0xff]  ;;  %v53_v10 = vld [vmem:[%s843_s1 + $0xf0] sm:$0xff]  ;;  %v67_v11 = vld [vmem:[%s843_s1 + $0x160] sm:$0xff] }
   0x5   :  { %212 = vmatpush.msra.mxu2 %v69_v4  ;;  %191 = vmatpush.msra.mxu1 %v54_v6  ;;  %v84_v12 = vld [vmem:[%s843_s1 + $0x1e8] sm:$0xff]  ;;  %v34_v14 = vld [vmem:[%s843_s1 + $0x58] sm:$0xff]  ;;  %v83_v15 = vld [vmem:[%s843_s1 + $0x1e0] sm:$0xff] }
   0x6   :  { %173 = vmatpush.msra.mxu0 %v36_v3  ;;  %232 = vmatpush.msra.mxu3 %v85_v8  ;;  %v52_v13 = vld [vmem:[%s843_s1 + $0xe8] sm:$0xff]  ;;  %v66_v16 = vld [vmem:[%s843_s1 + $0x158] sm:$0xff]  ;;  %v51_v17 = vld [vmem:[%s843_s1 + $0xe0] sm:$0xff] }
   0x7   :  { %213 = vmatpush.msra.mxu2 %v68_v7  ;;  %192 = vmatpush.msra.mxu1 %v53_v10  ;;  %v33_v18 = vld [vmem:[%s843_s1 + $0x50] sm:$0xff]  ;;  %v82_v19 = vld [vmem:[%s843_s1 + $0x1d8] sm:$0xff]  ;;  %v32_v22 = vld [vmem:[%s843_s1 + $0x48] sm:$0xff] }
   0x8   :  { %174 = vmatpush.msra.mxu0 %v35_v9  ;;  %233 = vmatpush.msra.mxu3 %v84_v12  ;;  %v65_v20 = vld [vmem:[%s843_s1 + $0x150] sm:$0xff]  ;;  %v50_v21 = vld [vmem:[%s843_s1 + $0xd8] sm:$0xff]  ;;  %v64_v24 = vld [vmem:[%s843_s1 + $0x148] sm:$0xff] }
   0x9   :  { %214 = vmatpush.msra.mxu2 %v67_v11  ;;  %193 = vmatpush.msra.mxu1 %v52_v13  ;;  %v81_v23 = vld [vmem:[%s843_s1 + $0x1d0] sm:$0xff]  ;;  %v31_v26 = vld [vmem:[%s843_s1 + $0x40] sm:$0xff]  ;;  %v80_v27 = vld [vmem:[%s843_s1 + $0x1c8] sm:$0xff] }
   0xa   :  { %175 = vmatpush.msra.mxu0 %v34_v14  ;;  %234 = vmatpush.msra.mxu3 %v83_v15  ;;  %v49_v25 = vld [vmem:[%s843_s1 + $0xd0] sm:$0xff]  ;;  %v63_v28 = vld [vmem:[%s843_s1 + $0x140] sm:$0xff]  ;;  %v48_v29 = vld [vmem:[%s843_s1 + $0xc8] sm:$0xff] }
   0xb   :  { %215 = vmatpush.msra.mxu2 %v66_v16  ;;  %194 = vmatpush.msra.mxu1 %v51_v17  ;;  %v30_v30 = vld [vmem:[%s843_s1 + $0x38] sm:$0xff]  ;;  %v79_v31 = vld [vmem:[%s843_s1 + $0x1c0] sm:$0xff]  ;;  %v29_v34 = vld [vmem:[%s843_s1 + $0x30] sm:$0xff] }
   0xc   :  { %176 = vmatpush.msra.mxu0 %v33_v18  ;;  %235 = vmatpush.msra.mxu3 %v82_v19  ;;  %v62_v32 = vld [vmem:[%s843_s1 + $0x138] sm:$0xff]  ;;  %v47_v33 = vld [vmem:[%s843_s1 + $0xc0] sm:$0xff]  ;;  %v61_v36 = vld [vmem:[%s843_s1 + $0x130] sm:$0xff] }
   0xd   :  { %216 = vmatpush.msra.mxu2 %v65_v20  ;;  %195 = vmatpush.msra.mxu1 %v50_v21  ;;  %v78_v35 = vld [vmem:[%s843_s1 + $0x1b8] sm:$0xff]  ;;  %v28_v38 = vld [vmem:[%s843_s1 + $0x28] sm:$0xff]  ;;  %v77_v39 = vld [vmem:[%s843_s1 + $0x1b0] sm:$0xff] }
   0xe   :  { %177 = vmatpush.msra.mxu0 %v32_v22  ;;  %236 = vmatpush.msra.mxu3 %v81_v23  ;;  %v46_v37 = vld [vmem:[%s843_s1 + $0xb8] sm:$0xff]  ;;  %v60_v40 = vld [vmem:[%s843_s1 + $0x128] sm:$0xff]  ;;  %v45_v41 = vld [vmem:[%s843_s1 + $0xb0] sm:$0xff] }
   0xf   :  { %217 = vmatpush.msra.mxu2 %v64_v24  ;;  %196 = vmatpush.msra.mxu1 %v49_v25  ;;  %v27_v42 = vld [vmem:[%s843_s1 + $0x20] sm:$0xff]  ;;  %v76_v43 = vld [vmem:[%s843_s1 + $0x1a8] sm:$0xff]  ;;  %v26_v46 = vld [vmem:[%s843_s1 + $0x18] sm:$0xff] }
  0x10   :  { %178 = vmatpush.msra.mxu0 %v31_v26  ;;  %237 = vmatpush.msra.mxu3 %v80_v27  ;;  %v59_v44 = vld [vmem:[%s843_s1 + $0x120] sm:$0xff]  ;;  %v44_v45 = vld [vmem:[%s843_s1 + $0xa8] sm:$0xff]  ;;  %v58_v48 = vld [vmem:[%s843_s1 + $0x118] sm:$0xff] }
  0x11   :  { %218 = vmatpush.msra.mxu2 %v63_v28  ;;  %197 = vmatpush.msra.mxu1 %v48_v29  ;;  %v75_v47 = vld [vmem:[%s843_s1 + $0x1a0] sm:$0xff]  ;;  %v25_v50 = vld [vmem:[%s843_s1 + $0x10] sm:$0xff]  ;;  %v74_v51 = vld [vmem:[%s843_s1 + $0x198] sm:$0xff] }
  0x12   :  { %179 = vmatpush.msra.mxu0 %v30_v30  ;;  %238 = vmatpush.msra.mxu3 %v79_v31  ;;  %v43_v49 = vld [vmem:[%s843_s1 + $0xa0] sm:$0xff]  ;;  %v57_v52 = vld [vmem:[%s843_s1 + $0x110] sm:$0xff]  ;;  %v42_v53 = vld [vmem:[%s843_s1 + $0x98] sm:$0xff] }
  0x13   :  { %219 = vmatpush.msra.mxu2 %v62_v32  ;;  %198 = vmatpush.msra.mxu1 %v47_v33  ;;  %v24_v54 = vld [vmem:[%s843_s1 + $0x8] sm:$0xff]  ;;  %v73_v55 = vld [vmem:[%s843_s1 + $0x190] sm:$0xff]  ;;  %v23_v58 = vld [vmem:[%s843_s1] sm:$0xff] }
  0x14   :  { %180 = vmatpush.msra.mxu0 %v29_v34  ;;  %239 = vmatpush.msra.mxu3 %v78_v35  ;;  %v56_v56 = vld [vmem:[%s843_s1 + $0x108] sm:$0xff]  ;;  %v41_v57 = vld [vmem:[%s843_s1 + $0x90] sm:$0xff]  ;;  %v102_v60 = vld [vmem:[%s843_s1 + $0x278] sm:$0xff] }
  0x15   :  { %220 = vmatpush.msra.mxu2 %v61_v36  ;;  %199 = vmatpush.msra.mxu1 %v46_v37  ;;  %v72_v59 = vld [vmem:[%s843_s1 + $0x188] sm:$0xff]  ;;  %v55_v61 = vld [vmem:[%s843_s1 + $0x100] sm:$0xff]  ;;  %v134_v62 = vld [vmem:[%s843_s1 + $0x378] sm:$0xff] }
  0x16   :  { %181 = vmatpush.msra.mxu0 %v28_v38  ;;  %240 = vmatpush.msra.mxu3 %v77_v39  ;;  %v40_v63 = vld [vmem:[%s843_s1 + $0x88] sm:$0xff]  ;;  %v101_v0 = vld [vmem:[%s843_s1 + $0x270] sm:$0xff]  ;;  %v71_v1 = vld [vmem:[%s843_s1 + $0x180] sm:$0xff] }
  0x17   :  { %221 = vmatpush.msra.mxu2 %v60_v40  ;;  %200 = vmatpush.msra.mxu1 %v45_v41  ;;  %v133_v2 = vld [vmem:[%s843_s1 + $0x370] sm:$0xff]  ;;  %v150_v3 = vld [vmem:[%s843_s1 + $0x3f8] sm:$0xff]  ;;  %v100_v4 = vld [vmem:[%s843_s1 + $0x268] sm:$0xff] }
  0x18   :  { %182 = vmatpush.msra.mxu0 %v27_v42  ;;  %241 = vmatpush.msra.mxu3 %v76_v43  ;;  %v39_v5 = vld [vmem:[%s843_s1 + $0x80] sm:$0xff]  ;;  %v118_v6 = vld [vmem:[%s843_s1 + $0x2f8] sm:$0xff]  ;;  %v132_v7 = vld [vmem:[%s843_s1 + $0x368] sm:$0xff] }
  0x19   :  { %222 = vmatpush.msra.mxu2 %v59_v44  ;;  %201 = vmatpush.msra.mxu1 %v44_v45  ;;  %v99_v8 = vld [vmem:[%s843_s1 + $0x260] sm:$0xff]  ;;  %v149_v9 = vld [vmem:[%s843_s1 + $0x3f0] sm:$0xff]  ;;  %v98_v12 = vld [vmem:[%s843_s1 + $0x258] sm:$0xff] }
  0x1a   :  { %183 = vmatpush.msra.mxu0 %v26_v46  ;;  %242 = vmatpush.msra.mxu3 %v75_v47  ;;  %v117_v10 = vld [vmem:[%s843_s1 + $0x2f0] sm:$0xff]  ;;  %v131_v11 = vld [vmem:[%s843_s1 + $0x360] sm:$0xff]  ;;  %v148_v13 = vld [vmem:[%s843_s1 + $0x3e8] sm:$0xff] }
  0x1b   :  { %223 = vmatpush.msra.mxu2 %v58_v48  ;;  %202 = vmatpush.msra.mxu1 %v43_v49  ;;  %v116_v14 = vld [vmem:[%s843_s1 + $0x2e8] sm:$0xff]  ;;  %v130_v15 = vld [vmem:[%s843_s1 + $0x358] sm:$0xff]  ;;  %v97_v16 = vld [vmem:[%s843_s1 + $0x250] sm:$0xff] }
  0x1c   :  { %184 = vmatpush.msra.mxu0 %v25_v50  ;;  %243 = vmatpush.msra.mxu3 %v74_v51  ;;  %v147_v17 = vld [vmem:[%s843_s1 + $0x3e0] sm:$0xff]  ;;  %v129_v19 = vld [vmem:[%s843_s1 + $0x350] sm:$0xff]  ;;  %v96_v20 = vld [vmem:[%s843_s1 + $0x248] sm:$0xff] }
  0x1d   :  { %224 = vmatpush.msra.mxu2 %v57_v52  ;;  %203 = vmatpush.msra.mxu1 %v42_v53  ;;  %v115_v18 = vld [vmem:[%s843_s1 + $0x2e0] sm:$0xff]  ;;  %v146_v21 = vld [vmem:[%s843_s1 + $0x3d8] sm:$0xff]  ;;  %v128_v23 = vld [vmem:[%s843_s1 + $0x348] sm:$0xff] }
  0x1e   :  { %185 = vmatpush.msra.mxu0 %v24_v54  ;;  %244 = vmatpush.msra.mxu3 %v73_v55  ;;  %v114_v22 = vld [vmem:[%s843_s1 + $0x2d8] sm:$0xff]  ;;  %v95_v24 = vld [vmem:[%s843_s1 + $0x240] sm:$0xff]  ;;  %v145_v25 = vld [vmem:[%s843_s1 + $0x3d0] sm:$0xff] }
  0x1f   :  { %225 = vmatpush.msra.mxu2 %v56_v56  ;;  %204 = vmatpush.msra.mxu1 %v41_v57  ;;  %v113_v26 = vld [vmem:[%s843_s1 + $0x2d0] sm:$0xff]  ;;  %v127_v27 = vld [vmem:[%s843_s1 + $0x340] sm:$0xff]  ;;  %v94_v28 = vld [vmem:[%s843_s1 + $0x238] sm:$0xff] }
  0x20   :  { %186 = vmatpush.msra.mxu0 %v23_v58  ;;  %245 = vmatpush.msra.mxu3 %v72_v59  ;;  %v144_v29 = vld [vmem:[%s843_s1 + $0x3c8] sm:$0xff]  ;;  %v126_v31 = vld [vmem:[%s843_s1 + $0x338] sm:$0xff]  ;;  %v93_v32 = vld [vmem:[%s843_s1 + $0x230] sm:$0xff] }
  0x21   :  { %226 = vmatpush.msra.mxu2 %v55_v61  ;;  %205 = vmatpush.msra.mxu1 %v40_v63  ;;  %v112_v30 = vld [vmem:[%s843_s1 + $0x2c8] sm:$0xff]  ;;  %v143_v33 = vld [vmem:[%s843_s1 + $0x3c0] sm:$0xff]  ;;  %v125_v35 = vld [vmem:[%s843_s1 + $0x330] sm:$0xff] }
  0x22   :  { %251 = vmatpush.msrb.mxu0 %v102_v60  ;;  %246 = vmatpush.msra.mxu3 %v71_v1  ;;  %v111_v34 = vld [vmem:[%s843_s1 + $0x2c0] sm:$0xff]  ;;  %v92_v36 = vld [vmem:[%s843_s1 + $0x228] sm:$0xff]  ;;  %v142_v37 = vld [vmem:[%s843_s1 + $0x3b8] sm:$0xff] }
  0x23   :  { %291 = vmatpush.msrb.mxu2 %v134_v62  ;;  %206 = vmatpush.msra.mxu1 %v39_v5  ;;  %v110_v38 = vld [vmem:[%s843_s1 + $0x2b8] sm:$0xff]  ;;  %v124_v39 = vld [vmem:[%s843_s1 + $0x328] sm:$0xff]  ;;  %v91_v40 = vld [vmem:[%s843_s1 + $0x220] sm:$0xff] }
  0x24   :  { %252 = vmatpush.msrb.mxu0 %v101_v0  ;;  %311 = vmatpush.msrb.mxu3 %v150_v3  ;;  %v141_v41 = vld [vmem:[%s843_s1 + $0x3b0] sm:$0xff]  ;;  %v123_v43 = vld [vmem:[%s843_s1 + $0x320] sm:$0xff]  ;;  %v90_v44 = vld [vmem:[%s843_s1 + $0x218] sm:$0xff] }
  0x25   :  { %292 = vmatpush.msrb.mxu2 %v133_v2  ;;  %271 = vmatpush.msrb.mxu1 %v118_v6  ;;  %v109_v42 = vld [vmem:[%s843_s1 + $0x2b0] sm:$0xff]  ;;  %v140_v45 = vld [vmem:[%s843_s1 + $0x3a8] sm:$0xff]  ;;  %v122_v49 = vld [vmem:[%s843_s1 + $0x318] sm:$0xff] }
  0x26   :  { %253 = vmatpush.msrb.mxu0 %v100_v4  ;;  %312 = vmatpush.msrb.mxu3 %v149_v9  ;;  %v16_v46 = vld [vmem:[%s845_s0 + $0x10] sm:$0xff]  ;;  %v108_v47 = vld [vmem:[%s843_s1 + $0x2a8] sm:$0xff]  ;;  %v139_v50 = vld [vmem:[%s843_s1 + $0x3a0] sm:$0xff] }
  0x27   :  { %293 = vmatpush.msrb.mxu2 %v132_v7  ;;  %272 = vmatpush.msrb.mxu1 %v117_v10  ;;  %v89_v48 = vld [vmem:[%s843_s1 + $0x210] sm:$0xff]  ;;  %v14_v51 = vld [vmem:[%s845_s0] sm:$0xff]  ;;  %v88_v52 = vld [vmem:[%s843_s1 + $0x208] sm:$0xff] }
  0x28   :  { %254 = vmatpush.msrb.mxu0 %v99_v8  ;;  %313 = vmatpush.msrb.mxu3 %v148_v13  ;;  %v17_v53 = vld [vmem:[%s845_s0 + $0x18] sm:$0xff]  ;;  %v107_v54 = vld [vmem:[%s843_s1 + $0x2a0] sm:$0xff]  ;;  %v121_v55 = vld [vmem:[%s843_s1 + $0x310] sm:$0xff] }
  0x29   :  { %294 = vmatpush.msrb.mxu2 %v131_v11  ;;  %273 = vmatpush.msrb.mxu1 %v116_v14  ;;  %v87_v56 = vld [vmem:[%s843_s1 + $0x200] sm:$0xff]  ;;  %v138_v57 = vld [vmem:[%s843_s1 + $0x398] sm:$0xff]  ;;  %v15_v59 = vld [vmem:[%s845_s0 + $0x8] sm:$0xff] }
  0x2a   :  { %255 = vmatpush.msrb.mxu0 %v98_v12  ;;  %314 = vmatpush.msrb.mxu3 %v147_v17  ;;  %v166_v58 = vld [vmem:[%s843_s1 + $0x478] sm:$0xff]  ;;  %v120_v61 = vld [vmem:[%s843_s1 + $0x308] sm:$0xff]  ;;  %v165_v62 = vld [vmem:[%s843_s1 + $0x470] sm:$0xff] }
  0x2b   :  { %295 = vmatpush.msrb.mxu2 %v130_v15  ;;  %274 = vmatpush.msrb.mxu1 %v115_v18  ;;  %v106_v60 = vld [vmem:[%s843_s1 + $0x298] sm:$0xff]  ;;  %v137_v63 = vld [vmem:[%s843_s1 + $0x390] sm:$0xff]  ;;  %v119_v1 = vld [vmem:[%s843_s1 + $0x300] sm:$0xff] }
  0x2c   :  { %256 = vmatpush.msrb.mxu0 %v97_v16  ;;  %315 = vmatpush.msrb.mxu3 %v146_v21  ;;  %v105_v0 = vld [vmem:[%s843_s1 + $0x290] sm:$0xff]  ;;  %v164_v2 = vld [vmem:[%s843_s1 + $0x468] sm:$0xff]  ;;  %v163_v6 = vld [vmem:[%s843_s1 + $0x460] sm:$0xff] }
  0x2d   :  { %296 = vmatpush.msrb.mxu2 %v129_v19  ;;  %275 = vmatpush.msrb.mxu1 %v114_v22  ;;  %v136_v3 = vld [vmem:[%s843_s1 + $0x388] sm:$0xff]  ;;  %v20_v4 = vld [vmem:[%s845_s0 + $0x30] sm:$0xff]  ;;  %v135_v7 = vld [vmem:[%s843_s1 + $0x380] sm:$0xff] }
  0x2e   :  { %257 = vmatpush.msrb.mxu0 %v96_v20  ;;  %316 = vmatpush.msrb.mxu3 %v145_v25  ;;  %v104_v5 = vld [vmem:[%s843_s1 + $0x288] sm:$0xff]  ;;  %v18_v8 = vld [vmem:[%s845_s0 + $0x20] sm:$0xff]  ;;  %v21_v9 = vld [vmem:[%s845_s0 + $0x38] sm:$0xff] }
  0x2f   :  { %297 = vmatpush.msrb.mxu2 %v128_v23  ;;  %276 = vmatpush.msrb.mxu1 %v113_v26  ;;  %v162_v10 = vld [vmem:[%s843_s1 + $0x458] sm:$0xff]  ;;  %v103_v11 = vld [vmem:[%s843_s1 + $0x280] sm:$0xff]  ;;  %v19_v12 = vld [vmem:[%s845_s0 + $0x28] sm:$0xff] }
  0x30   :  { %258 = vmatpush.msrb.mxu0 %v95_v24  ;;  %317 = vmatpush.msrb.mxu3 %v144_v29  ;;  %v161_v13 = vld [vmem:[%s843_s1 + $0x450] sm:$0xff]  ;;  %v160_v14 = vld [vmem:[%s843_s1 + $0x448] sm:$0xff]  ;;  %v159_v15 = vld [vmem:[%s843_s1 + $0x440] sm:$0xff] }
  0x31   :  { %298 = vmatpush.msrb.mxu2 %v127_v27  ;;  %277 = vmatpush.msrb.mxu1 %v112_v30  ;;  %v158_v16 = vld [vmem:[%s843_s1 + $0x438] sm:$0xff]  ;;  %v157_v17 = vld [vmem:[%s843_s1 + $0x430] sm:$0xff]  ;;  %v156_v18 = vld [vmem:[%s843_s1 + $0x428] sm:$0xff] }
  0x32   :  { %259 = vmatpush.msrb.mxu0 %v94_v28  ;;  %318 = vmatpush.msrb.mxu3 %v143_v33  ;;  %v155_v19 = vld [vmem:[%s843_s1 + $0x420] sm:$0xff]  ;;  %v154_v20 = vld [vmem:[%s843_s1 + $0x418] sm:$0xff]  ;;  %v153_v21 = vld [vmem:[%s843_s1 + $0x410] sm:$0xff] }
  0x33   :  { %299 = vmatpush.msrb.mxu2 %v126_v31  ;;  %278 = vmatpush.msrb.mxu1 %v111_v34  ;;  %v152_v22 = vld [vmem:[%s843_s1 + $0x408] sm:$0xff]  ;;  %v151_v23 = vld [vmem:[%s843_s1 + $0x400] sm:$0xff] }
  0x34   :  { %260 = vmatpush.msrb.mxu0 %v93_v32  ;;  %319 = vmatpush.msrb.mxu3 %v142_v37  ;;  %v22_v24 = vld [vmem:[%s845_s0 + $0x40] sm:$0xff] }
  0x35   :  { %300 = vmatpush.msrb.mxu2 %v125_v35  ;;  %279 = vmatpush.msrb.mxu1 %v110_v38  ;;  %v357_v25 = vld [vmem:[%s844_s2] ss:$0 sm:$0xff] }
  0x36   :  { %261 = vmatpush.msrb.mxu0 %v92_v36  ;;  %320 = vmatpush.msrb.mxu3 %v141_v41 }
  0x37   :  { %301 = vmatpush.msrb.mxu2 %v124_v39  ;;  %280 = vmatpush.msrb.mxu1 %v109_v42 }
  0x38   :  { %262 = vmatpush.msrb.mxu0 %v91_v40  ;;  %321 = vmatpush.msrb.mxu3 %v140_v45 }
  0x39   :  { %302 = vmatpush.msrb.mxu2 %v123_v43  ;;  %281 = vmatpush.msrb.mxu1 %v108_v47 }
  0x3a   :  { %263 = vmatpush.msrb.mxu0 %v90_v44  ;;  %227 = vmatmul.f32.vlgmr.msra.gmra.mxu2 %v16_v46 }
  0x3b   :  { %303 = vmatpush.msrb.mxu2 %v122_v49  ;;  %322 = vmatpush.msrb.mxu3 %v139_v50 }
  0x3c   :  { %264 = vmatpush.msrb.mxu0 %v89_v48  ;;  %247 = vmatmul.f32.vlgmr.msra.gmra.mxu3 %v17_v53 }
  0x3d   :  { %187 = vmatmul.f32.vlgmr.msra.gmra.mxu0 %v14_v51  ;;  %282 = vmatpush.msrb.mxu1 %v107_v54 }
  0x3e   :  { %265 = vmatpush.msrb.mxu0 %v88_v52  ;;  %304 = vmatpush.msrb.mxu2 %v121_v55 }
  0x3f   :  { %323 = vmatpush.msrb.mxu3 %v138_v57  ;;  %207 = vmatmul.f32.vlgmr.msra.gmra.mxu1 %v15_v59 }
  0x40   :  { %266 = vmatpush.msrb.mxu0 %v87_v56  ;;  %283 = vmatpush.msrb.mxu1 %v106_v60 }
  0x41   :  { %305 = vmatpush.msrb.mxu2 %v120_v61  ;;  %324 = vmatpush.msrb.mxu3 %v137_v63 }
  0x42   :  { %331 = vmatpush.msra.mxu0 %v166_v58  ;;  %284 = vmatpush.msrb.mxu1 %v105_v0 }
  0x43   :  { %306 = vmatpush.msrb.mxu2 %v119_v1  ;;  %325 = vmatpush.msrb.mxu3 %v136_v3 }
  0x44   :  { %332 = vmatpush.msra.mxu0 %v165_v62  ;;  %307 = vmatmul.f32.vlgmr.msrb.gmra.mxu2 %v20_v4 }
  0x45   :  { %285 = vmatpush.msrb.mxu1 %v104_v5  ;;  %326 = vmatpush.msrb.mxu3 %v135_v7 }
  0x46   :  { %333 = vmatpush.msra.mxu0 %v164_v2  ;;  %327 = vmatmul.f32.vlgmr.msrb.gmra.mxu3 %v21_v9 }
  0x47   :  { %267 = vmatmul.f32.vlgmr.msrb.gmra.mxu0 %v18_v8  ;;  %286 = vmatpush.msrb.mxu1 %v103_v11 }
  0x48   :  { %334 = vmatpush.msra.mxu0 %v163_v6  ;;  %287 = vmatmul.f32.vlgmr.msrb.gmra.mxu1 %v19_v12 }
  0x4a   :  { %335 = vmatpush.msra.mxu0 %v162_v10 }
  0x4c   :  { %336 = vmatpush.msra.mxu0 %v161_v13 }
  0x4e   :  { %337 = vmatpush.msra.mxu0 %v160_v14 }
  0x50   :  { %338 = vmatpush.msra.mxu0 %v159_v15 }
  0x52   :  { %339 = vmatpush.msra.mxu0 %v158_v16 }
  0x54   :  { %340 = vmatpush.msra.mxu0 %v157_v17 }
  0x56   :  { %341 = vmatpush.msra.mxu0 %v156_v18 }
  0x58   :  { %342 = vmatpush.msra.mxu0 %v155_v19 }
  0x5a   :  { %343 = vmatpush.msra.mxu0 %v154_v20 }
  0x5c   :  { %344 = vmatpush.msra.mxu0 %v153_v21 }
  0x5e   :  { %345 = vmatpush.msra.mxu0 %v152_v22 }
  0x60   :  { %346 = vmatpush.msra.mxu0 %v151_v23 }
  0x61   :  { %347 = vmatmul.f32.vlgmr.msra.gmra.mxu0 %v22_v24 }
  0xba   :  { %v188_v26 = vpop.f32.mrf.mxu0 }
  0xbb   :  { %v189_v27 = vadd.f32 %v357_v25, %v188_v26 }
  0xbc   :  { %v208_v28 = vpop.f32.mrf.mxu1 }
  0xbd   :  { %v209_v29 = vadd.f32 %v208_v28, %v189_v27  ;;  %v228_v30 = vpop.f32.mrf.mxu2 }
  0xbf   :  { %v229_v31 = vadd.f32 %v228_v30, %v209_v29  ;;  %v248_v32 = vpop.f32.mrf.mxu3 }
  0xc1   :  { %v249_v33 = vadd.f32 %v248_v32, %v229_v31 }
  0xc4   :  { %v268_v34 = vpop.f32.mrf.mxu0 }
  0xc5   :  { %v269_v35 = vadd.f32 %v268_v34, %v249_v33  ;;  %v288_v36 = vpop.f32.mrf.mxu1 }
  0xc7   :  { %v289_v37 = vadd.f32 %v288_v36, %v269_v35  ;;  %v308_v38 = vpop.f32.mrf.mxu2 }
  0xc9   :  { %v309_v39 = vadd.f32 %v308_v38, %v289_v37  ;;  %v328_v40 = vpop.f32.mrf.mxu3 }
  0xcb   :  { %v329_v41 = vadd.f32 %v328_v40, %v309_v39 }
  0xde   :  { %v348_v42 = vpop.f32.mrf.mxu0 }
  0xdf   :  { %v349_v43 = vadd.f32 %v348_v42, %v329_v41 }
  0xe1   :  { %v351_v44 = vmax.f32 %v349_v43, 0.0 }
  0xe3   :  { %352 = vst [vmem:[%s846_s3] sm:$0xff] %v351_v44 }

// kernel: cnn_deep_q_net_forward.7
= control target key start
LH: loop header
LB: loop body
LE: loop exit
PB: predicated region body
PF: predicated region fallthrough
CT: control target
= control target key end

     0   :  { %s1142_s0 = inlined_call_operand.vmem [shape: f32[4,256], index: 0, kind: input, shape index: {}]   ;;  %s1143_s1 = inlined_call_operand.vmem [shape: f32[256,512], index: 1, kind: input, shape index: {}]   ;;  %s1144_s2 = inlined_call_operand.vmem [shape: f32[1,512], index: 2, kind: input, shape index: {}]   ;;  %s1145_s3 = inlined_call_operand.vmem [shape: f32[512,128], index: 3, kind: input, shape index: {}]   ;;  %s1146_s4 = inlined_call_operand.vmem [shape: f32[1,128], index: 4, kind: input, shape index: {}]   ;;  %s1147_s5 = inlined_call_operand.hbm [shape: f32[4,128], index: 5, kind: output, shape index: {}]  }
   0x1   :  { %v82_v0 = vld [vmem:[%s1143_s1 + $0x1e0] sm:$0xff]  ;;  %v83_v1 = vld [vmem:[%s1143_s1 + $0x1e8] sm:$0xff]  ;;  %v84_v62 = vld [vmem:[%s1143_s1 + $0x1f0] sm:$0xff] }
   0x2   :  { %v78_v2 = vld [vmem:[%s1143_s1 + $0x1c0] sm:$0xff]  ;;  %166 = vmatpush.msra.mxu0 %v82_v0  ;;  %206 = vmatpush.msra.mxu2 %v83_v1  ;;  %v79_v4 = vld [vmem:[%s1143_s1 + $0x1c8] sm:$0xff]  ;;  %v85_v63 = vld [vmem:[%s1143_s1 + $0x1f8] sm:$0xff] }
   0x3   :  { %v146_v3 = vld [vmem:[%s1143_s1 + $0x3e0] sm:$0xff]  ;;  %v147_v5 = vld [vmem:[%s1143_s1 + $0x3e8] sm:$0xff] }
   0x4   :  { %186 = vmatpush.msra.mxu1 %v146_v3  ;;  %226 = vmatpush.msra.mxu3 %v147_v5  ;;  %v74_v6 = vld [vmem:[%s1143_s1 + $0x1a0] sm:$0xff]  ;;  %v75_v8 = vld [vmem:[%s1143_s1 + $0x1a8] sm:$0xff]  ;;  %v148_v3 = vld [vmem:[%s1143_s1 + $0x3f0] sm:$0xff] }
   0x5   :  { %v142_v7 = vld [vmem:[%s1143_s1 + $0x3c0] sm:$0xff]  ;;  %167 = vmatpush.msra.mxu0 %v78_v2  ;;  %207 = vmatpush.msra.mxu2 %v79_v4  ;;  %v143_v9 = vld [vmem:[%s1143_s1 + $0x3c8] sm:$0xff]  ;;  %v80_v2 = vld [vmem:[%s1143_s1 + $0x1d0] sm:$0xff] }
   0x6   :  { %v138_v10 = vld [vmem:[%s1143_s1 + $0x3a0] sm:$0xff]  ;;  %187 = vmatpush.msra.mxu1 %v142_v7  ;;  %227 = vmatpush.msra.mxu3 %v143_v9  ;;  %v71_v12 = vld [vmem:[%s1143_s1 + $0x188] sm:$0xff]  ;;  %v81_v4 = vld [vmem:[%s1143_s1 + $0x1d8] sm:$0xff] }
   0x7   :  { %v70_v11 = vld [vmem:[%s1143_s1 + $0x180] sm:$0xff]  ;;  %v139_v13 = vld [vmem:[%s1143_s1 + $0x3a8] sm:$0xff]  ;;  %168 = vmatpush.msra.mxu0 %v74_v6  ;;  %208 = vmatpush.msra.mxu2 %v75_v8  ;;  %v149_v5 = vld [vmem:[%s1143_s1 + $0x3f8] sm:$0xff] }
   0x8   :  { %v134_v14 = vld [vmem:[%s1143_s1 + $0x380] sm:$0xff]  ;;  %v135_v15 = vld [vmem:[%s1143_s1 + $0x388] sm:$0xff]  ;;  %188 = vmatpush.msra.mxu1 %v138_v10  ;;  %228 = vmatpush.msra.mxu3 %v139_v13  ;;  %v76_v6 = vld [vmem:[%s1143_s1 + $0x1b0] sm:$0xff] }
   0x9   :  { %v66_v16 = vld [vmem:[%s1143_s1 + $0x160] sm:$0xff]  ;;  %v67_v17 = vld [vmem:[%s1143_s1 + $0x168] sm:$0xff]  ;;  %169 = vmatpush.msra.mxu0 %v70_v11  ;;  %209 = vmatpush.msra.mxu2 %v71_v12  ;;  %v144_v7 = vld [vmem:[%s1143_s1 + $0x3d0] sm:$0xff] }
   0xa   :  { %v130_v18 = vld [vmem:[%s1143_s1 + $0x360] sm:$0xff]  ;;  %v131_v19 = vld [vmem:[%s1143_s1 + $0x368] sm:$0xff]  ;;  %189 = vmatpush.msra.mxu1 %v134_v14  ;;  %229 = vmatpush.msra.mxu3 %v135_v15  ;;  %v77_v8 = vld [vmem:[%s1143_s1 + $0x1b8] sm:$0xff] }
   0xb   :  { %v62_v20 = vld [vmem:[%s1143_s1 + $0x140] sm:$0xff]  ;;  %v63_v21 = vld [vmem:[%s1143_s1 + $0x148] sm:$0xff]  ;;  %170 = vmatpush.msra.mxu0 %v66_v16  ;;  %210 = vmatpush.msra.mxu2 %v67_v17  ;;  %v145_v9 = vld [vmem:[%s1143_s1 + $0x3d8] sm:$0xff] }
   0xc   :  { %v126_v22 = vld [vmem:[%s1143_s1 + $0x340] sm:$0xff]  ;;  %v127_v23 = vld [vmem:[%s1143_s1 + $0x348] sm:$0xff]  ;;  %190 = vmatpush.msra.mxu1 %v130_v18  ;;  %230 = vmatpush.msra.mxu3 %v131_v19  ;;  %v72_v10 = vld [vmem:[%s1143_s1 + $0x190] sm:$0xff] }
   0xd   :  { %v58_v24 = vld [vmem:[%s1143_s1 + $0x120] sm:$0xff]  ;;  %v59_v25 = vld [vmem:[%s1143_s1 + $0x128] sm:$0xff]  ;;  %171 = vmatpush.msra.mxu0 %v62_v20  ;;  %211 = vmatpush.msra.mxu2 %v63_v21  ;;  %v140_v11 = vld [vmem:[%s1143_s1 + $0x3b0] sm:$0xff] }
   0xe   :  { %v122_v26 = vld [vmem:[%s1143_s1 + $0x320] sm:$0xff]  ;;  %v123_v27 = vld [vmem:[%s1143_s1 + $0x328] sm:$0xff]  ;;  %191 = vmatpush.msra.mxu1 %v126_v22  ;;  %231 = vmatpush.msra.mxu3 %v127_v23  ;;  %v73_v12 = vld [vmem:[%s1143_s1 + $0x198] sm:$0xff] }
   0xf   :  { %v54_v28 = vld [vmem:[%s1143_s1 + $0x100] sm:$0xff]  ;;  %v55_v29 = vld [vmem:[%s1143_s1 + $0x108] sm:$0xff]  ;;  %172 = vmatpush.msra.mxu0 %v58_v24  ;;  %212 = vmatpush.msra.mxu2 %v59_v25  ;;  %v141_v13 = vld [vmem:[%s1143_s1 + $0x3b8] sm:$0xff] }
  0x10   :  { %v118_v30 = vld [vmem:[%s1143_s1 + $0x300] sm:$0xff]  ;;  %v119_v31 = vld [vmem:[%s1143_s1 + $0x308] sm:$0xff]  ;;  %192 = vmatpush.msra.mxu1 %v122_v26  ;;  %232 = vmatpush.msra.mxu3 %v123_v27  ;;  %v68_v15 = vld [vmem:[%s1143_s1 + $0x170] sm:$0xff] }
  0x11   :  { %v50_v32 = vld [vmem:[%s1143_s1 + $0xe0] sm:$0xff]  ;;  %v51_v33 = vld [vmem:[%s1143_s1 + $0xe8] sm:$0xff]  ;;  %173 = vmatpush.msra.mxu0 %v54_v28  ;;  %213 = vmatpush.msra.mxu2 %v55_v29  ;;  %v136_v16 = vld [vmem:[%s1143_s1 + $0x390] sm:$0xff] }
  0x12   :  { %v114_v34 = vld [vmem:[%s1143_s1 + $0x2e0] sm:$0xff]  ;;  %v115_v35 = vld [vmem:[%s1143_s1 + $0x2e8] sm:$0xff]  ;;  %193 = vmatpush.msra.mxu1 %v118_v30  ;;  %233 = vmatpush.msra.mxu3 %v119_v31  ;;  %v69_v17 = vld [vmem:[%s1143_s1 + $0x178] sm:$0xff] }
  0x13   :  { %v46_v36 = vld [vmem:[%s1143_s1 + $0xc0] sm:$0xff]  ;;  %v47_v37 = vld [vmem:[%s1143_s1 + $0xc8] sm:$0xff]  ;;  %174 = vmatpush.msra.mxu0 %v50_v32  ;;  %214 = vmatpush.msra.mxu2 %v51_v33  ;;  %v137_v18 = vld [vmem:[%s1143_s1 + $0x398] sm:$0xff] }
  0x14   :  { %v110_v38 = vld [vmem:[%s1143_s1 + $0x2c0] sm:$0xff]  ;;  %v111_v39 = vld [vmem:[%s1143_s1 + $0x2c8] sm:$0xff]  ;;  %194 = vmatpush.msra.mxu1 %v114_v34  ;;  %234 = vmatpush.msra.mxu3 %v115_v35  ;;  %v64_v19 = vld [vmem:[%s1143_s1 + $0x150] sm:$0xff] }
  0x15   :  { %v42_v40 = vld [vmem:[%s1143_s1 + $0xa0] sm:$0xff]  ;;  %v43_v41 = vld [vmem:[%s1143_s1 + $0xa8] sm:$0xff]  ;;  %175 = vmatpush.msra.mxu0 %v46_v36  ;;  %215 = vmatpush.msra.mxu2 %v47_v37  ;;  %v132_v20 = vld [vmem:[%s1143_s1 + $0x370] sm:$0xff] }
  0x16   :  { %v106_v42 = vld [vmem:[%s1143_s1 + $0x2a0] sm:$0xff]  ;;  %v107_v43 = vld [vmem:[%s1143_s1 + $0x2a8] sm:$0xff]  ;;  %195 = vmatpush.msra.mxu1 %v110_v38  ;;  %235 = vmatpush.msra.mxu3 %v111_v39  ;;  %v65_v21 = vld [vmem:[%s1143_s1 + $0x158] sm:$0xff] }
  0x17   :  { %v38_v44 = vld [vmem:[%s1143_s1 + $0x80] sm:$0xff]  ;;  %v39_v45 = vld [vmem:[%s1143_s1 + $0x88] sm:$0xff]  ;;  %176 = vmatpush.msra.mxu0 %v42_v40  ;;  %216 = vmatpush.msra.mxu2 %v43_v41  ;;  %v133_v22 = vld [vmem:[%s1143_s1 + $0x378] sm:$0xff] }
  0x18   :  { %v102_v46 = vld [vmem:[%s1143_s1 + $0x280] sm:$0xff]  ;;  %v103_v47 = vld [vmem:[%s1143_s1 + $0x288] sm:$0xff]  ;;  %196 = vmatpush.msra.mxu1 %v106_v42  ;;  %236 = vmatpush.msra.mxu3 %v107_v43  ;;  %v60_v23 = vld [vmem:[%s1143_s1 + $0x130] sm:$0xff] }
  0x19   :  { %v34_v48 = vld [vmem:[%s1143_s1 + $0x60] sm:$0xff]  ;;  %v35_v49 = vld [vmem:[%s1143_s1 + $0x68] sm:$0xff]  ;;  %177 = vmatpush.msra.mxu0 %v38_v44  ;;  %217 = vmatpush.msra.mxu2 %v39_v45  ;;  %v128_v24 = vld [vmem:[%s1143_s1 + $0x350] sm:$0xff] }
  0x1a   :  { %v98_v50 = vld [vmem:[%s1143_s1 + $0x260] sm:$0xff]  ;;  %v99_v51 = vld [vmem:[%s1143_s1 + $0x268] sm:$0xff]  ;;  %197 = vmatpush.msra.mxu1 %v102_v46  ;;  %237 = vmatpush.msra.mxu3 %v103_v47  ;;  %v61_v25 = vld [vmem:[%s1143_s1 + $0x138] sm:$0xff] }
  0x1b   :  { %v30_v52 = vld [vmem:[%s1143_s1 + $0x40] sm:$0xff]  ;;  %v31_v53 = vld [vmem:[%s1143_s1 + $0x48] sm:$0xff]  ;;  %178 = vmatpush.msra.mxu0 %v34_v48  ;;  %218 = vmatpush.msra.mxu2 %v35_v49  ;;  %v129_v26 = vld [vmem:[%s1143_s1 + $0x358] sm:$0xff] }
  0x1c   :  { %v94_v54 = vld [vmem:[%s1143_s1 + $0x240] sm:$0xff]  ;;  %v95_v55 = vld [vmem:[%s1143_s1 + $0x248] sm:$0xff]  ;;  %198 = vmatpush.msra.mxu1 %v98_v50  ;;  %238 = vmatpush.msra.mxu3 %v99_v51  ;;  %v56_v27 = vld [vmem:[%s1143_s1 + $0x110] sm:$0xff] }
  0x1d   :  { %v26_v56 = vld [vmem:[%s1143_s1 + $0x20] sm:$0xff]  ;;  %v27_v57 = vld [vmem:[%s1143_s1 + $0x28] sm:$0xff]  ;;  %179 = vmatpush.msra.mxu0 %v30_v52  ;;  %219 = vmatpush.msra.mxu2 %v31_v53  ;;  %v124_v28 = vld [vmem:[%s1143_s1 + $0x330] sm:$0xff] }
  0x1e   :  { %v90_v58 = vld [vmem:[%s1143_s1 + $0x220] sm:$0xff]  ;;  %v91_v59 = vld [vmem:[%s1143_s1 + $0x228] sm:$0xff]  ;;  %199 = vmatpush.msra.mxu1 %v94_v54  ;;  %239 = vmatpush.msra.mxu3 %v95_v55  ;;  %v57_v29 = vld [vmem:[%s1143_s1 + $0x118] sm:$0xff] }
  0x1f   :  { %v22_v60 = vld [vmem:[%s1143_s1] sm:$0xff]  ;;  %v23_v61 = vld [vmem:[%s1143_s1 + $0x8] sm:$0xff]  ;;  %180 = vmatpush.msra.mxu0 %v26_v56  ;;  %220 = vmatpush.msra.mxu2 %v27_v57  ;;  %v125_v30 = vld [vmem:[%s1143_s1 + $0x338] sm:$0xff] }
  0x20   :  { %200 = vmatpush.msra.mxu1 %v90_v58  ;;  %240 = vmatpush.msra.mxu3 %v91_v59  ;;  %v86_v0 = vld [vmem:[%s1143_s1 + $0x200] sm:$0xff]  ;;  %v87_v1 = vld [vmem:[%s1143_s1 + $0x208] sm:$0xff]  ;;  %v52_v31 = vld [vmem:[%s1143_s1 + $0xf0] sm:$0xff] }
  0x21   :  { %181 = vmatpush.msra.mxu0 %v22_v60  ;;  %221 = vmatpush.msra.mxu2 %v23_v61  ;;  %v21_v14 = vld [vmem:[%s1142_s0] sm:$0xff]  ;;  %v120_v32 = vld [vmem:[%s1143_s1 + $0x310] sm:$0xff]  ;;  %v53_v33 = vld [vmem:[%s1143_s1 + $0xf8] sm:$0xff] }
  0x22   :  { %201 = vmatpush.msra.mxu1 %v86_v0  ;;  %241 = vmatpush.msra.mxu3 %v87_v1  ;;  %161 = vst [vmem:[#allocation1] ss:$2 sm:$0xff] %v21_v14  ;;  %v121_v34 = vld [vmem:[%s1143_s1 + $0x318] sm:$0xff]  ;;  %v48_v35 = vld [vmem:[%s1143_s1 + $0xd0] sm:$0xff] }
  0x23   :  { %246 = vmatpush.msrb.mxu0 %v84_v62  ;;  %286 = vmatpush.msrb.mxu2 %v85_v63  ;;  %v116_v36 = vld [vmem:[%s1143_s1 + $0x2f0] sm:$0xff]  ;;  %v49_v37 = vld [vmem:[%s1143_s1 + $0xd8] sm:$0xff] }
  0x24   :  { %266 = vmatpush.msrb.mxu1 %v148_v3  ;;  %306 = vmatpush.msrb.mxu3 %v149_v5  ;;  %v117_v38 = vld [vmem:[%s1143_s1 + $0x2f8] sm:$0xff]  ;;  %v44_v39 = vld [vmem:[%s1143_s1 + $0xb0] sm:$0xff] }
  0x25   :  { %247 = vmatpush.msrb.mxu0 %v80_v2  ;;  %287 = vmatpush.msrb.mxu2 %v81_v4  ;;  %v112_v40 = vld [vmem:[%s1143_s1 + $0x2d0] sm:$0xff]  ;;  %v45_v41 = vld [vmem:[%s1143_s1 + $0xb8] sm:$0xff] }
  0x26   :  { %267 = vmatpush.msrb.mxu1 %v144_v7  ;;  %307 = vmatpush.msrb.mxu3 %v145_v9  ;;  %v113_v42 = vld [vmem:[%s1143_s1 + $0x2d8] sm:$0xff]  ;;  %v40_v43 = vld [vmem:[%s1143_s1 + $0x90] sm:$0xff] }
  0x27   :  { %248 = vmatpush.msrb.mxu0 %v76_v6  ;;  %288 = vmatpush.msrb.mxu2 %v77_v8  ;;  %v108_v44 = vld [vmem:[%s1143_s1 + $0x2b0] sm:$0xff]  ;;  %v41_v45 = vld [vmem:[%s1143_s1 + $0x98] sm:$0xff] }
  0x28   :  { %268 = vmatpush.msrb.mxu1 %v140_v11  ;;  %308 = vmatpush.msrb.mxu3 %v141_v13  ;;  %v109_v46 = vld [vmem:[%s1143_s1 + $0x2b8] sm:$0xff] }
  0x29   :  { %249 = vmatpush.msrb.mxu0 %v72_v10  ;;  %289 = vmatpush.msrb.mxu2 %v73_v12 }
  0x2a   :  { %269 = vmatpush.msrb.mxu1 %v136_v16  ;;  %309 = vmatpush.msrb.mxu3 %v137_v18 }
  0x2b   :  { %250 = vmatpush.msrb.mxu0 %v68_v15  ;;  %290 = vmatpush.msrb.mxu2 %v69_v17 }
  0x2c   :  { %270 = vmatpush.msrb.mxu1 %v132_v20  ;;  %310 = vmatpush.msrb.mxu3 %v133_v22 }
  0x2d   :  { %251 = vmatpush.msrb.mxu0 %v64_v19  ;;  %291 = vmatpush.msrb.mxu2 %v65_v21 }
  0x2e   :  { %271 = vmatpush.msrb.mxu1 %v128_v24  ;;  %311 = vmatpush.msrb.mxu3 %v129_v26 }
  0x2f   :  { %252 = vmatpush.msrb.mxu0 %v60_v23  ;;  %292 = vmatpush.msrb.mxu2 %v61_v25 }
  0x30   :  { %272 = vmatpush.msrb.mxu1 %v124_v28  ;;  %312 = vmatpush.msrb.mxu3 %v125_v30 }
  0x31   :  { %253 = vmatpush.msrb.mxu0 %v56_v27  ;;  %293 = vmatpush.msrb.mxu2 %v57_v29 }
  0x32   :  { %273 = vmatpush.msrb.mxu1 %v120_v32  ;;  %313 = vmatpush.msrb.mxu3 %v121_v34 }
  0x33   :  { %254 = vmatpush.msrb.mxu0 %v52_v31  ;;  %294 = vmatpush.msrb.mxu2 %v53_v33 }
  0x34   :  { %274 = vmatpush.msrb.mxu1 %v116_v36  ;;  %314 = vmatpush.msrb.mxu3 %v117_v38 }
  0x35   :  { %255 = vmatpush.msrb.mxu0 %v48_v35  ;;  %295 = vmatpush.msrb.mxu2 %v49_v37 }
  0x36   :  { %275 = vmatpush.msrb.mxu1 %v112_v40 }
  0x37   :  { %256 = vmatpush.msrb.mxu0 %v44_v39 }
  0x38   :  { %10 = vsyncpa [#allocation3], 0  ;;  %296 = vmatpush.msrb.mxu2 %v45_v41  ;;  %315 = vmatpush.msrb.mxu3 %v113_v42  ;;  %v162_v47 = vld.sshfl [vmem:[#allocation1] sm:$0xff pattern:$0x75316420]  ;;  %v36_v48 = vld [vmem:[%s1143_s1 + $0x70] sm:$0xff] }
  0x39   :  { %257 = vmatpush.msrb.mxu0 %v40_v43  ;;  %276 = vmatpush.msrb.mxu1 %v108_v44  ;;  %v104_v49 = vld [vmem:[%s1143_s1 + $0x290] sm:$0xff]  ;;  %v37_v50 = vld [vmem:[%s1143_s1 + $0x78] sm:$0xff]  ;;  %v163_v52 = vld.sshfl [vmem:[#allocation1 + $0x8] sm:$0xff pattern:$0x75316420]  ;;  %s523_s17 = smov [#allocation2]  }
  0x3a   :  { %297 = vmatpush.msrb.mxu2 %v41_v45  ;;  %316 = vmatpush.msrb.mxu3 %v109_v46  ;;  %v105_v51 = vld [vmem:[%s1143_s1 + $0x298] sm:$0xff]  ;;  %v32_v53 = vld [vmem:[%s1143_s1 + $0x50] sm:$0xff]  ;;  %v343_v11 = vld [vmem:[%s1145_s3 + $0x68] sm:$0xff]  ;;  %s484_s18 = sshll.u32 %s523_s17, 4  ;;  %s486_s21 = sshll.u32 %s1147_s5, 4  ;;  %s485_s18 = int_to_ptr.vmem [resolvable:$true] %s484_s18  ;;  %s487_s21 = int_to_ptr.hbm [resolvable:$true] %s486_s21 }
  0x3b   :  { %182 = vmatmul.f32.vlgmr.msra.gmra.mxu0 %v162_v47  ;;  %222 = vmatmul.f32.vlgmr.msra.gmra.mxu2 %v162_v47  ;;  %v100_v54 = vld [vmem:[%s1143_s1 + $0x270] sm:$0xff]  ;;  %v33_v55 = vld [vmem:[%s1143_s1 + $0x58] sm:$0xff]  ;;  %v359_v12 = vld [vmem:[%s1145_s3 + $0xe8] sm:$0xff] }
  0x3c   :  { %258 = vmatpush.msrb.mxu0 %v36_v48  ;;  %277 = vmatpush.msrb.mxu1 %v104_v49  ;;  %v101_v56 = vld [vmem:[%s1143_s1 + $0x278] sm:$0xff]  ;;  %v28_v57 = vld [vmem:[%s1143_s1 + $0x30] sm:$0xff]  ;;  %v375_v13 = vld [vmem:[%s1145_s3 + $0x168] sm:$0xff] }
  0x3d   :  { %298 = vmatpush.msrb.mxu2 %v37_v50  ;;  %317 = vmatpush.msrb.mxu3 %v105_v51  ;;  %v96_v58 = vld [vmem:[%s1143_s1 + $0x250] sm:$0xff]  ;;  %v29_v59 = vld [vmem:[%s1143_s1 + $0x38] sm:$0xff]  ;;  %v391_v14 = vld [vmem:[%s1145_s3 + $0x1e8] sm:$0xff] }
  0x3e   :  { %202 = vmatmul.f32.vlgmr.msra.gmra.mxu1 %v163_v52  ;;  %242 = vmatmul.f32.vlgmr.msra.gmra.mxu3 %v163_v52  ;;  %v97_v60 = vld [vmem:[%s1143_s1 + $0x258] sm:$0xff]  ;;  %v24_v61 = vld [vmem:[%s1143_s1 + $0x10] sm:$0xff]  ;;  %v342_v15 = vld [vmem:[%s1145_s3 + $0x60] sm:$0xff] }
  0x3f   :  { %259 = vmatpush.msrb.mxu0 %v32_v53  ;;  %278 = vmatpush.msrb.mxu1 %v100_v54  ;;  %v92_v62 = vld [vmem:[%s1143_s1 + $0x230] sm:$0xff]  ;;  %v25_v63 = vld [vmem:[%s1143_s1 + $0x18] sm:$0xff]  ;;  %v358_v16 = vld [vmem:[%s1145_s3 + $0xe0] sm:$0xff] }
  0x40   :  { %299 = vmatpush.msrb.mxu2 %v33_v55  ;;  %318 = vmatpush.msrb.mxu3 %v101_v56  ;;  %v93_v0 = vld [vmem:[%s1143_s1 + $0x238] sm:$0xff]  ;;  %v88_v1 = vld [vmem:[%s1143_s1 + $0x210] sm:$0xff]  ;;  %v374_v17 = vld [vmem:[%s1145_s3 + $0x160] sm:$0xff] }
  0x41   :  { %260 = vmatpush.msrb.mxu0 %v28_v57  ;;  %279 = vmatpush.msrb.mxu1 %v96_v58  ;;  %v89_v2 = vld [vmem:[%s1143_s1 + $0x218] sm:$0xff]  ;;  %v344_v7 = vld [vmem:[%s1145_s3 + $0x70] sm:$0xff]  ;;  %v390_v18 = vld [vmem:[%s1145_s3 + $0x1e0] sm:$0xff] }
  0x42   :  { %300 = vmatpush.msrb.mxu2 %v29_v59  ;;  %319 = vmatpush.msrb.mxu3 %v97_v60  ;;  %v345_v3 = vld [vmem:[%s1145_s3 + $0x78] sm:$0xff]  ;;  %v360_v8 = vld [vmem:[%s1145_s3 + $0xf0] sm:$0xff]  ;;  %v339_v26 = vld [vmem:[%s1145_s3 + $0x48] sm:$0xff] }
  0x43   :  { %261 = vmatpush.msrb.mxu0 %v24_v61  ;;  %280 = vmatpush.msrb.mxu1 %v92_v62  ;;  %v361_v4 = vld [vmem:[%s1145_s3 + $0xf8] sm:$0xff]  ;;  %v376_v9 = vld [vmem:[%s1145_s3 + $0x170] sm:$0xff]  ;;  %v355_v27 = vld [vmem:[%s1145_s3 + $0xc8] sm:$0xff] }
  0x44   :  { %301 = vmatpush.msrb.mxu2 %v25_v63  ;;  %320 = vmatpush.msrb.mxu3 %v93_v0  ;;  %v377_v5 = vld [vmem:[%s1145_s3 + $0x178] sm:$0xff]  ;;  %v392_v10 = vld [vmem:[%s1145_s3 + $0x1f0] sm:$0xff]  ;;  %v371_v28 = vld [vmem:[%s1145_s3 + $0x148] sm:$0xff] }
  0x45   :  { %262 = vmatmul.f32.vlgmr.msrb.gmra.mxu0 %v162_v47  ;;  %302 = vmatmul.f32.vlgmr.msrb.gmra.mxu2 %v162_v47  ;;  %v393_v6 = vld [vmem:[%s1145_s3 + $0x1f8] sm:$0xff]  ;;  %v340_v23 = vld [vmem:[%s1145_s3 + $0x50] sm:$0xff]  ;;  %v338_v29 = vld [vmem:[%s1145_s3 + $0x40] sm:$0xff] }
  0x46   :  { %281 = vmatpush.msrb.mxu1 %v88_v1  ;;  %321 = vmatpush.msrb.mxu3 %v89_v2  ;;  %v341_v19 = vld [vmem:[%s1145_s3 + $0x58] sm:$0xff]  ;;  %v356_v24 = vld [vmem:[%s1145_s3 + $0xd0] sm:$0xff]  ;;  %v354_v30 = vld [vmem:[%s1145_s3 + $0xc0] sm:$0xff] }
  0x47   :  { %282 = vmatmul.f32.vlgmr.msrb.gmra.mxu1 %v163_v52  ;;  %322 = vmatmul.f32.vlgmr.msrb.gmra.mxu3 %v163_v52  ;;  %v357_v20 = vld [vmem:[%s1145_s3 + $0xd8] sm:$0xff]  ;;  %v372_v25 = vld [vmem:[%s1145_s3 + $0x150] sm:$0xff]  ;;  %v370_v31 = vld [vmem:[%s1145_s3 + $0x140] sm:$0xff] }
  0x48   :  { %398 = vmatpush.msra.mxu0 %v345_v3  ;;  %418 = vmatpush.msra.mxu1 %v361_v4  ;;  %v373_v21 = vld [vmem:[%s1145_s3 + $0x158] sm:$0xff]  ;;  %v336_v34 = vld [vmem:[%s1145_s3 + $0x30] sm:$0xff]  ;;  %v335_v35 = vld [vmem:[%s1145_s3 + $0x28] sm:$0xff] }
  0x49   :  { %438 = vmatpush.msra.mxu2 %v377_v5  ;;  %458 = vmatpush.msra.mxu3 %v393_v6  ;;  %v389_v22 = vld [vmem:[%s1145_s3 + $0x1d8] sm:$0xff]  ;;  %v352_v36 = vld [vmem:[%s1145_s3 + $0xb0] sm:$0xff]  ;;  %v334_v39 = vld [vmem:[%s1145_s3 + $0x20] sm:$0xff] }
  0x4a   :  { %399 = vmatpush.msra.mxu0 %v344_v7  ;;  %419 = vmatpush.msra.mxu1 %v360_v8  ;;  %v337_v32 = vld [vmem:[%s1145_s3 + $0x38] sm:$0xff]  ;;  %v388_v38 = vld [vmem:[%s1145_s3 + $0x1d0] sm:$0xff]  ;;  %v351_v40 = vld [vmem:[%s1145_s3 + $0xa8] sm:$0xff] }
  0x4b   :  { %439 = vmatpush.msra.mxu2 %v376_v9  ;;  %459 = vmatpush.msra.mxu3 %v392_v10  ;;  %v353_v33 = vld [vmem:[%s1145_s3 + $0xb8] sm:$0xff]  ;;  %v368_v41 = vld [vmem:[%s1145_s3 + $0x130] sm:$0xff]  ;;  %v387_v42 = vld [vmem:[%s1145_s3 + $0x1c8] sm:$0xff] }
  0x4c   :  { %400 = vmatpush.msra.mxu0 %v343_v11  ;;  %420 = vmatpush.msra.mxu1 %v359_v12  ;;  %v369_v37 = vld [vmem:[%s1145_s3 + $0x138] sm:$0xff]  ;;  %v350_v44 = vld [vmem:[%s1145_s3 + $0xa0] sm:$0xff]  ;;  %v367_v45 = vld [vmem:[%s1145_s3 + $0x128] sm:$0xff] }
  0x4d   :  { %440 = vmatpush.msra.mxu2 %v375_v13  ;;  %460 = vmatpush.msra.mxu3 %v391_v14  ;;  %v333_v43 = vld [vmem:[%s1145_s3 + $0x18] sm:$0xff]  ;;  %v386_v46 = vld [vmem:[%s1145_s3 + $0x1c0] sm:$0xff]  ;;  %v332_v47 = vld [vmem:[%s1145_s3 + $0x10] sm:$0xff] }
  0x4e   :  { %401 = vmatpush.msra.mxu0 %v342_v15  ;;  %421 = vmatpush.msra.mxu1 %v358_v16  ;;  %v349_v48 = vld [vmem:[%s1145_s3 + $0x98] sm:$0xff]  ;;  %v366_v49 = vld [vmem:[%s1145_s3 + $0x120] sm:$0xff]  ;;  %v331_v51 = vld [vmem:[%s1145_s3 + $0x8] sm:$0xff] }
  0x4f   :  { %441 = vmatpush.msra.mxu2 %v374_v17  ;;  %461 = vmatpush.msra.mxu3 %v390_v18  ;;  %v385_v50 = vld [vmem:[%s1145_s3 + $0x1b8] sm:$0xff]  ;;  %v348_v52 = vld [vmem:[%s1145_s3 + $0x90] sm:$0xff]  ;;  %v330_v55 = vld [vmem:[%s1145_s3] sm:$0xff] }
  0x50   :  { %402 = vmatpush.msra.mxu0 %v341_v19  ;;  %422 = vmatpush.msra.mxu1 %v357_v20  ;;  %v365_v53 = vld [vmem:[%s1145_s3 + $0x118] sm:$0xff]  ;;  %v384_v54 = vld [vmem:[%s1145_s3 + $0x1b0] sm:$0xff]  ;;  %v347_v56 = vld [vmem:[%s1145_s3 + $0x88] sm:$0xff] }
  0x51   :  { %442 = vmatpush.msra.mxu2 %v373_v21  ;;  %462 = vmatpush.msra.mxu3 %v389_v22  ;;  %v364_v57 = vld [vmem:[%s1145_s3 + $0x110] sm:$0xff]  ;;  %v383_v58 = vld [vmem:[%s1145_s3 + $0x1a8] sm:$0xff]  ;;  %v346_v59 = vld [vmem:[%s1145_s3 + $0x80] sm:$0xff] }
  0x52   :  { %403 = vmatpush.msra.mxu0 %v340_v23  ;;  %423 = vmatpush.msra.mxu1 %v356_v24  ;;  %v363_v60 = vld [vmem:[%s1145_s3 + $0x108] sm:$0xff]  ;;  %v382_v61 = vld [vmem:[%s1145_s3 + $0x1a0] sm:$0xff]  ;;  %v381_v63 = vld [vmem:[%s1145_s3 + $0x198] sm:$0xff] }
  0x53   :  { %443 = vmatpush.msra.mxu2 %v372_v25  ;;  %463 = vmatpush.msra.mxu3 %v388_v38  ;;  %v362_v62 = vld [vmem:[%s1145_s3 + $0x100] sm:$0xff]  ;;  %v380_v0 = vld [vmem:[%s1145_s3 + $0x190] sm:$0xff]  ;;  %v379_v1 = vld [vmem:[%s1145_s3 + $0x188] sm:$0xff] }
  0x54   :  { %404 = vmatpush.msra.mxu0 %v339_v26  ;;  %424 = vmatpush.msra.mxu1 %v355_v27  ;;  %v378_v2 = vld [vmem:[%s1145_s3 + $0x180] sm:$0xff] }
  0x55   :  { %444 = vmatpush.msra.mxu2 %v371_v28  ;;  %464 = vmatpush.msra.mxu3 %v387_v42  ;;  %v150_v3 = vld [vmem:[%s1144_s2] sm:$0xf] }
  0x56   :  { %405 = vmatpush.msra.mxu0 %v338_v29  ;;  %425 = vmatpush.msra.mxu1 %v354_v30  ;;  %v152_v4 = vperm.slane %v150_v3, 0  ;;  %v153_v8 = vperm.slane %v150_v3, 1  ;;  %v154_v13 = vperm.slane %v150_v3, 2  ;;  %v155_v21 = vperm.slane %v150_v3, 3  ;;  %v496_v28 = vld [vmem:[%s1146_s4] ss:$0 sm:$0xff] }
  0x57   :  { %445 = vmatpush.msra.mxu2 %v370_v31  ;;  %465 = vmatpush.msra.mxu3 %v386_v46 }
  0x58   :  { %406 = vmatpush.msra.mxu0 %v337_v32  ;;  %426 = vmatpush.msra.mxu1 %v353_v33 }
  0x59   :  { %446 = vmatpush.msra.mxu2 %v369_v37  ;;  %466 = vmatpush.msra.mxu3 %v385_v50 }
  0x5a   :  { %407 = vmatpush.msra.mxu0 %v336_v34  ;;  %427 = vmatpush.msra.mxu1 %v352_v36 }
  0x5b   :  { %447 = vmatpush.msra.mxu2 %v368_v41  ;;  %467 = vmatpush.msra.mxu3 %v384_v54 }
  0x5c   :  { %408 = vmatpush.msra.mxu0 %v335_v35  ;;  %428 = vmatpush.msra.mxu1 %v351_v40 }
  0x5d   :  { %448 = vmatpush.msra.mxu2 %v367_v45  ;;  %468 = vmatpush.msra.mxu3 %v383_v58 }
  0x5e   :  { %409 = vmatpush.msra.mxu0 %v334_v39  ;;  %429 = vmatpush.msra.mxu1 %v350_v44 }
  0x5f   :  { %449 = vmatpush.msra.mxu2 %v366_v49  ;;  %469 = vmatpush.msra.mxu3 %v382_v61 }
  0x60   :  { %410 = vmatpush.msra.mxu0 %v333_v43  ;;  %430 = vmatpush.msra.mxu1 %v349_v48 }
  0x61   :  { %450 = vmatpush.msra.mxu2 %v365_v53  ;;  %470 = vmatpush.msra.mxu3 %v381_v63 }
  0x62   :  { %411 = vmatpush.msra.mxu0 %v332_v47  ;;  %431 = vmatpush.msra.mxu1 %v348_v52 }
  0x63   :  { %451 = vmatpush.msra.mxu2 %v364_v57  ;;  %471 = vmatpush.msra.mxu3 %v380_v0 }
  0x64   :  { %412 = vmatpush.msra.mxu0 %v331_v51  ;;  %432 = vmatpush.msra.mxu1 %v347_v56 }
  0x65   :  { %452 = vmatpush.msra.mxu2 %v363_v60  ;;  %472 = vmatpush.msra.mxu3 %v379_v1 }
  0x66   :  { %413 = vmatpush.msra.mxu0 %v330_v55  ;;  %433 = vmatpush.msra.mxu1 %v346_v59 }
  0x67   :  { %453 = vmatpush.msra.mxu2 %v362_v62  ;;  %473 = vmatpush.msra.mxu3 %v378_v2 }
  0xb8   :  { %v183_v5 = vpop.f32.mrf.mxu0 }
  0xb9   :  { %v184_v6 = vadd.f32 %v183_v5, %v152_v4 }
  0xbb   :  { %v203_v7 = vpop.f32.mrf.mxu1 }
  0xbc   :  { %v204_v9 = vadd.f32 %v203_v7, %v184_v6 }
  0xbe   :  { %v326_v10 = vmax.f32 %v204_v9, 0.0  ;;  %v223_v11 = vpop.f32.mrf.mxu2 }
  0xbf   :  { %v224_v12 = vadd.f32 %v223_v11, %v153_v8 }
  0xc0   :  { %414 = vmatmul.f32.vlgmr.msra.gmra.mxu0 %v326_v10 }
  0xc1   :  { %v243_v14 = vpop.f32.mrf.mxu3 }
  0xc2   :  { %v244_v15 = vadd.f32 %v243_v14, %v224_v12  ;;  %v263_v16 = vpop.f32.mrf.mxu0 }
  0xc3   :  { %v264_v17 = vadd.f32 %v263_v16, %v154_v13 }
  0xc4   :  { %v327_v18 = vmax.f32 %v244_v15, 0.0  ;;  %v283_v19 = vpop.f32.mrf.mxu1 }
  0xc5   :  { %v284_v20 = vadd.f32 %v283_v19, %v264_v17 }
  0xc6   :  { %434 = vmatmul.f32.vlgmr.msra.gmra.mxu1 %v327_v18 }
  0xc7   :  { %v328_v22 = vmax.f32 %v284_v20, 0.0 }
  0xc8   :  { %v303_v23 = vpop.f32.mrf.mxu2 }
  0xc9   :  { %v304_v24 = vadd.f32 %v303_v23, %v155_v21  ;;  %454 = vmatmul.f32.vlgmr.msra.gmra.mxu2 %v328_v22 }
  0xca   :  { %v323_v25 = vpop.f32.mrf.mxu3 }
  0xcb   :  { %v324_v26 = vadd.f32 %v323_v25, %v304_v24 }
  0xcd   :  { %v329_v27 = vmax.f32 %v324_v26, 0.0 }
  0xcf   :  { %474 = vmatmul.f32.vlgmr.msra.gmra.mxu3 %v329_v27 }
 0x13d   :  { %v415_v29 = vpop.f32.mrf.mxu0 }
 0x13e   :  { %v416_v30 = vadd.f32 %v496_v28, %v415_v29 }
 0x143   :  { %v435_v31 = vpop.f32.mrf.mxu1 }
 0x144   :  { %v436_v33 = vadd.f32 %v435_v31, %v416_v30 }
 0x14c   :  { %v455_v32 = vpop.f32.mrf.mxu2 }
 0x14d   :  { %v456_v34 = vadd.f32 %v455_v32, %v436_v33 }
 0x152   :  { %v475_v35 = vpop.f32.mrf.mxu3 }
 0x153   :  { %v476_v36 = vadd.f32 %v475_v35, %v456_v34 }
 0x155   :  { %478 = vst [vmem:[#allocation2] sm:$0xf] %v476_v36 }
 0x156   :  { %489 = dma.vmem_to_hbm [thread:$0]  %s485_s18, 64, %s487_s21, [#allocation3]  }
 0x157   :  { %521 = dma.done.wait [#allocation3], 64  }
 0x158   :  { %522 = vsyncadd [#allocation3], 4294967232 }
 0x159   :  { %494 = vsyncpa [#allocation3], 1 }

</bundles_post_ra>
